<compile_context>
chip_gen: v7x
topology: tpu7x:2x2x1
jax: 0.10.0
libtpu: 0.0.40
codegen_flags: <defaults>
</compile_context>

<pallas_src>
import functools

import jax
import jax.numpy as jnp
from jax.experimental import pallas as pl
from jax.experimental.pallas import tpu as pltpu


# -----------------------------------------------------------------------------
# Fused Pallas kernel: bi-LSTM layer 0 -> bi-LSTM layer 1 -> MLP head
# -----------------------------------------------------------------------------
def _lstm_model_kernel(len_ref, x_ref,
                       wih0_ref, whh0_ref, b0_ref,
                       wih1_ref, whh1_ref, b1_ref,
                       w1_ref, bf1_ref, w2_ref, bf2_ref,
                       o_ref,
                       gx_sc, seq0_sc,
                       *, seq_len, hidden):
    """One batch-block of the whole model.

    len_ref : (BB, 2H) int32  per-row valid length, broadcast over lanes
    x_ref   : (T, BB, Dp)     embedded input (lane/sublane padded)
    wih*    : (Dp|2H, 8H)     merged fwd+rev input weights, interleaved gate cols
    whh*    : (2H, 8H)        block-diagonal recurrent weights, interleaved gate cols
    b*      : (1, 8H) f32     combined bias (b_ih + b_hh), interleaved gate cols
    w1/bf1  : (2H, 2H)/(1,2H) fc1
    w2/bf2  : (2H,128)/(1,128) out layer, lane-padded (only column 0 is real)
    o_ref   : (BB, 128) f32   sigmoid(out) in lane 0
    gx_sc   : (T, BB, 8H) f32 hoisted input-projection scratch (reused by both layers)
    seq0_sc : (T, BB, 2H) f32 layer-0 per-timestep output (never leaves VMEM)
    """
    T, H = seq_len, hidden
    H2 = 2 * H
    G = 8 * H
    BB = o_ref.shape[0]
    Dp = x_ref.shape[-1]
    wdt = wih0_ref.dtype                       # matmul operand dtype (f32 or bf16)
    unroll = min(8, T)                         # opt #8: modest unroll, not full

    # ---- Loop-invariant masks / lengths (hoisted once per kernel invocation).
    lens = len_ref[...]                                            # (BB, 2H) int32
    lane2 = jax.lax.broadcasted_iota(jnp.int32, (BB, H2), 1)
    is_fwd2 = lane2 < H                                            # fwd half of the state
    gl = jax.lax.broadcasted_iota(jnp.int32, (BB, G), 1)
    is_fwd8 = gl < 0                                               # fwd halves of all 4 gates
    for k in range(4):
        lo = k * H2
        is_fwd8 = jnp.logical_or(is_fwd8,
                                 jnp.logical_and(gl >= lo, gl < lo + H))

    def run_layer(x_flat, wih_ref, whh_ref, b_ref, emit_seq):
        # Hoisted input projection for ALL timesteps, bias folded in (opts #1, #4):
        # one MXU matmul per layer, one gx scratch.
        gx_sc[...] = (jnp.dot(x_flat.astype(wdt), wih_ref[...],
                              preferred_element_type=jnp.float32)
                      + b_ref[...]).reshape(T, BB, G)
        whh = whh_ref[...]                                         # (2H, 8H)

        def step(t, carry):
            h, c = carry                     # (BB, 2H) f32; [:, :H]=fwd, [:, H:]=rev
            t_rev = T - 1 - t
            # Fwd gate lanes take gx[t], rev gate lanes take gx[T-1-t]: one vselect.
            gates = (jnp.where(is_fwd8, gx_sc[t], gx_sc[t_rev])
                     + jnp.dot(h.astype(wdt), whh,
                               preferred_element_type=jnp.float32))   # (BB, 8H)
            i_g = jax.nn.sigmoid(gates[:, 0 * H2:1 * H2])
            f_g = jax.nn.sigmoid(gates[:, 1 * H2:2 * H2])
            g_g = jnp.tanh(gates[:, 2 * H2:3 * H2])
            o_g = jax.nn.sigmoid(gates[:, 3 * H2:4 * H2])
            c_new = f_g * c + i_g * g_g
            h_new = o_g * jnp.tanh(c_new)

            # Packed-sequence mask: fwd half valid iff t < len, rev half iff t_rev < len.
            valid = jnp.where(is_fwd2, t, t_rev) < lens              # (BB, 2H) bool
            h = jnp.where(valid, h_new, h)
            c = jnp.where(valid, c_new, c)

            if emit_seq:                       # only layer 0 needs per-timestep output
                emit = jnp.where(valid, h, 0.0)  # pad_packed_sequence pads with 0
                seq0_sc[t, :, :H] = emit[:, :H]          # forward output @ time t
                seq0_sc[t_rev, :, H:] = emit[:, H:]      # reverse output @ time T-1-t
            return h, c

        h0 = jnp.zeros((BB, H2), jnp.float32)
        h_fin, _ = jax.lax.fori_loop(0, T, step, (h0, h0), unroll=unroll)
        return h_fin

    # Layer 0: per-timestep output stays in VMEM (seq0_sc); final state unused.
    run_layer(x_ref[...].reshape(T * BB, Dp), wih0_ref, whh0_ref, b0_ref, True)
    # Layer 1: only the final fused h-state is needed (opt #3).
    enc = run_layer(seq0_sc[...].reshape(T * BB, H2), wih1_ref, whh1_ref, b1_ref, False)
    # enc == [forward output @ last valid t | reverse output @ t=0]  (top layer)

    # Head: fc1 -> ReLU -> out -> sigmoid (dropout = identity at inference).
    hdn = jnp.maximum(
        jnp.dot(enc.astype(wdt), w1_ref[...], preferred_element_type=jnp.float32)
        + bf1_ref[...], 0.0)
    logit = (jnp.dot(hdn.astype(wdt), w2_ref[...], preferred_element_type=jnp.float32)
             + bf2_ref[...])                                        # (BB, 128) lane-dense
    o_ref[...] = jax.nn.sigmoid(logit)


# -----------------------------------------------------------------------------
# Wrapper
# -----------------------------------------------------------------------------
def lstm_model_forward(packed, text, text_len):
    """text: (B, T) int32 token ids; text_len: (B,) int32 valid lengths. Returns (B,)."""
    wih0, whh0, b0 = packed["l0"]
    wih1, whh1, b1l = packed["l1"]
    wdt = wih0.dtype
    H2 = whh0.shape[0]
    H = H2 // 2
    G = 8 * H
    Ep = wih0.shape[0]
    B, T = text.shape

    # Batch padding: sublane multiple of 8; if the batch allows, split it into two
    # blocks so the ("parallel",) grid axis can use both TensorCores on v7x (opt #2).
    if B > 8:
        n_blk = 2
        Bp = ((B + 15) // 16) * 16
    else:
        n_blk = 1
        Bp = 8
    BB = Bp // n_blk

    # Embedding lookup — gather stays in plain JAX (glue).
    emb = packed["embedding"][text]                               # (B, T, E)
    E = emb.shape[-1]
    x = jnp.transpose(emb, (1, 0, 2))                             # (T, B, E)
    x = jnp.pad(x, ((0, 0), (0, Bp - B), (0, Ep - E))).astype(wdt)  # (T, Bp, Ep)

    lens = jnp.pad(text_len.astype(jnp.int32), (0, Bp - B))       # padded rows -> len 0
    lens_b2h = jnp.broadcast_to(lens[:, None], (Bp, H2)).astype(jnp.int32)

    def const_spec(shape):
        return pl.BlockSpec(shape, lambda b: tuple(0 for _ in shape))

    kern = functools.partial(_lstm_model_kernel, seq_len=T, hidden=H)
    probs = pl.pallas_call(
        kern,
        out_shape=jax.ShapeDtypeStruct((Bp, 128), jnp.float32),
        grid=(n_blk,),
        in_specs=[
            pl.BlockSpec((BB, H2), lambda b: (b, 0)),             # lens (lane-dense)
            pl.BlockSpec((T, BB, Ep), lambda b: (0, b, 0)),       # x
            const_spec((Ep, G)),                                  # wih0 (merged fwd+rev)
            const_spec((H2, G)),                                  # whh0
            const_spec((1, G)),                                   # b0
            const_spec((H2, G)),                                  # wih1
            const_spec((H2, G)),                                  # whh1
            const_spec((1, G)),                                   # b1
            const_spec((H2, H2)),                                 # fc1 weight
            const_spec((1, H2)),                                  # fc1 bias
            const_spec((H2, 128)),                                # out weight (lane-padded)
            const_spec((1, 128)),                                 # out bias (lane-padded)
        ],
        out_specs=pl.BlockSpec((BB, 128), lambda b: (b, 0)),
        scratch_shapes=[pltpu.VMEM((T, BB, G), jnp.float32),      # gx (shared by both layers)
                        pltpu.VMEM((T, BB, H2), jnp.float32)],    # layer-0 seq output
        compiler_params=pltpu.CompilerParams(
            dimension_semantics=("parallel",),
            # Raises v5e's 16 MiB default scoped limit; stays under v7x's 64 MiB physical.
            vmem_limit_bytes=48 * 1024 * 1024),
    )(lens_b2h, x, wih0, whh0, b0, wih1, whh1, b1l,
      packed["w1"], packed["b1"], packed["w2"], packed["b2"])
    return probs[:B, 0]                                           # lane 0, valid rows


# -----------------------------------------------------------------------------
# Parameter init (PyTorch-equivalent layout) and packing into the fused layout
# -----------------------------------------------------------------------------
def init_params(key, vocab_size, embed_dim, hidden):
    keys = iter(jax.random.split(key, 32))
    k_lstm = 1.0 / jnp.sqrt(hidden)

    def lstm_dir(in_dim):
        w_ih = jax.random.uniform(next(keys), (4 * hidden, in_dim),
                                  minval=-k_lstm, maxval=k_lstm, dtype=jnp.float32)
        w_hh = jax.random.uniform(next(keys), (4 * hidden, hidden),
                                  minval=-k_lstm, maxval=k_lstm, dtype=jnp.float32)
        b_ih = jax.random.uniform(next(keys), (4 * hidden,),
                                  minval=-k_lstm, maxval=k_lstm, dtype=jnp.float32)
        b_hh = jax.random.uniform(next(keys), (4 * hidden,),
                                  minval=-k_lstm, maxval=k_lstm, dtype=jnp.float32)
        # reference layout: (in, 4H), (H, 4H), combined bias (1, 4H); gate order i,f,g,o
        return (w_ih.T, w_hh.T, (b_ih + b_hh)[None, :])

    two_h = 2 * hidden
    k_fc = 1.0 / jnp.sqrt(two_h)
    return {
        "embedding": jax.random.normal(next(keys), (vocab_size, embed_dim),
                                       dtype=jnp.float32),
        "l0_f": lstm_dir(embed_dim),
        "l0_r": lstm_dir(embed_dim),
        "l1_f": lstm_dir(two_h),
        "l1_r": lstm_dir(two_h),
        "w1": jax.random.uniform(next(keys), (two_h, two_h),
                                 minval=-k_fc, maxval=k_fc, dtype=jnp.float32),
        "b1": jax.random.uniform(next(keys), (1, two_h),
                                 minval=-k_fc, maxval=k_fc, dtype=jnp.float32),
        "w2": jax.random.uniform(next(keys), (two_h, 1),
                                 minval=-k_fc, maxval=k_fc, dtype=jnp.float32),
        "b2": jax.random.uniform(next(keys), (1, 1),
                                 minval=-k_fc, maxval=k_fc, dtype=jnp.float32),
    }


def _scatter_gate_cols(w, d, hidden):
    """Place the 4 gate blocks of one direction (d=0 fwd, d=1 rev) into the
    interleaved [i_f i_r | f_f f_r | g_f g_r | o_f o_r] layout (each block H wide)."""
    H = hidden
    G = 8 * H
    out = jnp.zeros((w.shape[0], G), jnp.float32)
    for k in range(4):                         # gate k of [i, f, g, o]
        out = out.at[:, (2 * k + d) * H:(2 * k + d + 1) * H].set(w[:, k * H:(k + 1) * H])
    return out


def _pack_bidir(pf, pr, in_pad, hidden, wdt):
    """Pack one fwd + one rev direction into the merged fused layout (opt #1)."""
    w_ih_f, w_hh_f, b_f = pf
    w_ih_r, w_hh_r, b_r = pr
    H = hidden
    G = 8 * H
    d_in = w_ih_f.shape[0]
    # ONE merged input-projection matrix: fwd weights in fwd gate lanes, rev in rev lanes.
    wih_merged = _scatter_gate_cols(w_ih_f, 0, H) + _scatter_gate_cols(w_ih_r, 1, H)
    wih = jnp.zeros((in_pad, G), jnp.float32).at[:d_in].set(wih_merged)
    whh = jnp.concatenate([_scatter_gate_cols(w_hh_f, 0, H),        # block-diagonal
                           _scatter_gate_cols(w_hh_r, 1, H)], axis=0)   # (2H, 8H)
    b = _scatter_gate_cols(b_f, 0, H) + _scatter_gate_cols(b_r, 1, H)   # (1, 8H)
    return wih.astype(wdt), whh.astype(wdt), b.astype(jnp.float32)


def pack_params(params, hidden, weight_dtype=jnp.bfloat16):
    """bf16 matmul operands by default (MXU-native on v5e/v6e/v7x), f32 accumulation."""
    E = params["embedding"].shape[1]
    Ep = ((E + 127) // 128) * 128              # lane-align the embedding dim (300 -> 384)
    H2 = 2 * hidden
    w2p = jnp.zeros((H2, 128), jnp.float32).at[:, :1].set(params["w2"])   # lane-pad (opt #12)
    b2p = jnp.zeros((1, 128), jnp.float32).at[:, :1].set(params["b2"])
    return {
        "embedding": params["embedding"],
        "l0": _pack_bidir(params["l0_f"], params["l0_r"], Ep, hidden, weight_dtype),
        "l1": _pack_bidir(params["l1_f"], params["l1_r"], H2, hidden, weight_dtype),
        "w1": params["w1"].astype(weight_dtype),
        "b1": params["b1"].astype(jnp.float32),
        "w2": w2p.astype(weight_dtype),
        "b2": b2p.astype(jnp.float32),
    }


# -----------------------------------------------------------------------------
# Pure-JAX reference (same masked-packed semantics) for a correctness check
# -----------------------------------------------------------------------------
def _ref_lstm_dir(x_seq, lens, w_ih, w_hh, b, reverse):
    T, B, _ = x_seq.shape
    H = w_hh.shape[0]

    def step(carry, t):
        h, c = carry
        xt = x_seq[t]
        gates = (jnp.dot(xt, w_ih, precision=jax.lax.Precision.HIGHEST)
                 + jnp.dot(h, w_hh, precision=jax.lax.Precision.HIGHEST) + b)
        i = jax.nn.sigmoid(gates[:, :H])
        f = jax.nn.sigmoid(gates[:, H:2 * H])
        g = jnp.tanh(gates[:, 2 * H:3 * H])
        o = jax.nn.sigmoid(gates[:, 3 * H:])
        cn = f * c + i * g
        hn = o * jnp.tanh(cn)
        m = (t < lens)[:, None].astype(jnp.float32)
        h2 = m * hn + (1.0 - m) * h
        c2 = m * cn + (1.0 - m) * c
        return (h2, c2), m * h2

    ts = jnp.arange(T)
    if reverse:
        ts = ts[::-1]
    init = (jnp.zeros((B, H), jnp.float32), jnp.zeros((B, H), jnp.float32))
    _, ys = jax.lax.scan(step, init, ts)
    if reverse:
        ys = ys[::-1]
    return ys


def _ref_forward(params, text, text_len):
    emb = params["embedding"][text]
    x = jnp.transpose(emb, (1, 0, 2)).astype(jnp.float32)
    lens = text_len.astype(jnp.int32)

    def layer(xi, pf, pr):
        f = _ref_lstm_dir(xi, lens, *pf, reverse=False)
        r = _ref_lstm_dir(xi, lens, *pr, reverse=True)
        return jnp.concatenate([f, r], axis=-1)

    h1 = layer(x, params["l0_f"], params["l0_r"])
    h2 = layer(h1, params["l1_f"], params["l1_r"])
    out = jnp.transpose(h2, (1, 0, 2))
    B = out.shape[0]
    H = params["l0_f"][1].shape[0]
    enc = jnp.concatenate([out[jnp.arange(B), text_len - 1, :H],
                           out[:, 0, H:]], axis=1)
    h = jnp.maximum(jnp.dot(enc, params["w1"],
                            precision=jax.lax.Precision.HIGHEST) + params["b1"], 0.0)
    logit = jnp.dot(h, params["w2"],
                    precision=jax.lax.Precision.HIGHEST) + params["b2"]
    return jax.nn.sigmoid(logit)[:, 0]


# -----------------------------------------------------------------------------
if __name__ == "__main__":
    VOCAB, EMBED, HIDDEN = 50, 300, 64
    B, T = 4, 8

    key = jax.random.PRNGKey(0)
    k_p, k_tok = jax.random.split(key, 2)

    params = init_params(k_p, VOCAB, EMBED, HIDDEN)
    text = jax.random.randint(k_tok, (B, T), 0, VOCAB, dtype=jnp.int32)
    text_len = jnp.array([8, 5, 3, 6], dtype=jnp.int32)   # valid lengths <= T

    ref = _ref_forward(params, text, text_len)

    # f32 matmul operands — strict check against the f32 reference.
    packed_f32 = pack_params(params, HIDDEN, jnp.float32)
    probs = jax.block_until_ready(jax.jit(lstm_model_forward)(packed_f32, text, text_len))
    assert probs.shape == (B,)
    assert jnp.allclose(probs, ref, atol=2e-3), (probs, ref)

    # bf16 matmul operands with f32 accumulation (MXU-native everywhere) — looser check.
    packed_bf16 = pack_params(params, HIDDEN, jnp.bfloat16)
    probs16 = jax.block_until_ready(jax.jit(lstm_model_forward)(packed_bf16, text, text_len))
    assert probs16.shape == (B,)
    assert jnp.allclose(probs16, ref, atol=2e-2), (probs16, ref)

    print("KERNEL_OK")
</pallas_src>

<mosaic_0001>
module attributes {stable_mosaic.version = 11 : i64} {
  func.func @_lstm_model_kernel(%arg0: i32, %arg1: memref<8x128xi32, #tpu.memory_space<vmem>>, %arg2: memref<8x8x384xf32, #tpu.memory_space<vmem>>, %arg3: memref<384x512xf32, #tpu.memory_space<vmem>>, %arg4: memref<128x512xf32, #tpu.memory_space<vmem>>, %arg5: memref<1x512xf32, #tpu.memory_space<vmem>>, %arg6: memref<128x512xf32, #tpu.memory_space<vmem>>, %arg7: memref<128x512xf32, #tpu.memory_space<vmem>>, %arg8: memref<1x512xf32, #tpu.memory_space<vmem>>, %arg9: memref<128x128xf32, #tpu.memory_space<vmem>>, %arg10: memref<1x128xf32, #tpu.memory_space<vmem>>, %arg11: memref<128x128xf32, #tpu.memory_space<vmem>>, %arg12: memref<1x128xf32, #tpu.memory_space<vmem>>, %arg13: memref<8x128xf32, #tpu.memory_space<vmem>>, %arg14: memref<8x8x512xf32, #tpu.memory_space<vmem>>, %arg15: memref<8x8x128xf32, #tpu.memory_space<vmem>>) attributes {dimension_semantics = [#tpu.dimension_semantics<parallel>], iteration_bounds = array<i64: 1>, scalar_prefetch = 0 : i64, scratch_operands = 2 : i64, tpu.core_type = #tpu.core_type<tc>, window_params = [{transform_indices = @transform_0, window_bounds = array<i64: 8, 128>}, {transform_indices = @transform_1, window_bounds = array<i64: 8, 8, 384>}, {pipeline_mode = #tpu.pipeline_mode<synchronous>, transform_indices = @transform_2, window_bounds = array<i64: 384, 512>}, {pipeline_mode = #tpu.pipeline_mode<synchronous>, transform_indices = @transform_3, window_bounds = array<i64: 128, 512>}, {pipeline_mode = #tpu.pipeline_mode<synchronous>, transform_indices = @transform_4, window_bounds = array<i64: 1, 512>}, {pipeline_mode = #tpu.pipeline_mode<synchronous>, transform_indices = @transform_5, window_bounds = array<i64: 128, 512>}, {pipeline_mode = #tpu.pipeline_mode<synchronous>, transform_indices = @transform_6, window_bounds = array<i64: 128, 512>}, {pipeline_mode = #tpu.pipeline_mode<synchronous>, transform_indices = @transform_7, window_bounds = array<i64: 1, 512>}, {pipeline_mode = #tpu.pipeline_mode<synchronous>, transform_indices = @transform_8, window_bounds = array<i64: 128, 128>}, {pipeline_mode = #tpu.pipeline_mode<synchronous>, transform_indices = @transform_9, window_bounds = array<i64: 1, 128>}, {pipeline_mode = #tpu.pipeline_mode<synchronous>, transform_indices = @transform_10, window_bounds = array<i64: 128, 128>}, {pipeline_mode = #tpu.pipeline_mode<synchronous>, transform_indices = @transform_11, window_bounds = array<i64: 1, 128>}, {transform_indices = @transform_12, window_bounds = array<i64: 8, 128>}]} {
    %c0 = arith.constant 0 : index
    %c0_0 = arith.constant 0 : index
    %0 = vector.load %arg1[%c0, %c0_0] : memref<8x128xi32, #tpu.memory_space<vmem>>, vector<8x128xi32>
    %1 = tpu.iota {dimensions = array<i32: 1>} : vector<8x128xi32>
    %c64_i32 = arith.constant 64 : i32
    %2 = vector.broadcast %c64_i32 : i32 to vector<8x128xi32>
    %3 = arith.cmpi slt, %1, %2 : vector<8x128xi32>
    %4 = tpu.iota {dimensions = array<i32: 1>} : vector<8x512xi32>
    %c0_i32 = arith.constant 0 : i32
    %5 = vector.broadcast %c0_i32 : i32 to vector<8x512xi32>
    %6 = arith.cmpi slt, %4, %5 : vector<8x512xi32>
    %c0_i32_1 = arith.constant 0 : i32
    %7 = vector.broadcast %c0_i32_1 : i32 to vector<8x512xi32>
    %8 = arith.cmpi sge, %4, %7 : vector<8x512xi32>
    %c64_i32_2 = arith.constant 64 : i32
    %9 = vector.broadcast %c64_i32_2 : i32 to vector<8x512xi32>
    %10 = arith.cmpi slt, %4, %9 : vector<8x512xi32>
    %11 = arith.andi %8, %10 : vector<8x512xi1>
    %12 = arith.ori %6, %11 : vector<8x512xi1>
    %c128_i32 = arith.constant 128 : i32
    %13 = vector.broadcast %c128_i32 : i32 to vector<8x512xi32>
    %14 = arith.cmpi sge, %4, %13 : vector<8x512xi32>
    %c192_i32 = arith.constant 192 : i32
    %15 = vector.broadcast %c192_i32 : i32 to vector<8x512xi32>
    %16 = arith.cmpi slt, %4, %15 : vector<8x512xi32>
    %17 = arith.andi %14, %16 : vector<8x512xi1>
    %18 = arith.ori %12, %17 : vector<8x512xi1>
    %c256_i32 = arith.constant 256 : i32
    %19 = vector.broadcast %c256_i32 : i32 to vector<8x512xi32>
    %20 = arith.cmpi sge, %4, %19 : vector<8x512xi32>
    %c320_i32 = arith.constant 320 : i32
    %21 = vector.broadcast %c320_i32 : i32 to vector<8x512xi32>
    %22 = arith.cmpi slt, %4, %21 : vector<8x512xi32>
    %23 = arith.andi %20, %22 : vector<8x512xi1>
    %24 = arith.ori %18, %23 : vector<8x512xi1>
    %c384_i32 = arith.constant 384 : i32
    %25 = vector.broadcast %c384_i32 : i32 to vector<8x512xi32>
    %26 = arith.cmpi sge, %4, %25 : vector<8x512xi32>
    %c448_i32 = arith.constant 448 : i32
    %27 = vector.broadcast %c448_i32 : i32 to vector<8x512xi32>
    %28 = arith.cmpi slt, %4, %27 : vector<8x512xi32>
    %29 = arith.andi %26, %28 : vector<8x512xi1>
    %30 = arith.ori %24, %29 : vector<8x512xi1>
    %c0_3 = arith.constant 0 : index
    %c0_4 = arith.constant 0 : index
    %c0_5 = arith.constant 0 : index
    %31 = vector.load %arg2[%c0_3, %c0_4, %c0_5] : memref<8x8x384xf32, #tpu.memory_space<vmem>>, vector<8x8x384xf32>
    %32 = vector.shape_cast %31 : vector<8x8x384xf32> to vector<64x384xf32>
    %c0_6 = arith.constant 0 : index
    %c0_7 = arith.constant 0 : index
    %33 = vector.load %arg3[%c0_6, %c0_7] : memref<384x512xf32, #tpu.memory_space<vmem>>, vector<384x512xf32>
    %cst = arith.constant dense<0.000000e+00> : vector<64x512xf32>
    %34 = tpu.matmul %32, %33, %cst {dimension_numbers = #tpu.dot_dimension_numbers<[1], [0], [0], [1], [0, 0, 1, 1], [], []>} : vector<64x384xf32>, vector<384x512xf32>, vector<64x512xf32> -> vector<64x512xf32>
    %c0_8 = arith.constant 0 : index
    %c0_9 = arith.constant 0 : index
    %35 = vector.load %arg5[%c0_8, %c0_9] : memref<1x512xf32, #tpu.memory_space<vmem>>, vector<1x512xf32>
    %36 = vector.broadcast %35 : vector<1x512xf32> to vector<64x512xf32>
    %37 = arith.addf %34, %36 : vector<64x512xf32>
    %38 = vector.shape_cast %37 : vector<64x512xf32> to vector<8x8x512xf32>
    %c0_10 = arith.constant 0 : index
    %c0_11 = arith.constant 0 : index
    %c0_12 = arith.constant 0 : index
    %39 = vector.load %arg14[%c0_10, %c0_11, %c0_12] : memref<8x8x512xf32, #tpu.memory_space<vmem>>, vector<8x8x512xf32>
    tpu.vector_store %arg14[%c0_10, %c0_11, %c0_12], %38 {strides = array<i32>} : memref<8x8x512xf32, #tpu.memory_space<vmem>>, vector<8x8x512xf32>,
    %c0_13 = arith.constant 0 : index
    %c0_14 = arith.constant 0 : index
    %40 = vector.load %arg4[%c0_13, %c0_14] : memref<128x512xf32, #tpu.memory_space<vmem>>, vector<128x512xf32>
    %cst_15 = arith.constant 0.000000e+00 : f32
    %41 = vector.broadcast %cst_15 : f32 to vector<8x128xf32>
    %c0_i32_16 = arith.constant 0 : i32
    %c7_i32 = arith.constant 7 : i32
    %42 = arith.subi %c7_i32, %c0_i32_16 : i32
    %43 = arith.index_cast %c0_i32_16 : i32 to index
    %c0_17 = arith.constant 0 : index
    %c0_18 = arith.constant 0 : index
    %44 = vector.load %arg14[%43, %c0_17, %c0_18] : memref<8x8x512xf32, #tpu.memory_space<vmem>>, vector<1x8x512xf32>
    %45 = vector.shape_cast %44 : vector<1x8x512xf32> to vector<8x512xf32>
    %46 = arith.index_cast %42 : i32 to index
    %c0_19 = arith.constant 0 : index
    %c0_20 = arith.constant 0 : index
    %47 = vector.load %arg14[%46, %c0_19, %c0_20] : memref<8x8x512xf32, #tpu.memory_space<vmem>>, vector<1x8x512xf32>
    %48 = vector.shape_cast %47 : vector<1x8x512xf32> to vector<8x512xf32>
    %49 = arith.select %30, %45, %48 : vector<8x512xi1>, vector<8x512xf32>
    %cst_21 = arith.constant dense<0.000000e+00> : vector<8x512xf32>
    %50 = tpu.matmul %41, %40, %cst_21 {dimension_numbers = #tpu.dot_dimension_numbers<[1], [0], [0], [1], [0, 0, 1, 1], [], []>} : vector<8x128xf32>, vector<128x512xf32>, vector<8x512xf32> -> vector<8x512xf32>
    %51 = arith.addf %49, %50 : vector<8x512xf32>
    %52 = vector.extract_strided_slice %51 {offsets = [0, 0], sizes = [8, 128], strides = [1, 1]} : vector<8x512xf32> to vector<8x128xf32>
    %53 = arith.negf %52 : vector<8x128xf32>
    %54 = math.exp %53 : vector<8x128xf32>
    %cst_22 = arith.constant 1.000000e+00 : f32
    %55 = vector.broadcast %cst_22 : f32 to vector<8x128xf32>
    %56 = arith.addf %55, %54 : vector<8x128xf32>
    %57 = arith.divf %55, %56 : vector<8x128xf32>
    %58 = vector.extract_strided_slice %51 {offsets = [0, 128], sizes = [8, 128], strides = [1, 1]} : vector<8x512xf32> to vector<8x128xf32>
    %59 = arith.negf %58 : vector<8x128xf32>
    %60 = math.exp %59 : vector<8x128xf32>
    %cst_23 = arith.constant 1.000000e+00 : f32
    %61 = vector.broadcast %cst_23 : f32 to vector<8x128xf32>
    %62 = arith.addf %61, %60 : vector<8x128xf32>
    %63 = arith.divf %61, %62 : vector<8x128xf32>
    %64 = vector.extract_strided_slice %51 {offsets = [0, 256], sizes = [8, 128], strides = [1, 1]} : vector<8x512xf32> to vector<8x128xf32>
    %65 = math.tanh %64 : vector<8x128xf32>
    %66 = vector.extract_strided_slice %51 {offsets = [0, 384], sizes = [8, 128], strides = [1, 1]} : vector<8x512xf32> to vector<8x128xf32>
    %67 = arith.negf %66 : vector<8x128xf32>
    %68 = math.exp %67 : vector<8x128xf32>
    %cst_24 = arith.constant 1.000000e+00 : f32
    %69 = vector.broadcast %cst_24 : f32 to vector<8x128xf32>
    %70 = arith.addf %69, %68 : vector<8x128xf32>
    %71 = arith.divf %69, %70 : vector<8x128xf32>
    %72 = arith.mulf %63, %41 : vector<8x128xf32>
    %73 = arith.mulf %57, %65 : vector<8x128xf32>
    %74 = arith.addf %72, %73 : vector<8x128xf32>
    %75 = math.tanh %74 : vector<8x128xf32>
    %76 = arith.mulf %71, %75 : vector<8x128xf32>
    %77 = vector.broadcast %c0_i32_16 : i32 to vector<8x128xi32>
    %78 = vector.broadcast %42 : i32 to vector<8x128xi32>
    %79 = arith.select %3, %77, %78 : vector<8x128xi1>, vector<8x128xi32>
    %80 = arith.cmpi slt, %79, %0 : vector<8x128xi32>
    %81 = arith.select %80, %76, %41 : vector<8x128xi1>, vector<8x128xf32>
    %82 = arith.select %80, %74, %41 : vector<8x128xi1>, vector<8x128xf32>
    %cst_25 = arith.constant 0.000000e+00 : f32
    %83 = vector.broadcast %cst_25 : f32 to vector<8x128xf32>
    %84 = arith.select %80, %81, %83 : vector<8x128xi1>, vector<8x128xf32>
    %85 = vector.extract_strided_slice %84 {offsets = [0, 0], sizes = [8, 64], strides = [1, 1]} : vector<8x128xf32> to vector<8x64xf32>
    %86 = arith.index_cast %c0_i32_16 : i32 to index
    %c0_26 = arith.constant 0 : index
    %c0_27 = arith.constant 0 : index
    %87 = vector.load %arg15[%86, %c0_26, %c0_27] : memref<8x8x128xf32, #tpu.memory_space<vmem>>, vector<1x8x64xf32>
    %88 = vector.shape_cast %87 : vector<1x8x64xf32> to vector<8x64xf32>
    %89 = vector.shape_cast %85 : vector<8x64xf32> to vector<1x8x64xf32>
    tpu.vector_store %arg15[%86, %c0_26, %c0_27], %89 {strides = array<i32>} : memref<8x8x128xf32, #tpu.memory_space<vmem>>, vector<1x8x64xf32>,
    %90 = vector.extract_strided_slice %84 {offsets = [0, 64], sizes = [8, 64], strides = [1, 1]} : vector<8x128xf32> to vector<8x64xf32>
    %91 = arith.index_cast %42 : i32 to index
    %c0_28 = arith.constant 0 : index
    %c64 = arith.constant 64 : index
    %92 = vector.load %arg15[%91, %c0_28, %c64] : memref<8x8x128xf32, #tpu.memory_space<vmem>>, vector<1x8x64xf32>
    %93 = vector.shape_cast %92 : vector<1x8x64xf32> to vector<8x64xf32>
    %94 = vector.shape_cast %90 : vector<8x64xf32> to vector<1x8x64xf32>
    tpu.vector_store %arg15[%91, %c0_28, %c64], %94 {strides = array<i32>} : memref<8x8x128xf32, #tpu.memory_space<vmem>>, vector<1x8x64xf32>,
    %c1_i32 = arith.constant 1 : i32
    %c7_i32_29 = arith.constant 7 : i32
    %95 = arith.subi %c7_i32_29, %c1_i32 : i32
    %96 = arith.index_cast %c1_i32 : i32 to index
    %c0_30 = arith.constant 0 : index
    %c0_31 = arith.constant 0 : index
    %97 = vector.load %arg14[%96, %c0_30, %c0_31] : memref<8x8x512xf32, #tpu.memory_space<vmem>>, vector<1x8x512xf32>
    %98 = vector.shape_cast %97 : vector<1x8x512xf32> to vector<8x512xf32>
    %99 = arith.index_cast %95 : i32 to index
    %c0_32 = arith.constant 0 : index
    %c0_33 = arith.constant 0 : index
    %100 = vector.load %arg14[%99, %c0_32, %c0_33] : memref<8x8x512xf32, #tpu.memory_space<vmem>>, vector<1x8x512xf32>
    %101 = vector.shape_cast %100 : vector<1x8x512xf32> to vector<8x512xf32>
    %102 = arith.select %30, %98, %101 : vector<8x512xi1>, vector<8x512xf32>
    %cst_34 = arith.constant dense<0.000000e+00> : vector<8x512xf32>
    %103 = tpu.matmul %81, %40, %cst_34 {dimension_numbers = #tpu.dot_dimension_numbers<[1], [0], [0], [1], [0, 0, 1, 1], [], []>} : vector<8x128xf32>, vector<128x512xf32>, vector<8x512xf32> -> vector<8x512xf32>
    %104 = arith.addf %102, %103 : vector<8x512xf32>
    %105 = vector.extract_strided_slice %104 {offsets = [0, 0], sizes = [8, 128], strides = [1, 1]} : vector<8x512xf32> to vector<8x128xf32>
    %106 = arith.negf %105 : vector<8x128xf32>
    %107 = math.exp %106 : vector<8x128xf32>
    %cst_35 = arith.constant 1.000000e+00 : f32
    %108 = vector.broadcast %cst_35 : f32 to vector<8x128xf32>
    %109 = arith.addf %108, %107 : vector<8x128xf32>
    %110 = arith.divf %108, %109 : vector<8x128xf32>
    %111 = vector.extract_strided_slice %104 {offsets = [0, 128], sizes = [8, 128], strides = [1, 1]} : vector<8x512xf32> to vector<8x128xf32>
    %112 = arith.negf %111 : vector<8x128xf32>
    %113 = math.exp %112 : vector<8x128xf32>
    %cst_36 = arith.constant 1.000000e+00 : f32
    %114 = vector.broadcast %cst_36 : f32 to vector<8x128xf32>
    %115 = arith.addf %114, %113 : vector<8x128xf32>
    %116 = arith.divf %114, %115 : vector<8x128xf32>
    %117 = vector.extract_strided_slice %104 {offsets = [0, 256], sizes = [8, 128], strides = [1, 1]} : vector<8x512xf32> to vector<8x128xf32>
    %118 = math.tanh %117 : vector<8x128xf32>
    %119 = vector.extract_strided_slice %104 {offsets = [0, 384], sizes = [8, 128], strides = [1, 1]} : vector<8x512xf32> to vector<8x128xf32>
    %120 = arith.negf %119 : vector<8x128xf32>
    %121 = math.exp %120 : vector<8x128xf32>
    %cst_37 = arith.constant 1.000000e+00 : f32
    %122 = vector.broadcast %cst_37 : f32 to vector<8x128xf32>
    %123 = arith.addf %122, %121 : vector<8x128xf32>
    %124 = arith.divf %122, %123 : vector<8x128xf32>
    %125 = arith.mulf %116, %82 : vector<8x128xf32>
    %126 = arith.mulf %110, %118 : vector<8x128xf32>
    %127 = arith.addf %125, %126 : vector<8x128xf32>
    %128 = math.tanh %127 : vector<8x128xf32>
    %129 = arith.mulf %124, %128 : vector<8x128xf32>
    %130 = vector.broadcast %c1_i32 : i32 to vector<8x128xi32>
    %131 = vector.broadcast %95 : i32 to vector<8x128xi32>
    %132 = arith.select %3, %130, %131 : vector<8x128xi1>, vector<8x128xi32>
    %133 = arith.cmpi slt, %132, %0 : vector<8x128xi32>
    %134 = arith.select %133, %129, %81 : vector<8x128xi1>, vector<8x128xf32>
    %135 = arith.select %133, %127, %82 : vector<8x128xi1>, vector<8x128xf32>
    %cst_38 = arith.constant 0.000000e+00 : f32
    %136 = vector.broadcast %cst_38 : f32 to vector<8x128xf32>
    %137 = arith.select %133, %134, %136 : vector<8x128xi1>, vector<8x128xf32>
    %138 = vector.extract_strided_slice %137 {offsets = [0, 0], sizes = [8, 64], strides = [1, 1]} : vector<8x128xf32> to vector<8x64xf32>
    %139 = arith.index_cast %c1_i32 : i32 to index
    %c0_39 = arith.constant 0 : index
    %c0_40 = arith.constant 0 : index
    %140 = vector.load %arg15[%139, %c0_39, %c0_40] : memref<8x8x128xf32, #tpu.memory_space<vmem>>, vector<1x8x64xf32>
    %141 = vector.shape_cast %140 : vector<1x8x64xf32> to vector<8x64xf32>
    %142 = vector.shape_cast %138 : vector<8x64xf32> to vector<1x8x64xf32>
    tpu.vector_store %arg15[%139, %c0_39, %c0_40], %142 {strides = array<i32>} : memref<8x8x128xf32, #tpu.memory_space<vmem>>, vector<1x8x64xf32>,
    %143 = vector.extract_strided_slice %137 {offsets = [0, 64], sizes = [8, 64], strides = [1, 1]} : vector<8x128xf32> to vector<8x64xf32>
    %144 = arith.index_cast %95 : i32 to index
    %c0_41 = arith.constant 0 : index
    %c64_42 = arith.constant 64 : index
    %145 = vector.load %arg15[%144, %c0_41, %c64_42] : memref<8x8x128xf32, #tpu.memory_space<vmem>>, vector<1x8x64xf32>
    %146 = vector.shape_cast %145 : vector<1x8x64xf32> to vector<8x64xf32>
    %147 = vector.shape_cast %143 : vector<8x64xf32> to vector<1x8x64xf32>
    tpu.vector_store %arg15[%144, %c0_41, %c64_42], %147 {strides = array<i32>} : memref<8x8x128xf32, #tpu.memory_space<vmem>>, vector<1x8x64xf32>,
    %c2_i32 = arith.constant 2 : i32
    %c7_i32_43 = arith.constant 7 : i32
    %148 = arith.subi %c7_i32_43, %c2_i32 : i32
    %149 = arith.index_cast %c2_i32 : i32 to index
    %c0_44 = arith.constant 0 : index
    %c0_45 = arith.constant 0 : index
    %150 = vector.load %arg14[%149, %c0_44, %c0_45] : memref<8x8x512xf32, #tpu.memory_space<vmem>>, vector<1x8x512xf32>
    %151 = vector.shape_cast %150 : vector<1x8x512xf32> to vector<8x512xf32>
    %152 = arith.index_cast %148 : i32 to index
    %c0_46 = arith.constant 0 : index
    %c0_47 = arith.constant 0 : index
    %153 = vector.load %arg14[%152, %c0_46, %c0_47] : memref<8x8x512xf32, #tpu.memory_space<vmem>>, vector<1x8x512xf32>
    %154 = vector.shape_cast %153 : vector<1x8x512xf32> to vector<8x512xf32>
    %155 = arith.select %30, %151, %154 : vector<8x512xi1>, vector<8x512xf32>
    %cst_48 = arith.constant dense<0.000000e+00> : vector<8x512xf32>
    %156 = tpu.matmul %134, %40, %cst_48 {dimension_numbers = #tpu.dot_dimension_numbers<[1], [0], [0], [1], [0, 0, 1, 1], [], []>} : vector<8x128xf32>, vector<128x512xf32>, vector<8x512xf32> -> vector<8x512xf32>
    %157 = arith.addf %155, %156 : vector<8x512xf32>
    %158 = vector.extract_strided_slice %157 {offsets = [0, 0], sizes = [8, 128], strides = [1, 1]} : vector<8x512xf32> to vector<8x128xf32>
    %159 = arith.negf %158 : vector<8x128xf32>
    %160 = math.exp %159 : vector<8x128xf32>
    %cst_49 = arith.constant 1.000000e+00 : f32
    %161 = vector.broadcast %cst_49 : f32 to vector<8x128xf32>
    %162 = arith.addf %161, %160 : vector<8x128xf32>
    %163 = arith.divf %161, %162 : vector<8x128xf32>
    %164 = vector.extract_strided_slice %157 {offsets = [0, 128], sizes = [8, 128], strides = [1, 1]} : vector<8x512xf32> to vector<8x128xf32>
    %165 = arith.negf %164 : vector<8x128xf32>
    %166 = math.exp %165 : vector<8x128xf32>
    %cst_50 = arith.constant 1.000000e+00 : f32
    %167 = vector.broadcast %cst_50 : f32 to vector<8x128xf32>
    %168 = arith.addf %167, %166 : vector<8x128xf32>
    %169 = arith.divf %167, %168 : vector<8x128xf32>
    %170 = vector.extract_strided_slice %157 {offsets = [0, 256], sizes = [8, 128], strides = [1, 1]} : vector<8x512xf32> to vector<8x128xf32>
    %171 = math.tanh %170 : vector<8x128xf32>
    %172 = vector.extract_strided_slice %157 {offsets = [0, 384], sizes = [8, 128], strides = [1, 1]} : vector<8x512xf32> to vector<8x128xf32>
    %173 = arith.negf %172 : vector<8x128xf32>
    %174 = math.exp %173 : vector<8x128xf32>
    %cst_51 = arith.constant 1.000000e+00 : f32
    %175 = vector.broadcast %cst_51 : f32 to vector<8x128xf32>
    %176 = arith.addf %175, %174 : vector<8x128xf32>
    %177 = arith.divf %175, %176 : vector<8x128xf32>
    %178 = arith.mulf %169, %135 : vector<8x128xf32>
    %179 = arith.mulf %163, %171 : vector<8x128xf32>
    %180 = arith.addf %178, %179 : vector<8x128xf32>
    %181 = math.tanh %180 : vector<8x128xf32>
    %182 = arith.mulf %177, %181 : vector<8x128xf32>
    %183 = vector.broadcast %c2_i32 : i32 to vector<8x128xi32>
    %184 = vector.broadcast %148 : i32 to vector<8x128xi32>
    %185 = arith.select %3, %183, %184 : vector<8x128xi1>, vector<8x128xi32>
    %186 = arith.cmpi slt, %185, %0 : vector<8x128xi32>
    %187 = arith.select %186, %182, %134 : vector<8x128xi1>, vector<8x128xf32>
    %188 = arith.select %186, %180, %135 : vector<8x128xi1>, vector<8x128xf32>
    %cst_52 = arith.constant 0.000000e+00 : f32
    %189 = vector.broadcast %cst_52 : f32 to vector<8x128xf32>
    %190 = arith.select %186, %187, %189 : vector<8x128xi1>, vector<8x128xf32>
    %191 = vector.extract_strided_slice %190 {offsets = [0, 0], sizes = [8, 64], strides = [1, 1]} : vector<8x128xf32> to vector<8x64xf32>
    %192 = arith.index_cast %c2_i32 : i32 to index
    %c0_53 = arith.constant 0 : index
    %c0_54 = arith.constant 0 : index
    %193 = vector.load %arg15[%192, %c0_53, %c0_54] : memref<8x8x128xf32, #tpu.memory_space<vmem>>, vector<1x8x64xf32>
    %194 = vector.shape_cast %193 : vector<1x8x64xf32> to vector<8x64xf32>
    %195 = vector.shape_cast %191 : vector<8x64xf32> to vector<1x8x64xf32>
    tpu.vector_store %arg15[%192, %c0_53, %c0_54], %195 {strides = array<i32>} : memref<8x8x128xf32, #tpu.memory_space<vmem>>, vector<1x8x64xf32>,
    %196 = vector.extract_strided_slice %190 {offsets = [0, 64], sizes = [8, 64], strides = [1, 1]} : vector<8x128xf32> to vector<8x64xf32>
    %197 = arith.index_cast %148 : i32 to index
    %c0_55 = arith.constant 0 : index
    %c64_56 = arith.constant 64 : index
    %198 = vector.load %arg15[%197, %c0_55, %c64_56] : memref<8x8x128xf32, #tpu.memory_space<vmem>>, vector<1x8x64xf32>
    %199 = vector.shape_cast %198 : vector<1x8x64xf32> to vector<8x64xf32>
    %200 = vector.shape_cast %196 : vector<8x64xf32> to vector<1x8x64xf32>
    tpu.vector_store %arg15[%197, %c0_55, %c64_56], %200 {strides = array<i32>} : memref<8x8x128xf32, #tpu.memory_space<vmem>>, vector<1x8x64xf32>,
    %c3_i32 = arith.constant 3 : i32
    %c7_i32_57 = arith.constant 7 : i32
    %201 = arith.subi %c7_i32_57, %c3_i32 : i32
    %202 = arith.index_cast %c3_i32 : i32 to index
    %c0_58 = arith.constant 0 : index
    %c0_59 = arith.constant 0 : index
    %203 = vector.load %arg14[%202, %c0_58, %c0_59] : memref<8x8x512xf32, #tpu.memory_space<vmem>>, vector<1x8x512xf32>
    %204 = vector.shape_cast %203 : vector<1x8x512xf32> to vector<8x512xf32>
    %205 = arith.index_cast %201 : i32 to index
    %c0_60 = arith.constant 0 : index
    %c0_61 = arith.constant 0 : index
    %206 = vector.load %arg14[%205, %c0_60, %c0_61] : memref<8x8x512xf32, #tpu.memory_space<vmem>>, vector<1x8x512xf32>
    %207 = vector.shape_cast %206 : vector<1x8x512xf32> to vector<8x512xf32>
    %208 = arith.select %30, %204, %207 : vector<8x512xi1>, vector<8x512xf32>
    %cst_62 = arith.constant dense<0.000000e+00> : vector<8x512xf32>
    %209 = tpu.matmul %187, %40, %cst_62 {dimension_numbers = #tpu.dot_dimension_numbers<[1], [0], [0], [1], [0, 0, 1, 1], [], []>} : vector<8x128xf32>, vector<128x512xf32>, vector<8x512xf32> -> vector<8x512xf32>
    %210 = arith.addf %208, %209 : vector<8x512xf32>
    %211 = vector.extract_strided_slice %210 {offsets = [0, 0], sizes = [8, 128], strides = [1, 1]} : vector<8x512xf32> to vector<8x128xf32>
    %212 = arith.negf %211 : vector<8x128xf32>
    %213 = math.exp %212 : vector<8x128xf32>
    %cst_63 = arith.constant 1.000000e+00 : f32
    %214 = vector.broadcast %cst_63 : f32 to vector<8x128xf32>
    %215 = arith.addf %214, %213 : vector<8x128xf32>
    %216 = arith.divf %214, %215 : vector<8x128xf32>
    %217 = vector.extract_strided_slice %210 {offsets = [0, 128], sizes = [8, 128], strides = [1, 1]} : vector<8x512xf32> to vector<8x128xf32>
    %218 = arith.negf %217 : vector<8x128xf32>
    %219 = math.exp %218 : vector<8x128xf32>
    %cst_64 = arith.constant 1.000000e+00 : f32
    %220 = vector.broadcast %cst_64 : f32 to vector<8x128xf32>
    %221 = arith.addf %220, %219 : vector<8x128xf32>
    %222 = arith.divf %220, %221 : vector<8x128xf32>
    %223 = vector.extract_strided_slice %210 {offsets = [0, 256], sizes = [8, 128], strides = [1, 1]} : vector<8x512xf32> to vector<8x128xf32>
    %224 = math.tanh %223 : vector<8x128xf32>
    %225 = vector.extract_strided_slice %210 {offsets = [0, 384], sizes = [8, 128], strides = [1, 1]} : vector<8x512xf32> to vector<8x128xf32>
    %226 = arith.negf %225 : vector<8x128xf32>
    %227 = math.exp %226 : vector<8x128xf32>
    %cst_65 = arith.constant 1.000000e+00 : f32
    %228 = vector.broadcast %cst_65 : f32 to vector<8x128xf32>
    %229 = arith.addf %228, %227 : vector<8x128xf32>
    %230 = arith.divf %228, %229 : vector<8x128xf32>
    %231 = arith.mulf %222, %188 : vector<8x128xf32>
    %232 = arith.mulf %216, %224 : vector<8x128xf32>
    %233 = arith.addf %231, %232 : vector<8x128xf32>
    %234 = math.tanh %233 : vector<8x128xf32>
    %235 = arith.mulf %230, %234 : vector<8x128xf32>
    %236 = vector.broadcast %c3_i32 : i32 to vector<8x128xi32>
    %237 = vector.broadcast %201 : i32 to vector<8x128xi32>
    %238 = arith.select %3, %236, %237 : vector<8x128xi1>, vector<8x128xi32>
    %239 = arith.cmpi slt, %238, %0 : vector<8x128xi32>
    %240 = arith.select %239, %235, %187 : vector<8x128xi1>, vector<8x128xf32>
    %241 = arith.select %239, %233, %188 : vector<8x128xi1>, vector<8x128xf32>
    %cst_66 = arith.constant 0.000000e+00 : f32
    %242 = vector.broadcast %cst_66 : f32 to vector<8x128xf32>
    %243 = arith.select %239, %240, %242 : vector<8x128xi1>, vector<8x128xf32>
    %244 = vector.extract_strided_slice %243 {offsets = [0, 0], sizes = [8, 64], strides = [1, 1]} : vector<8x128xf32> to vector<8x64xf32>
    %245 = arith.index_cast %c3_i32 : i32 to index
    %c0_67 = arith.constant 0 : index
    %c0_68 = arith.constant 0 : index
    %246 = vector.load %arg15[%245, %c0_67, %c0_68] : memref<8x8x128xf32, #tpu.memory_space<vmem>>, vector<1x8x64xf32>
    %247 = vector.shape_cast %246 : vector<1x8x64xf32> to vector<8x64xf32>
    %248 = vector.shape_cast %244 : vector<8x64xf32> to vector<1x8x64xf32>
    tpu.vector_store %arg15[%245, %c0_67, %c0_68], %248 {strides = array<i32>} : memref<8x8x128xf32, #tpu.memory_space<vmem>>, vector<1x8x64xf32>,
    %249 = vector.extract_strided_slice %243 {offsets = [0, 64], sizes = [8, 64], strides = [1, 1]} : vector<8x128xf32> to vector<8x64xf32>
    %250 = arith.index_cast %201 : i32 to index
    %c0_69 = arith.constant 0 : index
    %c64_70 = arith.constant 64 : index
    %251 = vector.load %arg15[%250, %c0_69, %c64_70] : memref<8x8x128xf32, #tpu.memory_space<vmem>>, vector<1x8x64xf32>
    %252 = vector.shape_cast %251 : vector<1x8x64xf32> to vector<8x64xf32>
    %253 = vector.shape_cast %249 : vector<8x64xf32> to vector<1x8x64xf32>
    tpu.vector_store %arg15[%250, %c0_69, %c64_70], %253 {strides = array<i32>} : memref<8x8x128xf32, #tpu.memory_space<vmem>>, vector<1x8x64xf32>,
    %c4_i32 = arith.constant 4 : i32
    %c7_i32_71 = arith.constant 7 : i32
    %254 = arith.subi %c7_i32_71, %c4_i32 : i32
    %255 = arith.index_cast %c4_i32 : i32 to index
    %c0_72 = arith.constant 0 : index
    %c0_73 = arith.constant 0 : index
    %256 = vector.load %arg14[%255, %c0_72, %c0_73] : memref<8x8x512xf32, #tpu.memory_space<vmem>>, vector<1x8x512xf32>
    %257 = vector.shape_cast %256 : vector<1x8x512xf32> to vector<8x512xf32>
    %258 = arith.index_cast %254 : i32 to index
    %c0_74 = arith.constant 0 : index
    %c0_75 = arith.constant 0 : index
    %259 = vector.load %arg14[%258, %c0_74, %c0_75] : memref<8x8x512xf32, #tpu.memory_space<vmem>>, vector<1x8x512xf32>
    %260 = vector.shape_cast %259 : vector<1x8x512xf32> to vector<8x512xf32>
    %261 = arith.select %30, %257, %260 : vector<8x512xi1>, vector<8x512xf32>
    %cst_76 = arith.constant dense<0.000000e+00> : vector<8x512xf32>
    %262 = tpu.matmul %240, %40, %cst_76 {dimension_numbers = #tpu.dot_dimension_numbers<[1], [0], [0], [1], [0, 0, 1, 1], [], []>} : vector<8x128xf32>, vector<128x512xf32>, vector<8x512xf32> -> vector<8x512xf32>
    %263 = arith.addf %261, %262 : vector<8x512xf32>
    %264 = vector.extract_strided_slice %263 {offsets = [0, 0], sizes = [8, 128], strides = [1, 1]} : vector<8x512xf32> to vector<8x128xf32>
    %265 = arith.negf %264 : vector<8x128xf32>
    %266 = math.exp %265 : vector<8x128xf32>
    %cst_77 = arith.constant 1.000000e+00 : f32
    %267 = vector.broadcast %cst_77 : f32 to vector<8x128xf32>
    %268 = arith.addf %267, %266 : vector<8x128xf32>
    %269 = arith.divf %267, %268 : vector<8x128xf32>
    %270 = vector.extract_strided_slice %263 {offsets = [0, 128], sizes = [8, 128], strides = [1, 1]} : vector<8x512xf32> to vector<8x128xf32>
    %271 = arith.negf %270 : vector<8x128xf32>
    %272 = math.exp %271 : vector<8x128xf32>
    %cst_78 = arith.constant 1.000000e+00 : f32
    %273 = vector.broadcast %cst_78 : f32 to vector<8x128xf32>
    %274 = arith.addf %273, %272 : vector<8x128xf32>
    %275 = arith.divf %273, %274 : vector<8x128xf32>
    %276 = vector.extract_strided_slice %263 {offsets = [0, 256], sizes = [8, 128], strides = [1, 1]} : vector<8x512xf32> to vector<8x128xf32>
    %277 = math.tanh %276 : vector<8x128xf32>
    %278 = vector.extract_strided_slice %263 {offsets = [0, 384], sizes = [8, 128], strides = [1, 1]} : vector<8x512xf32> to vector<8x128xf32>
    %279 = arith.negf %278 : vector<8x128xf32>
    %280 = math.exp %279 : vector<8x128xf32>
    %cst_79 = arith.constant 1.000000e+00 : f32
    %281 = vector.broadcast %cst_79 : f32 to vector<8x128xf32>
    %282 = arith.addf %281, %280 : vector<8x128xf32>
    %283 = arith.divf %281, %282 : vector<8x128xf32>
    %284 = arith.mulf %275, %241 : vector<8x128xf32>
    %285 = arith.mulf %269, %277 : vector<8x128xf32>
    %286 = arith.addf %284, %285 : vector<8x128xf32>
    %287 = math.tanh %286 : vector<8x128xf32>
    %288 = arith.mulf %283, %287 : vector<8x128xf32>
    %289 = vector.broadcast %c4_i32 : i32 to vector<8x128xi32>
    %290 = vector.broadcast %254 : i32 to vector<8x128xi32>
    %291 = arith.select %3, %289, %290 : vector<8x128xi1>, vector<8x128xi32>
    %292 = arith.cmpi slt, %291, %0 : vector<8x128xi32>
    %293 = arith.select %292, %288, %240 : vector<8x128xi1>, vector<8x128xf32>
    %294 = arith.select %292, %286, %241 : vector<8x128xi1>, vector<8x128xf32>
    %cst_80 = arith.constant 0.000000e+00 : f32
    %295 = vector.broadcast %cst_80 : f32 to vector<8x128xf32>
    %296 = arith.select %292, %293, %295 : vector<8x128xi1>, vector<8x128xf32>
    %297 = vector.extract_strided_slice %296 {offsets = [0, 0], sizes = [8, 64], strides = [1, 1]} : vector<8x128xf32> to vector<8x64xf32>
    %298 = arith.index_cast %c4_i32 : i32 to index
    %c0_81 = arith.constant 0 : index
    %c0_82 = arith.constant 0 : index
    %299 = vector.load %arg15[%298, %c0_81, %c0_82] : memref<8x8x128xf32, #tpu.memory_space<vmem>>, vector<1x8x64xf32>
    %300 = vector.shape_cast %299 : vector<1x8x64xf32> to vector<8x64xf32>
    %301 = vector.shape_cast %297 : vector<8x64xf32> to vector<1x8x64xf32>
    tpu.vector_store %arg15[%298, %c0_81, %c0_82], %301 {strides = array<i32>} : memref<8x8x128xf32, #tpu.memory_space<vmem>>, vector<1x8x64xf32>,
    %302 = vector.extract_strided_slice %296 {offsets = [0, 64], sizes = [8, 64], strides = [1, 1]} : vector<8x128xf32> to vector<8x64xf32>
    %303 = arith.index_cast %254 : i32 to index
    %c0_83 = arith.constant 0 : index
    %c64_84 = arith.constant 64 : index
    %304 = vector.load %arg15[%303, %c0_83, %c64_84] : memref<8x8x128xf32, #tpu.memory_space<vmem>>, vector<1x8x64xf32>
    %305 = vector.shape_cast %304 : vector<1x8x64xf32> to vector<8x64xf32>
    %306 = vector.shape_cast %302 : vector<8x64xf32> to vector<1x8x64xf32>
    tpu.vector_store %arg15[%303, %c0_83, %c64_84], %306 {strides = array<i32>} : memref<8x8x128xf32, #tpu.memory_space<vmem>>, vector<1x8x64xf32>,
    %c5_i32 = arith.constant 5 : i32
    %c7_i32_85 = arith.constant 7 : i32
    %307 = arith.subi %c7_i32_85, %c5_i32 : i32
    %308 = arith.index_cast %c5_i32 : i32 to index
    %c0_86 = arith.constant 0 : index
    %c0_87 = arith.constant 0 : index
    %309 = vector.load %arg14[%308, %c0_86, %c0_87] : memref<8x8x512xf32, #tpu.memory_space<vmem>>, vector<1x8x512xf32>
    %310 = vector.shape_cast %309 : vector<1x8x512xf32> to vector<8x512xf32>
    %311 = arith.index_cast %307 : i32 to index
    %c0_88 = arith.constant 0 : index
    %c0_89 = arith.constant 0 : index
    %312 = vector.load %arg14[%311, %c0_88, %c0_89] : memref<8x8x512xf32, #tpu.memory_space<vmem>>, vector<1x8x512xf32>
    %313 = vector.shape_cast %312 : vector<1x8x512xf32> to vector<8x512xf32>
    %314 = arith.select %30, %310, %313 : vector<8x512xi1>, vector<8x512xf32>
    %cst_90 = arith.constant dense<0.000000e+00> : vector<8x512xf32>
    %315 = tpu.matmul %293, %40, %cst_90 {dimension_numbers = #tpu.dot_dimension_numbers<[1], [0], [0], [1], [0, 0, 1, 1], [], []>} : vector<8x128xf32>, vector<128x512xf32>, vector<8x512xf32> -> vector<8x512xf32>
    %316 = arith.addf %314, %315 : vector<8x512xf32>
    %317 = vector.extract_strided_slice %316 {offsets = [0, 0], sizes = [8, 128], strides = [1, 1]} : vector<8x512xf32> to vector<8x128xf32>
    %318 = arith.negf %317 : vector<8x128xf32>
    %319 = math.exp %318 : vector<8x128xf32>
    %cst_91 = arith.constant 1.000000e+00 : f32
    %320 = vector.broadcast %cst_91 : f32 to vector<8x128xf32>
    %321 = arith.addf %320, %319 : vector<8x128xf32>
    %322 = arith.divf %320, %321 : vector<8x128xf32>
    %323 = vector.extract_strided_slice %316 {offsets = [0, 128], sizes = [8, 128], strides = [1, 1]} : vector<8x512xf32> to vector<8x128xf32>
    %324 = arith.negf %323 : vector<8x128xf32>
    %325 = math.exp %324 : vector<8x128xf32>
    %cst_92 = arith.constant 1.000000e+00 : f32
    %326 = vector.broadcast %cst_92 : f32 to vector<8x128xf32>
    %327 = arith.addf %326, %325 : vector<8x128xf32>
    %328 = arith.divf %326, %327 : vector<8x128xf32>
    %329 = vector.extract_strided_slice %316 {offsets = [0, 256], sizes = [8, 128], strides = [1, 1]} : vector<8x512xf32> to vector<8x128xf32>
    %330 = math.tanh %329 : vector<8x128xf32>
    %331 = vector.extract_strided_slice %316 {offsets = [0, 384], sizes = [8, 128], strides = [1, 1]} : vector<8x512xf32> to vector<8x128xf32>
    %332 = arith.negf %331 : vector<8x128xf32>
    %333 = math.exp %332 : vector<8x128xf32>
    %cst_93 = arith.constant 1.000000e+00 : f32
    %334 = vector.broadcast %cst_93 : f32 to vector<8x128xf32>
    %335 = arith.addf %334, %333 : vector<8x128xf32>
    %336 = arith.divf %334, %335 : vector<8x128xf32>
    %337 = arith.mulf %328, %294 : vector<8x128xf32>
    %338 = arith.mulf %322, %330 : vector<8x128xf32>
    %339 = arith.addf %337, %338 : vector<8x128xf32>
    %340 = math.tanh %339 : vector<8x128xf32>
    %341 = arith.mulf %336, %340 : vector<8x128xf32>
    %342 = vector.broadcast %c5_i32 : i32 to vector<8x128xi32>
    %343 = vector.broadcast %307 : i32 to vector<8x128xi32>
    %344 = arith.select %3, %342, %343 : vector<8x128xi1>, vector<8x128xi32>
    %345 = arith.cmpi slt, %344, %0 : vector<8x128xi32>
    %346 = arith.select %345, %341, %293 : vector<8x128xi1>, vector<8x128xf32>
    %347 = arith.select %345, %339, %294 : vector<8x128xi1>, vector<8x128xf32>
    %cst_94 = arith.constant 0.000000e+00 : f32
    %348 = vector.broadcast %cst_94 : f32 to vector<8x128xf32>
    %349 = arith.select %345, %346, %348 : vector<8x128xi1>, vector<8x128xf32>
    %350 = vector.extract_strided_slice %349 {offsets = [0, 0], sizes = [8, 64], strides = [1, 1]} : vector<8x128xf32> to vector<8x64xf32>
    %351 = arith.index_cast %c5_i32 : i32 to index
    %c0_95 = arith.constant 0 : index
    %c0_96 = arith.constant 0 : index
    %352 = vector.load %arg15[%351, %c0_95, %c0_96] : memref<8x8x128xf32, #tpu.memory_space<vmem>>, vector<1x8x64xf32>
    %353 = vector.shape_cast %352 : vector<1x8x64xf32> to vector<8x64xf32>
    %354 = vector.shape_cast %350 : vector<8x64xf32> to vector<1x8x64xf32>
    tpu.vector_store %arg15[%351, %c0_95, %c0_96], %354 {strides = array<i32>} : memref<8x8x128xf32, #tpu.memory_space<vmem>>, vector<1x8x64xf32>,
    %355 = vector.extract_strided_slice %349 {offsets = [0, 64], sizes = [8, 64], strides = [1, 1]} : vector<8x128xf32> to vector<8x64xf32>
    %356 = arith.index_cast %307 : i32 to index
    %c0_97 = arith.constant 0 : index
    %c64_98 = arith.constant 64 : index
    %357 = vector.load %arg15[%356, %c0_97, %c64_98] : memref<8x8x128xf32, #tpu.memory_space<vmem>>, vector<1x8x64xf32>
    %358 = vector.shape_cast %357 : vector<1x8x64xf32> to vector<8x64xf32>
    %359 = vector.shape_cast %355 : vector<8x64xf32> to vector<1x8x64xf32>
    tpu.vector_store %arg15[%356, %c0_97, %c64_98], %359 {strides = array<i32>} : memref<8x8x128xf32, #tpu.memory_space<vmem>>, vector<1x8x64xf32>,
    %c6_i32 = arith.constant 6 : i32
    %c7_i32_99 = arith.constant 7 : i32
    %360 = arith.subi %c7_i32_99, %c6_i32 : i32
    %361 = arith.index_cast %c6_i32 : i32 to index
    %c0_100 = arith.constant 0 : index
    %c0_101 = arith.constant 0 : index
    %362 = vector.load %arg14[%361, %c0_100, %c0_101] : memref<8x8x512xf32, #tpu.memory_space<vmem>>, vector<1x8x512xf32>
    %363 = vector.shape_cast %362 : vector<1x8x512xf32> to vector<8x512xf32>
    %364 = arith.index_cast %360 : i32 to index
    %c0_102 = arith.constant 0 : index
    %c0_103 = arith.constant 0 : index
    %365 = vector.load %arg14[%364, %c0_102, %c0_103] : memref<8x8x512xf32, #tpu.memory_space<vmem>>, vector<1x8x512xf32>
    %366 = vector.shape_cast %365 : vector<1x8x512xf32> to vector<8x512xf32>
    %367 = arith.select %30, %363, %366 : vector<8x512xi1>, vector<8x512xf32>
    %cst_104 = arith.constant dense<0.000000e+00> : vector<8x512xf32>
    %368 = tpu.matmul %346, %40, %cst_104 {dimension_numbers = #tpu.dot_dimension_numbers<[1], [0], [0], [1], [0, 0, 1, 1], [], []>} : vector<8x128xf32>, vector<128x512xf32>, vector<8x512xf32> -> vector<8x512xf32>
    %369 = arith.addf %367, %368 : vector<8x512xf32>
    %370 = vector.extract_strided_slice %369 {offsets = [0, 0], sizes = [8, 128], strides = [1, 1]} : vector<8x512xf32> to vector<8x128xf32>
    %371 = arith.negf %370 : vector<8x128xf32>
    %372 = math.exp %371 : vector<8x128xf32>
    %cst_105 = arith.constant 1.000000e+00 : f32
    %373 = vector.broadcast %cst_105 : f32 to vector<8x128xf32>
    %374 = arith.addf %373, %372 : vector<8x128xf32>
    %375 = arith.divf %373, %374 : vector<8x128xf32>
    %376 = vector.extract_strided_slice %369 {offsets = [0, 128], sizes = [8, 128], strides = [1, 1]} : vector<8x512xf32> to vector<8x128xf32>
    %377 = arith.negf %376 : vector<8x128xf32>
    %378 = math.exp %377 : vector<8x128xf32>
    %cst_106 = arith.constant 1.000000e+00 : f32
    %379 = vector.broadcast %cst_106 : f32 to vector<8x128xf32>
    %380 = arith.addf %379, %378 : vector<8x128xf32>
    %381 = arith.divf %379, %380 : vector<8x128xf32>
    %382 = vector.extract_strided_slice %369 {offsets = [0, 256], sizes = [8, 128], strides = [1, 1]} : vector<8x512xf32> to vector<8x128xf32>
    %383 = math.tanh %382 : vector<8x128xf32>
    %384 = vector.extract_strided_slice %369 {offsets = [0, 384], sizes = [8, 128], strides = [1, 1]} : vector<8x512xf32> to vector<8x128xf32>
    %385 = arith.negf %384 : vector<8x128xf32>
    %386 = math.exp %385 : vector<8x128xf32>
    %cst_107 = arith.constant 1.000000e+00 : f32
    %387 = vector.broadcast %cst_107 : f32 to vector<8x128xf32>
    %388 = arith.addf %387, %386 : vector<8x128xf32>
    %389 = arith.divf %387, %388 : vector<8x128xf32>
    %390 = arith.mulf %381, %347 : vector<8x128xf32>
    %391 = arith.mulf %375, %383 : vector<8x128xf32>
    %392 = arith.addf %390, %391 : vector<8x128xf32>
    %393 = math.tanh %392 : vector<8x128xf32>
    %394 = arith.mulf %389, %393 : vector<8x128xf32>
    %395 = vector.broadcast %c6_i32 : i32 to vector<8x128xi32>
    %396 = vector.broadcast %360 : i32 to vector<8x128xi32>
    %397 = arith.select %3, %395, %396 : vector<8x128xi1>, vector<8x128xi32>
    %398 = arith.cmpi slt, %397, %0 : vector<8x128xi32>
    %399 = arith.select %398, %394, %346 : vector<8x128xi1>, vector<8x128xf32>
    %400 = arith.select %398, %392, %347 : vector<8x128xi1>, vector<8x128xf32>
    %cst_108 = arith.constant 0.000000e+00 : f32
    %401 = vector.broadcast %cst_108 : f32 to vector<8x128xf32>
    %402 = arith.select %398, %399, %401 : vector<8x128xi1>, vector<8x128xf32>
    %403 = vector.extract_strided_slice %402 {offsets = [0, 0], sizes = [8, 64], strides = [1, 1]} : vector<8x128xf32> to vector<8x64xf32>
    %404 = arith.index_cast %c6_i32 : i32 to index
    %c0_109 = arith.constant 0 : index
    %c0_110 = arith.constant 0 : index
    %405 = vector.load %arg15[%404, %c0_109, %c0_110] : memref<8x8x128xf32, #tpu.memory_space<vmem>>, vector<1x8x64xf32>
    %406 = vector.shape_cast %405 : vector<1x8x64xf32> to vector<8x64xf32>
    %407 = vector.shape_cast %403 : vector<8x64xf32> to vector<1x8x64xf32>
    tpu.vector_store %arg15[%404, %c0_109, %c0_110], %407 {strides = array<i32>} : memref<8x8x128xf32, #tpu.memory_space<vmem>>, vector<1x8x64xf32>,
    %408 = vector.extract_strided_slice %402 {offsets = [0, 64], sizes = [8, 64], strides = [1, 1]} : vector<8x128xf32> to vector<8x64xf32>
    %409 = arith.index_cast %360 : i32 to index
    %c0_111 = arith.constant 0 : index
    %c64_112 = arith.constant 64 : index
    %410 = vector.load %arg15[%409, %c0_111, %c64_112] : memref<8x8x128xf32, #tpu.memory_space<vmem>>, vector<1x8x64xf32>
    %411 = vector.shape_cast %410 : vector<1x8x64xf32> to vector<8x64xf32>
    %412 = vector.shape_cast %408 : vector<8x64xf32> to vector<1x8x64xf32>
    tpu.vector_store %arg15[%409, %c0_111, %c64_112], %412 {strides = array<i32>} : memref<8x8x128xf32, #tpu.memory_space<vmem>>, vector<1x8x64xf32>,
    %c7_i32_113 = arith.constant 7 : i32
    %c7_i32_114 = arith.constant 7 : i32
    %413 = arith.subi %c7_i32_114, %c7_i32_113 : i32
    %414 = arith.index_cast %c7_i32_113 : i32 to index
    %c0_115 = arith.constant 0 : index
    %c0_116 = arith.constant 0 : index
    %415 = vector.load %arg14[%414, %c0_115, %c0_116] : memref<8x8x512xf32, #tpu.memory_space<vmem>>, vector<1x8x512xf32>
    %416 = vector.shape_cast %415 : vector<1x8x512xf32> to vector<8x512xf32>
    %417 = arith.index_cast %413 : i32 to index
    %c0_117 = arith.constant 0 : index
    %c0_118 = arith.constant 0 : index
    %418 = vector.load %arg14[%417, %c0_117, %c0_118] : memref<8x8x512xf32, #tpu.memory_space<vmem>>, vector<1x8x512xf32>
    %419 = vector.shape_cast %418 : vector<1x8x512xf32> to vector<8x512xf32>
    %420 = arith.select %30, %416, %419 : vector<8x512xi1>, vector<8x512xf32>
    %cst_119 = arith.constant dense<0.000000e+00> : vector<8x512xf32>
    %421 = tpu.matmul %399, %40, %cst_119 {dimension_numbers = #tpu.dot_dimension_numbers<[1], [0], [0], [1], [0, 0, 1, 1], [], []>} : vector<8x128xf32>, vector<128x512xf32>, vector<8x512xf32> -> vector<8x512xf32>
    %422 = arith.addf %420, %421 : vector<8x512xf32>
    %423 = vector.extract_strided_slice %422 {offsets = [0, 0], sizes = [8, 128], strides = [1, 1]} : vector<8x512xf32> to vector<8x128xf32>
    %424 = arith.negf %423 : vector<8x128xf32>
    %425 = math.exp %424 : vector<8x128xf32>
    %cst_120 = arith.constant 1.000000e+00 : f32
    %426 = vector.broadcast %cst_120 : f32 to vector<8x128xf32>
    %427 = arith.addf %426, %425 : vector<8x128xf32>
    %428 = arith.divf %426, %427 : vector<8x128xf32>
    %429 = vector.extract_strided_slice %422 {offsets = [0, 128], sizes = [8, 128], strides = [1, 1]} : vector<8x512xf32> to vector<8x128xf32>
    %430 = arith.negf %429 : vector<8x128xf32>
    %431 = math.exp %430 : vector<8x128xf32>
    %cst_121 = arith.constant 1.000000e+00 : f32
    %432 = vector.broadcast %cst_121 : f32 to vector<8x128xf32>
    %433 = arith.addf %432, %431 : vector<8x128xf32>
    %434 = arith.divf %432, %433 : vector<8x128xf32>
    %435 = vector.extract_strided_slice %422 {offsets = [0, 256], sizes = [8, 128], strides = [1, 1]} : vector<8x512xf32> to vector<8x128xf32>
    %436 = math.tanh %435 : vector<8x128xf32>
    %437 = vector.extract_strided_slice %422 {offsets = [0, 384], sizes = [8, 128], strides = [1, 1]} : vector<8x512xf32> to vector<8x128xf32>
    %438 = arith.negf %437 : vector<8x128xf32>
    %439 = math.exp %438 : vector<8x128xf32>
    %cst_122 = arith.constant 1.000000e+00 : f32
    %440 = vector.broadcast %cst_122 : f32 to vector<8x128xf32>
    %441 = arith.addf %440, %439 : vector<8x128xf32>
    %442 = arith.divf %440, %441 : vector<8x128xf32>
    %443 = arith.mulf %434, %400 : vector<8x128xf32>
    %444 = arith.mulf %428, %436 : vector<8x128xf32>
    %445 = arith.addf %443, %444 : vector<8x128xf32>
    %446 = math.tanh %445 : vector<8x128xf32>
    %447 = arith.mulf %442, %446 : vector<8x128xf32>
    %448 = vector.broadcast %c7_i32_113 : i32 to vector<8x128xi32>
    %449 = vector.broadcast %413 : i32 to vector<8x128xi32>
    %450 = arith.select %3, %448, %449 : vector<8x128xi1>, vector<8x128xi32>
    %451 = arith.cmpi slt, %450, %0 : vector<8x128xi32>
    %452 = arith.select %451, %447, %399 : vector<8x128xi1>, vector<8x128xf32>
    %453 = arith.select %451, %445, %400 : vector<8x128xi1>, vector<8x128xf32>
    %cst_123 = arith.constant 0.000000e+00 : f32
    %454 = vector.broadcast %cst_123 : f32 to vector<8x128xf32>
    %455 = arith.select %451, %452, %454 : vector<8x128xi1>, vector<8x128xf32>
    %456 = vector.extract_strided_slice %455 {offsets = [0, 0], sizes = [8, 64], strides = [1, 1]} : vector<8x128xf32> to vector<8x64xf32>
    %457 = arith.index_cast %c7_i32_113 : i32 to index
    %c0_124 = arith.constant 0 : index
    %c0_125 = arith.constant 0 : index
    %458 = vector.load %arg15[%457, %c0_124, %c0_125] : memref<8x8x128xf32, #tpu.memory_space<vmem>>, vector<1x8x64xf32>
    %459 = vector.shape_cast %458 : vector<1x8x64xf32> to vector<8x64xf32>
    %460 = vector.shape_cast %456 : vector<8x64xf32> to vector<1x8x64xf32>
    tpu.vector_store %arg15[%457, %c0_124, %c0_125], %460 {strides = array<i32>} : memref<8x8x128xf32, #tpu.memory_space<vmem>>, vector<1x8x64xf32>,
    %461 = vector.extract_strided_slice %455 {offsets = [0, 64], sizes = [8, 64], strides = [1, 1]} : vector<8x128xf32> to vector<8x64xf32>
    %462 = arith.index_cast %413 : i32 to index
    %c0_126 = arith.constant 0 : index
    %c64_127 = arith.constant 64 : index
    %463 = vector.load %arg15[%462, %c0_126, %c64_127] : memref<8x8x128xf32, #tpu.memory_space<vmem>>, vector<1x8x64xf32>
    %464 = vector.shape_cast %463 : vector<1x8x64xf32> to vector<8x64xf32>
    %465 = vector.shape_cast %461 : vector<8x64xf32> to vector<1x8x64xf32>
    tpu.vector_store %arg15[%462, %c0_126, %c64_127], %465 {strides = array<i32>} : memref<8x8x128xf32, #tpu.memory_space<vmem>>, vector<1x8x64xf32>,
    %c8_i32 = arith.constant 8 : i32
    %c0_128 = arith.constant 0 : index
    %c0_129 = arith.constant 0 : index
    %c0_130 = arith.constant 0 : index
    %466 = vector.load %arg15[%c0_128, %c0_129, %c0_130] : memref<8x8x128xf32, #tpu.memory_space<vmem>>, vector<8x8x128xf32>
    %467 = vector.shape_cast %466 : vector<8x8x128xf32> to vector<64x128xf32>
    %c0_131 = arith.constant 0 : index
    %c0_132 = arith.constant 0 : index
    %468 = vector.load %arg6[%c0_131, %c0_132] : memref<128x512xf32, #tpu.memory_space<vmem>>, vector<128x512xf32>
    %cst_133 = arith.constant dense<0.000000e+00> : vector<64x512xf32>
    %469 = tpu.matmul %467, %468, %cst_133 {dimension_numbers = #tpu.dot_dimension_numbers<[1], [0], [0], [1], [0, 0, 1, 1], [], []>} : vector<64x128xf32>, vector<128x512xf32>, vector<64x512xf32> -> vector<64x512xf32>
    %c0_134 = arith.constant 0 : index
    %c0_135 = arith.constant 0 : index
    %470 = vector.load %arg8[%c0_134, %c0_135] : memref<1x512xf32, #tpu.memory_space<vmem>>, vector<1x512xf32>
    %471 = vector.broadcast %470 : vector<1x512xf32> to vector<64x512xf32>
    %472 = arith.addf %469, %471 : vector<64x512xf32>
    %473 = vector.shape_cast %472 : vector<64x512xf32> to vector<8x8x512xf32>
    %c0_136 = arith.constant 0 : index
    %c0_137 = arith.constant 0 : index
    %c0_138 = arith.constant 0 : index
    %474 = vector.load %arg14[%c0_136, %c0_137, %c0_138] : memref<8x8x512xf32, #tpu.memory_space<vmem>>, vector<8x8x512xf32>
    tpu.vector_store %arg14[%c0_136, %c0_137, %c0_138], %473 {strides = array<i32>} : memref<8x8x512xf32, #tpu.memory_space<vmem>>, vector<8x8x512xf32>,
    %c0_139 = arith.constant 0 : index
    %c0_140 = arith.constant 0 : index
    %475 = vector.load %arg7[%c0_139, %c0_140] : memref<128x512xf32, #tpu.memory_space<vmem>>, vector<128x512xf32>
    %cst_141 = arith.constant 0.000000e+00 : f32
    %476 = vector.broadcast %cst_141 : f32 to vector<8x128xf32>
    %c0_i32_142 = arith.constant 0 : i32
    %c7_i32_143 = arith.constant 7 : i32
    %477 = arith.subi %c7_i32_143, %c0_i32_142 : i32
    %478 = arith.index_cast %c0_i32_142 : i32 to index
    %c0_144 = arith.constant 0 : index
    %c0_145 = arith.constant 0 : index
    %479 = vector.load %arg14[%478, %c0_144, %c0_145] : memref<8x8x512xf32, #tpu.memory_space<vmem>>, vector<1x8x512xf32>
    %480 = vector.shape_cast %479 : vector<1x8x512xf32> to vector<8x512xf32>
    %481 = arith.index_cast %477 : i32 to index
    %c0_146 = arith.constant 0 : index
    %c0_147 = arith.constant 0 : index
    %482 = vector.load %arg14[%481, %c0_146, %c0_147] : memref<8x8x512xf32, #tpu.memory_space<vmem>>, vector<1x8x512xf32>
    %483 = vector.shape_cast %482 : vector<1x8x512xf32> to vector<8x512xf32>
    %484 = arith.select %30, %480, %483 : vector<8x512xi1>, vector<8x512xf32>
    %cst_148 = arith.constant dense<0.000000e+00> : vector<8x512xf32>
    %485 = tpu.matmul %476, %475, %cst_148 {dimension_numbers = #tpu.dot_dimension_numbers<[1], [0], [0], [1], [0, 0, 1, 1], [], []>} : vector<8x128xf32>, vector<128x512xf32>, vector<8x512xf32> -> vector<8x512xf32>
    %486 = arith.addf %484, %485 : vector<8x512xf32>
    %487 = vector.extract_strided_slice %486 {offsets = [0, 0], sizes = [8, 128], strides = [1, 1]} : vector<8x512xf32> to vector<8x128xf32>
    %488 = arith.negf %487 : vector<8x128xf32>
    %489 = math.exp %488 : vector<8x128xf32>
    %cst_149 = arith.constant 1.000000e+00 : f32
    %490 = vector.broadcast %cst_149 : f32 to vector<8x128xf32>
    %491 = arith.addf %490, %489 : vector<8x128xf32>
    %492 = arith.divf %490, %491 : vector<8x128xf32>
    %493 = vector.extract_strided_slice %486 {offsets = [0, 128], sizes = [8, 128], strides = [1, 1]} : vector<8x512xf32> to vector<8x128xf32>
    %494 = arith.negf %493 : vector<8x128xf32>
    %495 = math.exp %494 : vector<8x128xf32>
    %cst_150 = arith.constant 1.000000e+00 : f32
    %496 = vector.broadcast %cst_150 : f32 to vector<8x128xf32>
    %497 = arith.addf %496, %495 : vector<8x128xf32>
    %498 = arith.divf %496, %497 : vector<8x128xf32>
    %499 = vector.extract_strided_slice %486 {offsets = [0, 256], sizes = [8, 128], strides = [1, 1]} : vector<8x512xf32> to vector<8x128xf32>
    %500 = math.tanh %499 : vector<8x128xf32>
    %501 = vector.extract_strided_slice %486 {offsets = [0, 384], sizes = [8, 128], strides = [1, 1]} : vector<8x512xf32> to vector<8x128xf32>
    %502 = arith.negf %501 : vector<8x128xf32>
    %503 = math.exp %502 : vector<8x128xf32>
    %cst_151 = arith.constant 1.000000e+00 : f32
    %504 = vector.broadcast %cst_151 : f32 to vector<8x128xf32>
    %505 = arith.addf %504, %503 : vector<8x128xf32>
    %506 = arith.divf %504, %505 : vector<8x128xf32>
    %507 = arith.mulf %498, %476 : vector<8x128xf32>
    %508 = arith.mulf %492, %500 : vector<8x128xf32>
    %509 = arith.addf %507, %508 : vector<8x128xf32>
    %510 = math.tanh %509 : vector<8x128xf32>
    %511 = arith.mulf %506, %510 : vector<8x128xf32>
    %512 = vector.broadcast %c0_i32_142 : i32 to vector<8x128xi32>
    %513 = vector.broadcast %477 : i32 to vector<8x128xi32>
    %514 = arith.select %3, %512, %513 : vector<8x128xi1>, vector<8x128xi32>
    %515 = arith.cmpi slt, %514, %0 : vector<8x128xi32>
    %516 = arith.select %515, %511, %476 : vector<8x128xi1>, vector<8x128xf32>
    %517 = arith.select %515, %509, %476 : vector<8x128xi1>, vector<8x128xf32>
    %c1_i32_152 = arith.constant 1 : i32
    %c7_i32_153 = arith.constant 7 : i32
    %518 = arith.subi %c7_i32_153, %c1_i32_152 : i32
    %519 = arith.index_cast %c1_i32_152 : i32 to index
    %c0_154 = arith.constant 0 : index
    %c0_155 = arith.constant 0 : index
    %520 = vector.load %arg14[%519, %c0_154, %c0_155] : memref<8x8x512xf32, #tpu.memory_space<vmem>>, vector<1x8x512xf32>
    %521 = vector.shape_cast %520 : vector<1x8x512xf32> to vector<8x512xf32>
    %522 = arith.index_cast %518 : i32 to index
    %c0_156 = arith.constant 0 : index
    %c0_157 = arith.constant 0 : index
    %523 = vector.load %arg14[%522, %c0_156, %c0_157] : memref<8x8x512xf32, #tpu.memory_space<vmem>>, vector<1x8x512xf32>
    %524 = vector.shape_cast %523 : vector<1x8x512xf32> to vector<8x512xf32>
    %525 = arith.select %30, %521, %524 : vector<8x512xi1>, vector<8x512xf32>
    %cst_158 = arith.constant dense<0.000000e+00> : vector<8x512xf32>
    %526 = tpu.matmul %516, %475, %cst_158 {dimension_numbers = #tpu.dot_dimension_numbers<[1], [0], [0], [1], [0, 0, 1, 1], [], []>} : vector<8x128xf32>, vector<128x512xf32>, vector<8x512xf32> -> vector<8x512xf32>
    %527 = arith.addf %525, %526 : vector<8x512xf32>
    %528 = vector.extract_strided_slice %527 {offsets = [0, 0], sizes = [8, 128], strides = [1, 1]} : vector<8x512xf32> to vector<8x128xf32>
    %529 = arith.negf %528 : vector<8x128xf32>
    %530 = math.exp %529 : vector<8x128xf32>
    %cst_159 = arith.constant 1.000000e+00 : f32
    %531 = vector.broadcast %cst_159 : f32 to vector<8x128xf32>
    %532 = arith.addf %531, %530 : vector<8x128xf32>
    %533 = arith.divf %531, %532 : vector<8x128xf32>
    %534 = vector.extract_strided_slice %527 {offsets = [0, 128], sizes = [8, 128], strides = [1, 1]} : vector<8x512xf32> to vector<8x128xf32>
    %535 = arith.negf %534 : vector<8x128xf32>
    %536 = math.exp %535 : vector<8x128xf32>
    %cst_160 = arith.constant 1.000000e+00 : f32
    %537 = vector.broadcast %cst_160 : f32 to vector<8x128xf32>
    %538 = arith.addf %537, %536 : vector<8x128xf32>
    %539 = arith.divf %537, %538 : vector<8x128xf32>
    %540 = vector.extract_strided_slice %527 {offsets = [0, 256], sizes = [8, 128], strides = [1, 1]} : vector<8x512xf32> to vector<8x128xf32>
    %541 = math.tanh %540 : vector<8x128xf32>
    %542 = vector.extract_strided_slice %527 {offsets = [0, 384], sizes = [8, 128], strides = [1, 1]} : vector<8x512xf32> to vector<8x128xf32>
    %543 = arith.negf %542 : vector<8x128xf32>
    %544 = math.exp %543 : vector<8x128xf32>
    %cst_161 = arith.constant 1.000000e+00 : f32
    %545 = vector.broadcast %cst_161 : f32 to vector<8x128xf32>
    %546 = arith.addf %545, %544 : vector<8x128xf32>
    %547 = arith.divf %545, %546 : vector<8x128xf32>
    %548 = arith.mulf %539, %517 : vector<8x128xf32>
    %549 = arith.mulf %533, %541 : vector<8x128xf32>
    %550 = arith.addf %548, %549 : vector<8x128xf32>
    %551 = math.tanh %550 : vector<8x128xf32>
    %552 = arith.mulf %547, %551 : vector<8x128xf32>
    %553 = vector.broadcast %c1_i32_152 : i32 to vector<8x128xi32>
    %554 = vector.broadcast %518 : i32 to vector<8x128xi32>
    %555 = arith.select %3, %553, %554 : vector<8x128xi1>, vector<8x128xi32>
    %556 = arith.cmpi slt, %555, %0 : vector<8x128xi32>
    %557 = arith.select %556, %552, %516 : vector<8x128xi1>, vector<8x128xf32>
    %558 = arith.select %556, %550, %517 : vector<8x128xi1>, vector<8x128xf32>
    %c2_i32_162 = arith.constant 2 : i32
    %c7_i32_163 = arith.constant 7 : i32
    %559 = arith.subi %c7_i32_163, %c2_i32_162 : i32
    %560 = arith.index_cast %c2_i32_162 : i32 to index
    %c0_164 = arith.constant 0 : index
    %c0_165 = arith.constant 0 : index
    %561 = vector.load %arg14[%560, %c0_164, %c0_165] : memref<8x8x512xf32, #tpu.memory_space<vmem>>, vector<1x8x512xf32>
    %562 = vector.shape_cast %561 : vector<1x8x512xf32> to vector<8x512xf32>
    %563 = arith.index_cast %559 : i32 to index
    %c0_166 = arith.constant 0 : index
    %c0_167 = arith.constant 0 : index
    %564 = vector.load %arg14[%563, %c0_166, %c0_167] : memref<8x8x512xf32, #tpu.memory_space<vmem>>, vector<1x8x512xf32>
    %565 = vector.shape_cast %564 : vector<1x8x512xf32> to vector<8x512xf32>
    %566 = arith.select %30, %562, %565 : vector<8x512xi1>, vector<8x512xf32>
    %cst_168 = arith.constant dense<0.000000e+00> : vector<8x512xf32>
    %567 = tpu.matmul %557, %475, %cst_168 {dimension_numbers = #tpu.dot_dimension_numbers<[1], [0], [0], [1], [0, 0, 1, 1], [], []>} : vector<8x128xf32>, vector<128x512xf32>, vector<8x512xf32> -> vector<8x512xf32>
    %568 = arith.addf %566, %567 : vector<8x512xf32>
    %569 = vector.extract_strided_slice %568 {offsets = [0, 0], sizes = [8, 128], strides = [1, 1]} : vector<8x512xf32> to vector<8x128xf32>
    %570 = arith.negf %569 : vector<8x128xf32>
    %571 = math.exp %570 : vector<8x128xf32>
    %cst_169 = arith.constant 1.000000e+00 : f32
    %572 = vector.broadcast %cst_169 : f32 to vector<8x128xf32>
    %573 = arith.addf %572, %571 : vector<8x128xf32>
    %574 = arith.divf %572, %573 : vector<8x128xf32>
    %575 = vector.extract_strided_slice %568 {offsets = [0, 128], sizes = [8, 128], strides = [1, 1]} : vector<8x512xf32> to vector<8x128xf32>
    %576 = arith.negf %575 : vector<8x128xf32>
    %577 = math.exp %576 : vector<8x128xf32>
    %cst_170 = arith.constant 1.000000e+00 : f32
    %578 = vector.broadcast %cst_170 : f32 to vector<8x128xf32>
    %579 = arith.addf %578, %577 : vector<8x128xf32>
    %580 = arith.divf %578, %579 : vector<8x128xf32>
    %581 = vector.extract_strided_slice %568 {offsets = [0, 256], sizes = [8, 128], strides = [1, 1]} : vector<8x512xf32> to vector<8x128xf32>
    %582 = math.tanh %581 : vector<8x128xf32>
    %583 = vector.extract_strided_slice %568 {offsets = [0, 384], sizes = [8, 128], strides = [1, 1]} : vector<8x512xf32> to vector<8x128xf32>
    %584 = arith.negf %583 : vector<8x128xf32>
    %585 = math.exp %584 : vector<8x128xf32>
    %cst_171 = arith.constant 1.000000e+00 : f32
    %586 = vector.broadcast %cst_171 : f32 to vector<8x128xf32>
    %587 = arith.addf %586, %585 : vector<8x128xf32>
    %588 = arith.divf %586, %587 : vector<8x128xf32>
    %589 = arith.mulf %580, %558 : vector<8x128xf32>
    %590 = arith.mulf %574, %582 : vector<8x128xf32>
    %591 = arith.addf %589, %590 : vector<8x128xf32>
    %592 = math.tanh %591 : vector<8x128xf32>
    %593 = arith.mulf %588, %592 : vector<8x128xf32>
    %594 = vector.broadcast %c2_i32_162 : i32 to vector<8x128xi32>
    %595 = vector.broadcast %559 : i32 to vector<8x128xi32>
    %596 = arith.select %3, %594, %595 : vector<8x128xi1>, vector<8x128xi32>
    %597 = arith.cmpi slt, %596, %0 : vector<8x128xi32>
    %598 = arith.select %597, %593, %557 : vector<8x128xi1>, vector<8x128xf32>
    %599 = arith.select %597, %591, %558 : vector<8x128xi1>, vector<8x128xf32>
    %c3_i32_172 = arith.constant 3 : i32
    %c7_i32_173 = arith.constant 7 : i32
    %600 = arith.subi %c7_i32_173, %c3_i32_172 : i32
    %601 = arith.index_cast %c3_i32_172 : i32 to index
    %c0_174 = arith.constant 0 : index
    %c0_175 = arith.constant 0 : index
    %602 = vector.load %arg14[%601, %c0_174, %c0_175] : memref<8x8x512xf32, #tpu.memory_space<vmem>>, vector<1x8x512xf32>
    %603 = vector.shape_cast %602 : vector<1x8x512xf32> to vector<8x512xf32>
    %604 = arith.index_cast %600 : i32 to index
    %c0_176 = arith.constant 0 : index
    %c0_177 = arith.constant 0 : index
    %605 = vector.load %arg14[%604, %c0_176, %c0_177] : memref<8x8x512xf32, #tpu.memory_space<vmem>>, vector<1x8x512xf32>
    %606 = vector.shape_cast %605 : vector<1x8x512xf32> to vector<8x512xf32>
    %607 = arith.select %30, %603, %606 : vector<8x512xi1>, vector<8x512xf32>
    %cst_178 = arith.constant dense<0.000000e+00> : vector<8x512xf32>
    %608 = tpu.matmul %598, %475, %cst_178 {dimension_numbers = #tpu.dot_dimension_numbers<[1], [0], [0], [1], [0, 0, 1, 1], [], []>} : vector<8x128xf32>, vector<128x512xf32>, vector<8x512xf32> -> vector<8x512xf32>
    %609 = arith.addf %607, %608 : vector<8x512xf32>
    %610 = vector.extract_strided_slice %609 {offsets = [0, 0], sizes = [8, 128], strides = [1, 1]} : vector<8x512xf32> to vector<8x128xf32>
    %611 = arith.negf %610 : vector<8x128xf32>
    %612 = math.exp %611 : vector<8x128xf32>
    %cst_179 = arith.constant 1.000000e+00 : f32
    %613 = vector.broadcast %cst_179 : f32 to vector<8x128xf32>
    %614 = arith.addf %613, %612 : vector<8x128xf32>
    %615 = arith.divf %613, %614 : vector<8x128xf32>
    %616 = vector.extract_strided_slice %609 {offsets = [0, 128], sizes = [8, 128], strides = [1, 1]} : vector<8x512xf32> to vector<8x128xf32>
    %617 = arith.negf %616 : vector<8x128xf32>
    %618 = math.exp %617 : vector<8x128xf32>
    %cst_180 = arith.constant 1.000000e+00 : f32
    %619 = vector.broadcast %cst_180 : f32 to vector<8x128xf32>
    %620 = arith.addf %619, %618 : vector<8x128xf32>
    %621 = arith.divf %619, %620 : vector<8x128xf32>
    %622 = vector.extract_strided_slice %609 {offsets = [0, 256], sizes = [8, 128], strides = [1, 1]} : vector<8x512xf32> to vector<8x128xf32>
    %623 = math.tanh %622 : vector<8x128xf32>
    %624 = vector.extract_strided_slice %609 {offsets = [0, 384], sizes = [8, 128], strides = [1, 1]} : vector<8x512xf32> to vector<8x128xf32>
    %625 = arith.negf %624 : vector<8x128xf32>
    %626 = math.exp %625 : vector<8x128xf32>
    %cst_181 = arith.constant 1.000000e+00 : f32
    %627 = vector.broadcast %cst_181 : f32 to vector<8x128xf32>
    %628 = arith.addf %627, %626 : vector<8x128xf32>
    %629 = arith.divf %627, %628 : vector<8x128xf32>
    %630 = arith.mulf %621, %599 : vector<8x128xf32>
    %631 = arith.mulf %615, %623 : vector<8x128xf32>
    %632 = arith.addf %630, %631 : vector<8x128xf32>
    %633 = math.tanh %632 : vector<8x128xf32>
    %634 = arith.mulf %629, %633 : vector<8x128xf32>
    %635 = vector.broadcast %c3_i32_172 : i32 to vector<8x128xi32>
    %636 = vector.broadcast %600 : i32 to vector<8x128xi32>
    %637 = arith.select %3, %635, %636 : vector<8x128xi1>, vector<8x128xi32>
    %638 = arith.cmpi slt, %637, %0 : vector<8x128xi32>
    %639 = arith.select %638, %634, %598 : vector<8x128xi1>, vector<8x128xf32>
    %640 = arith.select %638, %632, %599 : vector<8x128xi1>, vector<8x128xf32>
    %c4_i32_182 = arith.constant 4 : i32
    %c7_i32_183 = arith.constant 7 : i32
    %641 = arith.subi %c7_i32_183, %c4_i32_182 : i32
    %642 = arith.index_cast %c4_i32_182 : i32 to index
    %c0_184 = arith.constant 0 : index
    %c0_185 = arith.constant 0 : index
    %643 = vector.load %arg14[%642, %c0_184, %c0_185] : memref<8x8x512xf32, #tpu.memory_space<vmem>>, vector<1x8x512xf32>
    %644 = vector.shape_cast %643 : vector<1x8x512xf32> to vector<8x512xf32>
    %645 = arith.index_cast %641 : i32 to index
    %c0_186 = arith.constant 0 : index
    %c0_187 = arith.constant 0 : index
    %646 = vector.load %arg14[%645, %c0_186, %c0_187] : memref<8x8x512xf32, #tpu.memory_space<vmem>>, vector<1x8x512xf32>
    %647 = vector.shape_cast %646 : vector<1x8x512xf32> to vector<8x512xf32>
    %648 = arith.select %30, %644, %647 : vector<8x512xi1>, vector<8x512xf32>
    %cst_188 = arith.constant dense<0.000000e+00> : vector<8x512xf32>
    %649 = tpu.matmul %639, %475, %cst_188 {dimension_numbers = #tpu.dot_dimension_numbers<[1], [0], [0], [1], [0, 0, 1, 1], [], []>} : vector<8x128xf32>, vector<128x512xf32>, vector<8x512xf32> -> vector<8x512xf32>
    %650 = arith.addf %648, %649 : vector<8x512xf32>
    %651 = vector.extract_strided_slice %650 {offsets = [0, 0], sizes = [8, 128], strides = [1, 1]} : vector<8x512xf32> to vector<8x128xf32>
    %652 = arith.negf %651 : vector<8x128xf32>
    %653 = math.exp %652 : vector<8x128xf32>
    %cst_189 = arith.constant 1.000000e+00 : f32
    %654 = vector.broadcast %cst_189 : f32 to vector<8x128xf32>
    %655 = arith.addf %654, %653 : vector<8x128xf32>
    %656 = arith.divf %654, %655 : vector<8x128xf32>
    %657 = vector.extract_strided_slice %650 {offsets = [0, 128], sizes = [8, 128], strides = [1, 1]} : vector<8x512xf32> to vector<8x128xf32>
    %658 = arith.negf %657 : vector<8x128xf32>
    %659 = math.exp %658 : vector<8x128xf32>
    %cst_190 = arith.constant 1.000000e+00 : f32
    %660 = vector.broadcast %cst_190 : f32 to vector<8x128xf32>
    %661 = arith.addf %660, %659 : vector<8x128xf32>
    %662 = arith.divf %660, %661 : vector<8x128xf32>
    %663 = vector.extract_strided_slice %650 {offsets = [0, 256], sizes = [8, 128], strides = [1, 1]} : vector<8x512xf32> to vector<8x128xf32>
    %664 = math.tanh %663 : vector<8x128xf32>
    %665 = vector.extract_strided_slice %650 {offsets = [0, 384], sizes = [8, 128], strides = [1, 1]} : vector<8x512xf32> to vector<8x128xf32>
    %666 = arith.negf %665 : vector<8x128xf32>
    %667 = math.exp %666 : vector<8x128xf32>
    %cst_191 = arith.constant 1.000000e+00 : f32
    %668 = vector.broadcast %cst_191 : f32 to vector<8x128xf32>
    %669 = arith.addf %668, %667 : vector<8x128xf32>
    %670 = arith.divf %668, %669 : vector<8x128xf32>
    %671 = arith.mulf %662, %640 : vector<8x128xf32>
    %672 = arith.mulf %656, %664 : vector<8x128xf32>
    %673 = arith.addf %671, %672 : vector<8x128xf32>
    %674 = math.tanh %673 : vector<8x128xf32>
    %675 = arith.mulf %670, %674 : vector<8x128xf32>
    %676 = vector.broadcast %c4_i32_182 : i32 to vector<8x128xi32>
    %677 = vector.broadcast %641 : i32 to vector<8x128xi32>
    %678 = arith.select %3, %676, %677 : vector<8x128xi1>, vector<8x128xi32>
    %679 = arith.cmpi slt, %678, %0 : vector<8x128xi32>
    %680 = arith.select %679, %675, %639 : vector<8x128xi1>, vector<8x128xf32>
    %681 = arith.select %679, %673, %640 : vector<8x128xi1>, vector<8x128xf32>
    %c5_i32_192 = arith.constant 5 : i32
    %c7_i32_193 = arith.constant 7 : i32
    %682 = arith.subi %c7_i32_193, %c5_i32_192 : i32
    %683 = arith.index_cast %c5_i32_192 : i32 to index
    %c0_194 = arith.constant 0 : index
    %c0_195 = arith.constant 0 : index
    %684 = vector.load %arg14[%683, %c0_194, %c0_195] : memref<8x8x512xf32, #tpu.memory_space<vmem>>, vector<1x8x512xf32>
    %685 = vector.shape_cast %684 : vector<1x8x512xf32> to vector<8x512xf32>
    %686 = arith.index_cast %682 : i32 to index
    %c0_196 = arith.constant 0 : index
    %c0_197 = arith.constant 0 : index
    %687 = vector.load %arg14[%686, %c0_196, %c0_197] : memref<8x8x512xf32, #tpu.memory_space<vmem>>, vector<1x8x512xf32>
    %688 = vector.shape_cast %687 : vector<1x8x512xf32> to vector<8x512xf32>
    %689 = arith.select %30, %685, %688 : vector<8x512xi1>, vector<8x512xf32>
    %cst_198 = arith.constant dense<0.000000e+00> : vector<8x512xf32>
    %690 = tpu.matmul %680, %475, %cst_198 {dimension_numbers = #tpu.dot_dimension_numbers<[1], [0], [0], [1], [0, 0, 1, 1], [], []>} : vector<8x128xf32>, vector<128x512xf32>, vector<8x512xf32> -> vector<8x512xf32>
    %691 = arith.addf %689, %690 : vector<8x512xf32>
    %692 = vector.extract_strided_slice %691 {offsets = [0, 0], sizes = [8, 128], strides = [1, 1]} : vector<8x512xf32> to vector<8x128xf32>
    %693 = arith.negf %692 : vector<8x128xf32>
    %694 = math.exp %693 : vector<8x128xf32>
    %cst_199 = arith.constant 1.000000e+00 : f32
    %695 = vector.broadcast %cst_199 : f32 to vector<8x128xf32>
    %696 = arith.addf %695, %694 : vector<8x128xf32>
    %697 = arith.divf %695, %696 : vector<8x128xf32>
    %698 = vector.extract_strided_slice %691 {offsets = [0, 128], sizes = [8, 128], strides = [1, 1]} : vector<8x512xf32> to vector<8x128xf32>
    %699 = arith.negf %698 : vector<8x128xf32>
    %700 = math.exp %699 : vector<8x128xf32>
    %cst_200 = arith.constant 1.000000e+00 : f32
    %701 = vector.broadcast %cst_200 : f32 to vector<8x128xf32>
    %702 = arith.addf %701, %700 : vector<8x128xf32>
    %703 = arith.divf %701, %702 : vector<8x128xf32>
    %704 = vector.extract_strided_slice %691 {offsets = [0, 256], sizes = [8, 128], strides = [1, 1]} : vector<8x512xf32> to vector<8x128xf32>
    %705 = math.tanh %704 : vector<8x128xf32>
    %706 = vector.extract_strided_slice %691 {offsets = [0, 384], sizes = [8, 128], strides = [1, 1]} : vector<8x512xf32> to vector<8x128xf32>
    %707 = arith.negf %706 : vector<8x128xf32>
    %708 = math.exp %707 : vector<8x128xf32>
    %cst_201 = arith.constant 1.000000e+00 : f32
    %709 = vector.broadcast %cst_201 : f32 to vector<8x128xf32>
    %710 = arith.addf %709, %708 : vector<8x128xf32>
    %711 = arith.divf %709, %710 : vector<8x128xf32>
    %712 = arith.mulf %703, %681 : vector<8x128xf32>
    %713 = arith.mulf %697, %705 : vector<8x128xf32>
    %714 = arith.addf %712, %713 : vector<8x128xf32>
    %715 = math.tanh %714 : vector<8x128xf32>
    %716 = arith.mulf %711, %715 : vector<8x128xf32>
    %717 = vector.broadcast %c5_i32_192 : i32 to vector<8x128xi32>
    %718 = vector.broadcast %682 : i32 to vector<8x128xi32>
    %719 = arith.select %3, %717, %718 : vector<8x128xi1>, vector<8x128xi32>
    %720 = arith.cmpi slt, %719, %0 : vector<8x128xi32>
    %721 = arith.select %720, %716, %680 : vector<8x128xi1>, vector<8x128xf32>
    %722 = arith.select %720, %714, %681 : vector<8x128xi1>, vector<8x128xf32>
    %c6_i32_202 = arith.constant 6 : i32
    %c7_i32_203 = arith.constant 7 : i32
    %723 = arith.subi %c7_i32_203, %c6_i32_202 : i32
    %724 = arith.index_cast %c6_i32_202 : i32 to index
    %c0_204 = arith.constant 0 : index
    %c0_205 = arith.constant 0 : index
    %725 = vector.load %arg14[%724, %c0_204, %c0_205] : memref<8x8x512xf32, #tpu.memory_space<vmem>>, vector<1x8x512xf32>
    %726 = vector.shape_cast %725 : vector<1x8x512xf32> to vector<8x512xf32>
    %727 = arith.index_cast %723 : i32 to index
    %c0_206 = arith.constant 0 : index
    %c0_207 = arith.constant 0 : index
    %728 = vector.load %arg14[%727, %c0_206, %c0_207] : memref<8x8x512xf32, #tpu.memory_space<vmem>>, vector<1x8x512xf32>
    %729 = vector.shape_cast %728 : vector<1x8x512xf32> to vector<8x512xf32>
    %730 = arith.select %30, %726, %729 : vector<8x512xi1>, vector<8x512xf32>
    %cst_208 = arith.constant dense<0.000000e+00> : vector<8x512xf32>
    %731 = tpu.matmul %721, %475, %cst_208 {dimension_numbers = #tpu.dot_dimension_numbers<[1], [0], [0], [1], [0, 0, 1, 1], [], []>} : vector<8x128xf32>, vector<128x512xf32>, vector<8x512xf32> -> vector<8x512xf32>
    %732 = arith.addf %730, %731 : vector<8x512xf32>
    %733 = vector.extract_strided_slice %732 {offsets = [0, 0], sizes = [8, 128], strides = [1, 1]} : vector<8x512xf32> to vector<8x128xf32>
    %734 = arith.negf %733 : vector<8x128xf32>
    %735 = math.exp %734 : vector<8x128xf32>
    %cst_209 = arith.constant 1.000000e+00 : f32
    %736 = vector.broadcast %cst_209 : f32 to vector<8x128xf32>
    %737 = arith.addf %736, %735 : vector<8x128xf32>
    %738 = arith.divf %736, %737 : vector<8x128xf32>
    %739 = vector.extract_strided_slice %732 {offsets = [0, 128], sizes = [8, 128], strides = [1, 1]} : vector<8x512xf32> to vector<8x128xf32>
    %740 = arith.negf %739 : vector<8x128xf32>
    %741 = math.exp %740 : vector<8x128xf32>
    %cst_210 = arith.constant 1.000000e+00 : f32
    %742 = vector.broadcast %cst_210 : f32 to vector<8x128xf32>
    %743 = arith.addf %742, %741 : vector<8x128xf32>
    %744 = arith.divf %742, %743 : vector<8x128xf32>
    %745 = vector.extract_strided_slice %732 {offsets = [0, 256], sizes = [8, 128], strides = [1, 1]} : vector<8x512xf32> to vector<8x128xf32>
    %746 = math.tanh %745 : vector<8x128xf32>
    %747 = vector.extract_strided_slice %732 {offsets = [0, 384], sizes = [8, 128], strides = [1, 1]} : vector<8x512xf32> to vector<8x128xf32>
    %748 = arith.negf %747 : vector<8x128xf32>
    %749 = math.exp %748 : vector<8x128xf32>
    %cst_211 = arith.constant 1.000000e+00 : f32
    %750 = vector.broadcast %cst_211 : f32 to vector<8x128xf32>
    %751 = arith.addf %750, %749 : vector<8x128xf32>
    %752 = arith.divf %750, %751 : vector<8x128xf32>
    %753 = arith.mulf %744, %722 : vector<8x128xf32>
    %754 = arith.mulf %738, %746 : vector<8x128xf32>
    %755 = arith.addf %753, %754 : vector<8x128xf32>
    %756 = math.tanh %755 : vector<8x128xf32>
    %757 = arith.mulf %752, %756 : vector<8x128xf32>
    %758 = vector.broadcast %c6_i32_202 : i32 to vector<8x128xi32>
    %759 = vector.broadcast %723 : i32 to vector<8x128xi32>
    %760 = arith.select %3, %758, %759 : vector<8x128xi1>, vector<8x128xi32>
    %761 = arith.cmpi slt, %760, %0 : vector<8x128xi32>
    %762 = arith.select %761, %757, %721 : vector<8x128xi1>, vector<8x128xf32>
    %763 = arith.select %761, %755, %722 : vector<8x128xi1>, vector<8x128xf32>
    %c7_i32_212 = arith.constant 7 : i32
    %c7_i32_213 = arith.constant 7 : i32
    %764 = arith.subi %c7_i32_213, %c7_i32_212 : i32
    %765 = arith.index_cast %c7_i32_212 : i32 to index
    %c0_214 = arith.constant 0 : index
    %c0_215 = arith.constant 0 : index
    %766 = vector.load %arg14[%765, %c0_214, %c0_215] : memref<8x8x512xf32, #tpu.memory_space<vmem>>, vector<1x8x512xf32>
    %767 = vector.shape_cast %766 : vector<1x8x512xf32> to vector<8x512xf32>
    %768 = arith.index_cast %764 : i32 to index
    %c0_216 = arith.constant 0 : index
    %c0_217 = arith.constant 0 : index
    %769 = vector.load %arg14[%768, %c0_216, %c0_217] : memref<8x8x512xf32, #tpu.memory_space<vmem>>, vector<1x8x512xf32>
    %770 = vector.shape_cast %769 : vector<1x8x512xf32> to vector<8x512xf32>
    %771 = arith.select %30, %767, %770 : vector<8x512xi1>, vector<8x512xf32>
    %cst_218 = arith.constant dense<0.000000e+00> : vector<8x512xf32>
    %772 = tpu.matmul %762, %475, %cst_218 {dimension_numbers = #tpu.dot_dimension_numbers<[1], [0], [0], [1], [0, 0, 1, 1], [], []>} : vector<8x128xf32>, vector<128x512xf32>, vector<8x512xf32> -> vector<8x512xf32>
    %773 = arith.addf %771, %772 : vector<8x512xf32>
    %774 = vector.extract_strided_slice %773 {offsets = [0, 0], sizes = [8, 128], strides = [1, 1]} : vector<8x512xf32> to vector<8x128xf32>
    %775 = arith.negf %774 : vector<8x128xf32>
    %776 = math.exp %775 : vector<8x128xf32>
    %cst_219 = arith.constant 1.000000e+00 : f32
    %777 = vector.broadcast %cst_219 : f32 to vector<8x128xf32>
    %778 = arith.addf %777, %776 : vector<8x128xf32>
    %779 = arith.divf %777, %778 : vector<8x128xf32>
    %780 = vector.extract_strided_slice %773 {offsets = [0, 128], sizes = [8, 128], strides = [1, 1]} : vector<8x512xf32> to vector<8x128xf32>
    %781 = arith.negf %780 : vector<8x128xf32>
    %782 = math.exp %781 : vector<8x128xf32>
    %cst_220 = arith.constant 1.000000e+00 : f32
    %783 = vector.broadcast %cst_220 : f32 to vector<8x128xf32>
    %784 = arith.addf %783, %782 : vector<8x128xf32>
    %785 = arith.divf %783, %784 : vector<8x128xf32>
    %786 = vector.extract_strided_slice %773 {offsets = [0, 256], sizes = [8, 128], strides = [1, 1]} : vector<8x512xf32> to vector<8x128xf32>
    %787 = math.tanh %786 : vector<8x128xf32>
    %788 = vector.extract_strided_slice %773 {offsets = [0, 384], sizes = [8, 128], strides = [1, 1]} : vector<8x512xf32> to vector<8x128xf32>
    %789 = arith.negf %788 : vector<8x128xf32>
    %790 = math.exp %789 : vector<8x128xf32>
    %cst_221 = arith.constant 1.000000e+00 : f32
    %791 = vector.broadcast %cst_221 : f32 to vector<8x128xf32>
    %792 = arith.addf %791, %790 : vector<8x128xf32>
    %793 = arith.divf %791, %792 : vector<8x128xf32>
    %794 = arith.mulf %785, %763 : vector<8x128xf32>
    %795 = arith.mulf %779, %787 : vector<8x128xf32>
    %796 = arith.addf %794, %795 : vector<8x128xf32>
    %797 = math.tanh %796 : vector<8x128xf32>
    %798 = arith.mulf %793, %797 : vector<8x128xf32>
    %799 = vector.broadcast %c7_i32_212 : i32 to vector<8x128xi32>
    %800 = vector.broadcast %764 : i32 to vector<8x128xi32>
    %801 = arith.select %3, %799, %800 : vector<8x128xi1>, vector<8x128xi32>
    %802 = arith.cmpi slt, %801, %0 : vector<8x128xi32>
    %803 = arith.select %802, %798, %762 : vector<8x128xi1>, vector<8x128xf32>
    %804 = arith.select %802, %796, %763 : vector<8x128xi1>, vector<8x128xf32>
    %c8_i32_222 = arith.constant 8 : i32
    %c0_223 = arith.constant 0 : index
    %c0_224 = arith.constant 0 : index
    %805 = vector.load %arg9[%c0_223, %c0_224] : memref<128x128xf32, #tpu.memory_space<vmem>>, vector<128x128xf32>
    %cst_225 = arith.constant dense<0.000000e+00> : vector<8x128xf32>
    %806 = tpu.matmul %803, %805, %cst_225 {dimension_numbers = #tpu.dot_dimension_numbers<[1], [0], [0], [1], [0, 0, 1, 1], [], []>} : vector<8x128xf32>, vector<128x128xf32>, vector<8x128xf32> -> vector<8x128xf32>
    %c0_226 = arith.constant 0 : index
    %c0_227 = arith.constant 0 : index
    %807 = vector.load %arg10[%c0_226, %c0_227] : memref<1x128xf32, #tpu.memory_space<vmem>>, vector<1x128xf32>
    %808 = vector.broadcast %807 : vector<1x128xf32> to vector<8x128xf32>
    %809 = arith.addf %806, %808 : vector<8x128xf32>
    %cst_228 = arith.constant 0.000000e+00 : f32
    %810 = vector.broadcast %cst_228 : f32 to vector<8x128xf32>
    %811 = arith.maximumf %809, %810 : vector<8x128xf32>
    %c0_229 = arith.constant 0 : index
    %c0_230 = arith.constant 0 : index
    %812 = vector.load %arg11[%c0_229, %c0_230] : memref<128x128xf32, #tpu.memory_space<vmem>>, vector<128x128xf32>
    %cst_231 = arith.constant dense<0.000000e+00> : vector<8x128xf32>
    %813 = tpu.matmul %811, %812, %cst_231 {dimension_numbers = #tpu.dot_dimension_numbers<[1], [0], [0], [1], [0, 0, 1, 1], [], []>} : vector<8x128xf32>, vector<128x128xf32>, vector<8x128xf32> -> vector<8x128xf32>
    %c0_232 = arith.constant 0 : index
    %c0_233 = arith.constant 0 : index
    %814 = vector.load %arg12[%c0_232, %c0_233] : memref<1x128xf32, #tpu.memory_space<vmem>>, vector<1x128xf32>
    %815 = vector.broadcast %814 : vector<1x128xf32> to vector<8x128xf32>
    %816 = arith.addf %813, %815 : vector<8x128xf32>
    %817 = arith.negf %816 : vector<8x128xf32>
    %818 = math.exp %817 : vector<8x128xf32>
    %cst_234 = arith.constant 1.000000e+00 : f32
    %819 = vector.broadcast %cst_234 : f32 to vector<8x128xf32>
    %820 = arith.addf %819, %818 : vector<8x128xf32>
    %821 = arith.divf %819, %820 : vector<8x128xf32>
    %c0_235 = arith.constant 0 : index
    %c0_236 = arith.constant 0 : index
    %822 = vector.load %arg13[%c0_235, %c0_236] : memref<8x128xf32, #tpu.memory_space<vmem>>, vector<8x128xf32>
    tpu.vector_store %arg13[%c0_235, %c0_236], %821 {strides = array<i32>} : memref<8x128xf32, #tpu.memory_space<vmem>>, vector<8x128xf32>,
    return
  }
  func.func @transform_0(%arg0: i32) -> (i32, i32) {
    %c0_i32 = arith.constant 0 : i32
    %c0_i32_0 = arith.constant 0 : i32
    return %arg0, %c0_i32 : i32, i32
  }
  func.func @transform_1(%arg0: i32) -> (i32, i32, i32) {
    %c0_i32 = arith.constant 0 : i32
    %c0_i32_0 = arith.constant 0 : i32
    %c0_i32_1 = arith.constant 0 : i32
    return %c0_i32, %arg0, %c0_i32_0 : i32, i32, i32
  }
  func.func @transform_2(%arg0: i32) -> (i32, i32) {
    %c0_i32 = arith.constant 0 : i32
    %c0_i32_0 = arith.constant 0 : i32
    %c0_i32_1 = arith.constant 0 : i32
    return %c0_i32, %c0_i32_0 : i32, i32
  }
  func.func @transform_3(%arg0: i32) -> (i32, i32) {
    %c0_i32 = arith.constant 0 : i32
    %c0_i32_0 = arith.constant 0 : i32
    %c0_i32_1 = arith.constant 0 : i32
    return %c0_i32, %c0_i32_0 : i32, i32
  }
  func.func @transform_4(%arg0: i32) -> (i32, i32) {
    %c0_i32 = arith.constant 0 : i32
    %c0_i32_0 = arith.constant 0 : i32
    %c0_i32_1 = arith.constant 0 : i32
    return %c0_i32, %c0_i32_0 : i32, i32
  }
  func.func @transform_5(%arg0: i32) -> (i32, i32) {
    %c0_i32 = arith.constant 0 : i32
    %c0_i32_0 = arith.constant 0 : i32
    %c0_i32_1 = arith.constant 0 : i32
    return %c0_i32, %c0_i32_0 : i32, i32
  }
  func.func @transform_6(%arg0: i32) -> (i32, i32) {
    %c0_i32 = arith.constant 0 : i32
    %c0_i32_0 = arith.constant 0 : i32
    %c0_i32_1 = arith.constant 0 : i32
    return %c0_i32, %c0_i32_0 : i32, i32
  }
  func.func @transform_7(%arg0: i32) -> (i32, i32) {
    %c0_i32 = arith.constant 0 : i32
    %c0_i32_0 = arith.constant 0 : i32
    %c0_i32_1 = arith.constant 0 : i32
    return %c0_i32, %c0_i32_0 : i32, i32
  }
  func.func @transform_8(%arg0: i32) -> (i32, i32) {
    %c0_i32 = arith.constant 0 : i32
    %c0_i32_0 = arith.constant 0 : i32
    %c0_i32_1 = arith.constant 0 : i32
    return %c0_i32, %c0_i32_0 : i32, i32
  }
  func.func @transform_9(%arg0: i32) -> (i32, i32) {
    %c0_i32 = arith.constant 0 : i32
    %c0_i32_0 = arith.constant 0 : i32
    %c0_i32_1 = arith.constant 0 : i32
    return %c0_i32, %c0_i32_0 : i32, i32
  }
  func.func @transform_10(%arg0: i32) -> (i32, i32) {
    %c0_i32 = arith.constant 0 : i32
    %c0_i32_0 = arith.constant 0 : i32
    %c0_i32_1 = arith.constant 0 : i32
    return %c0_i32, %c0_i32_0 : i32, i32
  }
  func.func @transform_11(%arg0: i32) -> (i32, i32) {
    %c0_i32 = arith.constant 0 : i32
    %c0_i32_0 = arith.constant 0 : i32
    %c0_i32_1 = arith.constant 0 : i32
    return %c0_i32, %c0_i32_0 : i32, i32
  }
  func.func @transform_12(%arg0: i32) -> (i32, i32) {
    %c0_i32 = arith.constant 0 : i32
    %c0_i32_0 = arith.constant 0 : i32
    return %arg0, %c0_i32 : i32, i32
  }
}

</mosaic_0001>

<bundles_post_ra>
// kernel: lstm_model_forward.1
= control target key start
LH: loop header
LB: loop body
LE: loop exit
PB: predicated region body
PF: predicated region fallthrough
CT: control target
= control target key end

     0   :  { %17 = vsyncpa [#allocation5], 0  ;;  %s8544_s0 = inlined_call_operand.vmem [shape: s32[8,128], index: 0, kind: input, shape index: {}]   ;;  %s8545_s1 = inlined_call_operand.vmem [shape: f32[8,8,384], index: 1, kind: input, shape index: {}]   ;;  %s8546_s2 = inlined_call_operand.hbm [shape: f32[384,512], index: 2, kind: input, shape index: {}]   ;;  %s8547_s3 = inlined_call_operand.vmem [shape: f32[128,512], index: 3, kind: input, shape index: {}]   ;;  %s8548_s4 = inlined_call_operand.vmem [shape: f32[1,512], index: 4, kind: input, shape index: {}]   ;;  %s8549_s5 = inlined_call_operand.vmem [shape: f32[128,512], index: 5, kind: input, shape index: {}]   ;;  %s8550_s6 = inlined_call_operand.hbm [shape: f32[128,512], index: 6, kind: input, shape index: {}]   ;;  %s8551_s7 = inlined_call_operand.vmem [shape: f32[1,512], index: 7, kind: input, shape index: {}]   ;;  %s8552_s8 = inlined_call_operand.vmem [shape: f32[128,128], index: 8, kind: input, shape index: {}]   ;;  %s8553_s9 = inlined_call_operand.vmem [shape: f32[1,128], index: 9, kind: input, shape index: {}]   ;;  %s8554_s10 = inlined_call_operand.vmem [shape: f32[128,128], index: 10, kind: input, shape index: {}]   ;;  %s8555_s11 = inlined_call_operand.vmem [shape: f32[1,128], index: 11, kind: input, shape index: {}]   ;;  %s8556_s12 = inlined_call_operand.vmem [shape: f32[8,128], index: 12, kind: output, shape index: {}]  }
   0x1   :  { %18 = vsyncpa [#allocation7], 0  ;;  %s6384_s21 = smov [#allocation4]   ;;  %s6336_s25 = scalar_lea.hbm %s8546_s2, 24576 }
   0x2   :  { %s28_s22 = sshll.u32 %s6384_s21, 4  ;;  %p6337_p0 = scmp.ne.s32.totalorder %s8546_s2, %s6336_s25  ;;  %s29_s22 = int_to_ptr.vmem [resolvable:$true] %s28_s22 }
   0x3   :  { %p6340_p1 = scmp.lt.u32.totalorder %s6336_s25, %s8546_s2 }
   0x5   :  { %p6342_p2 = pnand %p6340_p1, %p6337_p0 }
   0x7   :  { %6345 = shalt.err (!%p6342_p2)
}
   0x8   :  { %s6346_s30 = scalar_lea.vmem %s29_s22, 24576  ;;  %p6351_p4 = scmp.lt.s32.totalorder %s29_s22, %s29_s22 }
   0x9   :  { %p6347_p3 = scmp.ne.s32.totalorder %s29_s22, %s6346_s30  ;;  %p6352_p5 = scmp.lt.s32.totalorder %s6346_s30, %s6346_s30 }
   0xb   :  { %p6353_p6 = por %p6352_p5, %p6351_p4 }
   0xd   :  { %p6354_p7 = pnand %p6353_p6, %p6347_p3 }
   0xf   :  { %6357 = shalt.err (!%p6354_p7)
}
  0x10   :  { %s6385_s13 = smov 512   ;;  %s6386_s14 = smov 32  }
  0x11   :  { %34 = dma.hbm_to_vmem [thread:$0]  %s8546_s2, 24576, %s29_s22, [#allocation5], %s6385_s13, %s6385_s13, %s6386_s14  }
  0x12   :  { %s6387_s17 = smov [#allocation6]   ;;  %s6358_s21 = scalar_lea.hbm %s8550_s6, 8192 }
  0x13   :  { %s46_s18 = sshll.u32 %s6387_s17, 4  ;;  %p6359_p8 = scmp.ne.s32.totalorder %s8550_s6, %s6358_s21  ;;  %s47_s18 = int_to_ptr.vmem [resolvable:$true] %s46_s18 }
  0x14   :  { %p6362_p9 = scmp.lt.u32.totalorder %s6358_s21, %s8550_s6 }
  0x16   :  { %p6364_p10 = pnand %p6362_p9, %p6359_p8 }
  0x18   :  { %6367 = shalt.err (!%p6364_p10)
}
  0x19   :  { %s6368_s27 = scalar_lea.vmem %s47_s18, 8192  ;;  %p6373_p12 = scmp.lt.s32.totalorder %s47_s18, %s47_s18 }
  0x1a   :  { %p6369_p11 = scmp.ne.s32.totalorder %s47_s18, %s6368_s27  ;;  %p6374_p13 = scmp.lt.s32.totalorder %s6368_s27, %s6368_s27 }
  0x1c   :  { %p6375_p0 = por %p6374_p13, %p6373_p12 }
  0x1e   :  { %p6376_p1 = pnand %p6375_p0, %p6369_p11 }
  0x20   :  { %6379 = shalt.err (!%p6376_p1)
}
  0x21   :  { %52 = dma.hbm_to_vmem [thread:$0]  %s8550_s6, 8192, %s47_s18, [#allocation7], %s6385_s13, %s6385_s13, %s6386_s14  }
  0x22   :  { %6380 = dma.done.wait [#allocation5], 24576  }
  0x23   :  { %6381 = vsyncadd [#allocation5], 4294942720 }
  0x24   :  { %6382 = dma.done.wait [#allocation7], 8192  }
  0x25   :  { %6383 = vsyncadd [#allocation7], 4294959104  ;;  %v168_v0 = vld [vmem:[#allocation4 + $0x8] sm:$0xff]  ;;  %v170_v2 = vld [vmem:[#allocation4 + $0x18] sm:$0xff]  ;;  %vm1116_vm4 = vcmask 523264   ;;  %vm1119_vm5 = vcmask 1048064  }
  0x26   :  { %v172_v1 = vld [vmem:[#allocation4 + $0x28] sm:$0xff]  ;;  %v174_v4 = vld [vmem:[#allocation4 + $0x38] sm:$0xff]  ;;  %v167_v5 = vld [vmem:[#allocation4] sm:$0xff]  ;;  %vm6398_vm14 = vmmov 0  }
  0x27   :  { %v4668_v3 = vpack.c.bf16 %v172_v1, %v168_v0  ;;  %v171_v6 = vld [vmem:[#allocation4 + $0x20] sm:$0xff]  ;;  %v4764_v7 = vpack.c.bf16 %v174_v4, %v170_v2  ;;  %v169_v9 = vld [vmem:[#allocation4 + $0x10] sm:$0xff]  ;;  %v176_v11 = vld [vmem:[#allocation4 + $0x48] sm:$0xff] }
  0x28   :  { %v4670_v8 = vpack.c.bf16 %v171_v6, %v167_v5  ;;  %v173_v10 = vld [vmem:[#allocation4 + $0x30] sm:$0xff]  ;;  %v180_v13 = vld [vmem:[#allocation4 + $0x68] sm:$0xff]  ;;  %v178_v14 = vld [vmem:[#allocation4 + $0x58] sm:$0xff] }
  0x29   :  { %4669 = vmatprep.subr.bf16.mxu0 %v4668_v3  ;;  %v4766_v12 = vpack.c.bf16 %v173_v10, %v169_v9  ;;  %v182_v15 = vld [vmem:[#allocation4 + $0x78] sm:$0xff]  ;;  %4765 = vmatprep.subr.bf16.mxu1 %v4764_v7  ;;  %v4672_v16 = vpack.c.bf16 %v180_v13, %v176_v11  ;;  %v175_v18 = vld [vmem:[#allocation4 + $0x40] sm:$0xff]  ;;  %v177_v20 = vld [vmem:[#allocation4 + $0x50] sm:$0xff] }
  0x2a   :  { %4671 = vmatpush1.bf16.msra.mxu0 %v4670_v8  ;;  %v4768_v17 = vpack.c.bf16 %v182_v15, %v178_v14  ;;  %v179_v19 = vld [vmem:[#allocation4 + $0x60] sm:$0xff]  ;;  %v181_v22 = vld [vmem:[#allocation4 + $0x70] sm:$0xff]  ;;  %v184_v23 = vld [vmem:[#allocation4 + $0x88] sm:$0xff] }
  0x2b   :  { %4767 = vmatpush1.bf16.msra.mxu1 %v4766_v12  ;;  %v4674_v21 = vpack.c.bf16 %v179_v19, %v175_v18  ;;  %v188_v24 = vld [vmem:[#allocation4 + $0xa8] sm:$0xff]  ;;  %4673 = vmatprep.subr.bf16.mxu0 %v4672_v16  ;;  %v4770_v25 = vpack.c.bf16 %v181_v22, %v177_v20  ;;  %v186_v27 = vld [vmem:[#allocation4 + $0x98] sm:$0xff]  ;;  %v183_v29 = vld [vmem:[#allocation4 + $0x80] sm:$0xff] }
  0x2c   :  { %4769 = vmatprep.subr.bf16.mxu1 %v4768_v17  ;;  %v4676_v26 = vpack.c.bf16 %v188_v24, %v184_v23  ;;  %v190_v28 = vld [vmem:[#allocation4 + $0xb8] sm:$0xff]  ;;  %v187_v31 = vld [vmem:[#allocation4 + $0xa0] sm:$0xff]  ;;  %v185_v32 = vld [vmem:[#allocation4 + $0x90] sm:$0xff] }
  0x2d   :  { %v4772_v30 = vpack.c.bf16 %v190_v28, %v186_v27  ;;  %v189_v33 = vld [vmem:[#allocation4 + $0xb0] sm:$0xff]  ;;  %v4678_v34 = vpack.c.bf16 %v187_v31, %v183_v29  ;;  %v192_v35 = vld [vmem:[#allocation4 + $0xc8] sm:$0xff]  ;;  %v194_v37 = vld [vmem:[#allocation4 + $0xd8] sm:$0xff] }
  0x2e   :  { %4675 = vmatpush1.bf16.msra.mxu0 %v4674_v21  ;;  %v196_v36 = vld [vmem:[#allocation4 + $0xe8] sm:$0xff]  ;;  %v4774_v38 = vpack.c.bf16 %v189_v33, %v185_v32  ;;  %v198_v40 = vld [vmem:[#allocation4 + $0xf8] sm:$0xff]  ;;  %v191_v41 = vld [vmem:[#allocation4 + $0xc0] sm:$0xff] }
  0x2f   :  { %4771 = vmatpush1.bf16.msra.mxu1 %v4770_v25  ;;  %4677 = vmatprep.subr.bf16.mxu0 %v4676_v26  ;;  %v4680_v39 = vpack.c.bf16 %v196_v36, %v192_v35  ;;  %v195_v42 = vld [vmem:[#allocation4 + $0xe0] sm:$0xff]  ;;  %v4776_v43 = vpack.c.bf16 %v198_v40, %v194_v37  ;;  %v193_v44 = vld [vmem:[#allocation4 + $0xd0] sm:$0xff]  ;;  %v200_v46 = vld [vmem:[#allocation4 + $0x108] sm:$0xff] }
  0x30   :  { %4773 = vmatprep.subr.bf16.mxu1 %v4772_v30  ;;  %v197_v45 = vld [vmem:[#allocation4 + $0xf0] sm:$0xff]  ;;  %v204_v47 = vld [vmem:[#allocation4 + $0x128] sm:$0xff]  ;;  %v202_v48 = vld [vmem:[#allocation4 + $0x118] sm:$0xff]  ;;  %v4682_v50 = vpack.c.bf16 %v195_v42, %v191_v41 }
  0x31   :  { %v206_v49 = vld [vmem:[#allocation4 + $0x138] sm:$0xff]  ;;  %v4778_v51 = vpack.c.bf16 %v197_v45, %v193_v44  ;;  %v4684_v52 = vpack.c.bf16 %v204_v47, %v200_v46  ;;  %v199_v53 = vld [vmem:[#allocation4 + $0x100] sm:$0xff]  ;;  %v201_v55 = vld [vmem:[#allocation4 + $0x110] sm:$0xff] }
  0x32   :  { %4679 = vmatpush1.bf16.msra.mxu0 %v4678_v34  ;;  %v203_v54 = vld [vmem:[#allocation4 + $0x120] sm:$0xff]  ;;  %v4780_v56 = vpack.c.bf16 %v206_v49, %v202_v48  ;;  %v205_v57 = vld [vmem:[#allocation4 + $0x130] sm:$0xff]  ;;  %v208_v58 = vld [vmem:[#allocation4 + $0x148] sm:$0xff] }
  0x33   :  { %4775 = vmatpush1.bf16.msra.mxu1 %v4774_v38  ;;  %4681 = vmatprep.subr.bf16.mxu0 %v4680_v39  ;;  %v212_v59 = vld [vmem:[#allocation4 + $0x168] sm:$0xff]  ;;  %v210_v60 = vld [vmem:[#allocation4 + $0x158] sm:$0xff]  ;;  %v4686_v62 = vpack.c.bf16 %v203_v54, %v199_v53  ;;  %v4782_v63 = vpack.c.bf16 %v205_v57, %v201_v55  ;;  %v207_v1 = vld [vmem:[#allocation4 + $0x140] sm:$0xff] }
  0x34   :  { %4777 = vmatprep.subr.bf16.mxu1 %v4776_v43  ;;  %v214_v61 = vld [vmem:[#allocation4 + $0x178] sm:$0xff]  ;;  %v4688_v0 = vpack.c.bf16 %v212_v59, %v208_v58  ;;  %v211_v2 = vld [vmem:[#allocation4 + $0x160] sm:$0xff]  ;;  %v209_v3 = vld [vmem:[#allocation4 + $0x150] sm:$0xff] }
  0x35   :  { %v4784_v4 = vpack.c.bf16 %v214_v61, %v210_v60  ;;  %v213_v5 = vld [vmem:[#allocation4 + $0x170] sm:$0xff]  ;;  %v216_v6 = vld [vmem:[#allocation4 + $0x188] sm:$0xff]  ;;  %v218_v8 = vld [vmem:[#allocation4 + $0x198] sm:$0xff]  ;;  %v4690_v10 = vpack.c.bf16 %v211_v2, %v207_v1 }
  0x36   :  { %4683 = vmatpush1.bf16.msra.mxu0 %v4682_v50  ;;  %v220_v7 = vld [vmem:[#allocation4 + $0x1a8] sm:$0xff]  ;;  %v222_v9 = vld [vmem:[#allocation4 + $0x1b8] sm:$0xff]  ;;  %v4786_v11 = vpack.c.bf16 %v213_v5, %v209_v3  ;;  %v215_v13 = vld [vmem:[#allocation4 + $0x180] sm:$0xff] }
  0x37   :  { %4779 = vmatpush1.bf16.msra.mxu1 %v4778_v51  ;;  %4685 = vmatprep.subr.bf16.mxu0 %v4684_v52  ;;  %v4692_v12 = vpack.c.bf16 %v220_v7, %v216_v6  ;;  %v219_v14 = vld [vmem:[#allocation4 + $0x1a0] sm:$0xff]  ;;  %v217_v15 = vld [vmem:[#allocation4 + $0x190] sm:$0xff]  ;;  %v4788_v16 = vpack.c.bf16 %v222_v9, %v218_v8  ;;  %v224_v18 = vld [vmem:[#allocation4 + $0x1c8] sm:$0xff] }
  0x38   :  { %4781 = vmatprep.subr.bf16.mxu1 %v4780_v56  ;;  %v221_v17 = vld [vmem:[#allocation4 + $0x1b0] sm:$0xff]  ;;  %v228_v19 = vld [vmem:[#allocation4 + $0x1e8] sm:$0xff]  ;;  %v226_v20 = vld [vmem:[#allocation4 + $0x1d8] sm:$0xff]  ;;  %v4694_v22 = vpack.c.bf16 %v219_v14, %v215_v13 }
  0x39   :  { %v230_v21 = vld [vmem:[#allocation4 + $0x1f8] sm:$0xff]  ;;  %v4790_v23 = vpack.c.bf16 %v221_v17, %v217_v15  ;;  %v4696_v24 = vpack.c.bf16 %v228_v19, %v224_v18  ;;  %v223_v25 = vld [vmem:[#allocation4 + $0x1c0] sm:$0xff]  ;;  %v225_v27 = vld [vmem:[#allocation4 + $0x1d0] sm:$0xff] }
  0x3a   :  { %4687 = vmatpush1.bf16.msra.mxu0 %v4686_v62  ;;  %v227_v26 = vld [vmem:[#allocation4 + $0x1e0] sm:$0xff]  ;;  %v4792_v28 = vpack.c.bf16 %v230_v21, %v226_v20  ;;  %v229_v29 = vld [vmem:[#allocation4 + $0x1f0] sm:$0xff]  ;;  %v232_v30 = vld [vmem:[#allocation4 + $0x208] sm:$0xff] }
  0x3b   :  { %4783 = vmatpush1.bf16.msra.mxu1 %v4782_v63  ;;  %4689 = vmatprep.subr.bf16.mxu0 %v4688_v0  ;;  %v236_v31 = vld [vmem:[#allocation4 + $0x228] sm:$0xff]  ;;  %v234_v32 = vld [vmem:[#allocation4 + $0x218] sm:$0xff]  ;;  %v4698_v34 = vpack.c.bf16 %v227_v26, %v223_v25  ;;  %v4794_v35 = vpack.c.bf16 %v229_v29, %v225_v27  ;;  %v231_v37 = vld [vmem:[#allocation4 + $0x200] sm:$0xff] }
  0x3c   :  { %4785 = vmatprep.subr.bf16.mxu1 %v4784_v4  ;;  %v238_v33 = vld [vmem:[#allocation4 + $0x238] sm:$0xff]  ;;  %v4700_v36 = vpack.c.bf16 %v236_v31, %v232_v30  ;;  %v235_v38 = vld [vmem:[#allocation4 + $0x220] sm:$0xff]  ;;  %v233_v39 = vld [vmem:[#allocation4 + $0x210] sm:$0xff] }
  0x3d   :  { %v4796_v40 = vpack.c.bf16 %v238_v33, %v234_v32  ;;  %v237_v41 = vld [vmem:[#allocation4 + $0x230] sm:$0xff]  ;;  %v240_v42 = vld [vmem:[#allocation4 + $0x248] sm:$0xff]  ;;  %v242_v44 = vld [vmem:[#allocation4 + $0x258] sm:$0xff]  ;;  %v4702_v46 = vpack.c.bf16 %v235_v38, %v231_v37 }
  0x3e   :  { %4691 = vmatpush1.bf16.msra.mxu0 %v4690_v10  ;;  %v244_v43 = vld [vmem:[#allocation4 + $0x268] sm:$0xff]  ;;  %v246_v45 = vld [vmem:[#allocation4 + $0x278] sm:$0xff]  ;;  %v4798_v47 = vpack.c.bf16 %v237_v41, %v233_v39  ;;  %v239_v49 = vld [vmem:[#allocation4 + $0x240] sm:$0xff] }
  0x3f   :  { %4787 = vmatpush1.bf16.msra.mxu1 %v4786_v11  ;;  %4693 = vmatprep.subr.bf16.mxu0 %v4692_v12  ;;  %v4704_v48 = vpack.c.bf16 %v244_v43, %v240_v42  ;;  %v243_v50 = vld [vmem:[#allocation4 + $0x260] sm:$0xff]  ;;  %v241_v51 = vld [vmem:[#allocation4 + $0x250] sm:$0xff]  ;;  %v4800_v52 = vpack.c.bf16 %v246_v45, %v242_v44  ;;  %v248_v54 = vld [vmem:[#allocation4 + $0x288] sm:$0xff] }
  0x40   :  { %4789 = vmatprep.subr.bf16.mxu1 %v4788_v16  ;;  %v245_v53 = vld [vmem:[#allocation4 + $0x270] sm:$0xff]  ;;  %v252_v55 = vld [vmem:[#allocation4 + $0x2a8] sm:$0xff]  ;;  %v250_v56 = vld [vmem:[#allocation4 + $0x298] sm:$0xff]  ;;  %v4706_v58 = vpack.c.bf16 %v243_v50, %v239_v49 }
  0x41   :  { %v254_v57 = vld [vmem:[#allocation4 + $0x2b8] sm:$0xff]  ;;  %v4802_v59 = vpack.c.bf16 %v245_v53, %v241_v51  ;;  %v4708_v60 = vpack.c.bf16 %v252_v55, %v248_v54  ;;  %v247_v61 = vld [vmem:[#allocation4 + $0x280] sm:$0xff]  ;;  %v249_v63 = vld [vmem:[#allocation4 + $0x290] sm:$0xff] }
  0x42   :  { %4695 = vmatpush1.bf16.msra.mxu0 %v4694_v22  ;;  %v251_v62 = vld [vmem:[#allocation4 + $0x2a0] sm:$0xff]  ;;  %v4804_v0 = vpack.c.bf16 %v254_v57, %v250_v56  ;;  %v253_v1 = vld [vmem:[#allocation4 + $0x2b0] sm:$0xff]  ;;  %v256_v2 = vld [vmem:[#allocation4 + $0x2c8] sm:$0xff] }
  0x43   :  { %4791 = vmatpush1.bf16.msra.mxu1 %v4790_v23  ;;  %4697 = vmatprep.subr.bf16.mxu0 %v4696_v24  ;;  %v260_v3 = vld [vmem:[#allocation4 + $0x2e8] sm:$0xff]  ;;  %v258_v4 = vld [vmem:[#allocation4 + $0x2d8] sm:$0xff]  ;;  %v4710_v6 = vpack.c.bf16 %v251_v62, %v247_v61  ;;  %v255_v7 = vld [vmem:[#allocation4 + $0x2c0] sm:$0xff]  ;;  %v4806_v8 = vpack.c.bf16 %v253_v1, %v249_v63 }
  0x44   :  { %4793 = vmatprep.subr.bf16.mxu1 %v4792_v28  ;;  %v262_v5 = vld [vmem:[#allocation4 + $0x2f8] sm:$0xff]  ;;  %v4712_v9 = vpack.c.bf16 %v260_v3, %v256_v2  ;;  %v259_v10 = vld [vmem:[#allocation4 + $0x2e0] sm:$0xff]  ;;  %v257_v11 = vld [vmem:[#allocation4 + $0x2d0] sm:$0xff] }
  0x45   :  { %v261_v12 = vld [vmem:[#allocation4 + $0x2f0] sm:$0xff]  ;;  %v4808_v13 = vpack.c.bf16 %v262_v5, %v258_v4  ;;  %v264_v14 = vld [vmem:[#allocation4 + $0x308] sm:$0xff]  ;;  %v266_v17 = vld [vmem:[#allocation4 + $0x318] sm:$0xff]  ;;  %v4714_v19 = vpack.c.bf16 %v259_v10, %v255_v7 }
  0x46   :  { %4699 = vmatpush1.bf16.msra.mxu0 %v4698_v34  ;;  %v268_v15 = vld [vmem:[#allocation4 + $0x328] sm:$0xff]  ;;  %v270_v18 = vld [vmem:[#allocation4 + $0x338] sm:$0xff]  ;;  %v4810_v20 = vpack.c.bf16 %v261_v12, %v257_v11  ;;  %v263_v22 = vld [vmem:[#allocation4 + $0x300] sm:$0xff] }
  0x47   :  { %4795 = vmatpush1.bf16.msra.mxu1 %v4794_v35  ;;  %4701 = vmatprep.subr.bf16.mxu0 %v4700_v36  ;;  %v144_v16 = vld [vmem:[%s8545_s1 + $0x8] sm:$0xff]  ;;  %v4716_v21 = vpack.c.bf16 %v268_v15, %v264_v14  ;;  %v267_v23 = vld [vmem:[#allocation4 + $0x320] sm:$0xff]  ;;  %v265_v24 = vld [vmem:[#allocation4 + $0x310] sm:$0xff]  ;;  %v4812_v25 = vpack.c.bf16 %v270_v18, %v266_v17 }
  0x48   :  { %4797 = vmatprep.subr.bf16.mxu1 %v4796_v40  ;;  %445 = vmatprep.mubr.f32.mxu0 %v144_v16  ;;  %v269_v26 = vld [vmem:[#allocation4 + $0x330] sm:$0xff]  ;;  %v272_v27 = vld [vmem:[#allocation4 + $0x348] sm:$0xff]  ;;  %v274_v29 = vld [vmem:[#allocation4 + $0x358] sm:$0xff]  ;;  %v4718_v31 = vpack.c.bf16 %v267_v23, %v263_v22 }
  0x49   :  { %671 = vmatprep.mubr.f32.mxu1 %v144_v16  ;;  %v276_v28 = vld [vmem:[#allocation4 + $0x368] sm:$0xff]  ;;  %v278_v30 = vld [vmem:[#allocation4 + $0x378] sm:$0xff]  ;;  %v4814_v32 = vpack.c.bf16 %v269_v26, %v265_v24  ;;  %v271_v34 = vld [vmem:[#allocation4 + $0x340] sm:$0xff] }
  0x4a   :  { %4703 = vmatpush1.bf16.msra.mxu0 %v4702_v46  ;;  %v4720_v33 = vpack.c.bf16 %v276_v28, %v272_v27  ;;  %v275_v35 = vld [vmem:[#allocation4 + $0x360] sm:$0xff]  ;;  %v273_v36 = vld [vmem:[#allocation4 + $0x350] sm:$0xff]  ;;  %v4816_v37 = vpack.c.bf16 %v278_v30, %v274_v29  ;;  %v280_v39 = vld [vmem:[#allocation4 + $0x388] sm:$0xff] }
  0x4b   :  { %4799 = vmatpush1.bf16.msra.mxu1 %v4798_v47  ;;  %4705 = vmatprep.subr.bf16.mxu0 %v4704_v48  ;;  %v277_v38 = vld [vmem:[#allocation4 + $0x370] sm:$0xff]  ;;  %v284_v40 = vld [vmem:[#allocation4 + $0x3a8] sm:$0xff]  ;;  %v282_v41 = vld [vmem:[#allocation4 + $0x398] sm:$0xff]  ;;  %v4722_v43 = vpack.c.bf16 %v275_v35, %v271_v34 }
  0x4c   :  { %4801 = vmatprep.subr.bf16.mxu1 %v4800_v52  ;;  %v286_v42 = vld [vmem:[#allocation4 + $0x3b8] sm:$0xff]  ;;  %v4818_v44 = vpack.c.bf16 %v277_v38, %v273_v36  ;;  %v4724_v45 = vpack.c.bf16 %v284_v40, %v280_v39  ;;  %v279_v46 = vld [vmem:[#allocation4 + $0x380] sm:$0xff]  ;;  %v281_v48 = vld [vmem:[#allocation4 + $0x390] sm:$0xff] }
  0x4d   :  { %v283_v47 = vld [vmem:[#allocation4 + $0x3a0] sm:$0xff]  ;;  %v4820_v49 = vpack.c.bf16 %v286_v42, %v282_v41  ;;  %v285_v50 = vld [vmem:[#allocation4 + $0x3b0] sm:$0xff]  ;;  %v288_v51 = vld [vmem:[#allocation4 + $0x3c8] sm:$0xff] }
  0x4e   :  { %4707 = vmatpush1.bf16.msra.mxu0 %v4706_v58  ;;  %v292_v52 = vld [vmem:[#allocation4 + $0x3e8] sm:$0xff]  ;;  %v290_v53 = vld [vmem:[#allocation4 + $0x3d8] sm:$0xff]  ;;  %v4726_v55 = vpack.c.bf16 %v283_v47, %v279_v46  ;;  %v4822_v56 = vpack.c.bf16 %v285_v50, %v281_v48  ;;  %v287_v58 = vld [vmem:[#allocation4 + $0x3c0] sm:$0xff] }
  0x4f   :  { %4803 = vmatpush1.bf16.msra.mxu1 %v4802_v59  ;;  %4709 = vmatprep.subr.bf16.mxu0 %v4708_v60  ;;  %v294_v54 = vld [vmem:[#allocation4 + $0x3f8] sm:$0xff]  ;;  %v4728_v57 = vpack.c.bf16 %v292_v52, %v288_v51  ;;  %v291_v59 = vld [vmem:[#allocation4 + $0x3e0] sm:$0xff]  ;;  %v289_v60 = vld [vmem:[#allocation4 + $0x3d0] sm:$0xff] }
  0x50   :  { %4805 = vmatprep.subr.bf16.mxu1 %v4804_v0  ;;  %v4824_v61 = vpack.c.bf16 %v294_v54, %v290_v53  ;;  %v293_v62 = vld [vmem:[#allocation4 + $0x3f0] sm:$0xff]  ;;  %v296_v63 = vld [vmem:[#allocation4 + $0x408] sm:$0xff]  ;;  %v298_v1 = vld [vmem:[#allocation4 + $0x418] sm:$0xff]  ;;  %v4730_v3 = vpack.c.bf16 %v291_v59, %v287_v58 }
  0x51   :  { %v300_v0 = vld [vmem:[#allocation4 + $0x428] sm:$0xff]  ;;  %v302_v2 = vld [vmem:[#allocation4 + $0x438] sm:$0xff]  ;;  %v4826_v4 = vpack.c.bf16 %v293_v62, %v289_v60  ;;  %v299_v7 = vld [vmem:[#allocation4 + $0x420] sm:$0xff] }
  0x52   :  { %4711 = vmatpush1.bf16.msra.mxu0 %v4710_v6  ;;  %v4732_v5 = vpack.c.bf16 %v300_v0, %v296_v63  ;;  %v295_v6 = vld [vmem:[#allocation4 + $0x400] sm:$0xff]  ;;  %v301_v10 = vld [vmem:[#allocation4 + $0x430] sm:$0xff]  ;;  %v304_v11 = vld [vmem:[#allocation4 + $0x448] sm:$0xff] }
  0x53   :  { %4807 = vmatpush1.bf16.msra.mxu1 %v4806_v8  ;;  %4713 = vmatprep.subr.bf16.mxu0 %v4712_v9  ;;  %v4828_v8 = vpack.c.bf16 %v302_v2, %v298_v1  ;;  %v297_v9 = vld [vmem:[#allocation4 + $0x410] sm:$0xff]  ;;  %v308_v12 = vld [vmem:[#allocation4 + $0x468] sm:$0xff]  ;;  %v4734_v14 = vpack.c.bf16 %v299_v7, %v295_v6  ;;  %v306_v15 = vld [vmem:[#allocation4 + $0x458] sm:$0xff] }
  0x54   :  { %4809 = vmatprep.subr.bf16.mxu1 %v4808_v13  ;;  %v143_v13 = vld [vmem:[%s8545_s1] sm:$0xff]  ;;  %v310_v16 = vld [vmem:[#allocation4 + $0x478] sm:$0xff]  ;;  %v4830_v17 = vpack.c.bf16 %v301_v10, %v297_v9  ;;  %v305_v22 = vld [vmem:[#allocation4 + $0x450] sm:$0xff] }
  0x55   :  { %v303_v18 = vld [vmem:[#allocation4 + $0x440] sm:$0xff]  ;;  %v309_v23 = vld [vmem:[#allocation4 + $0x470] sm:$0xff]  ;;  %v4832_v24 = vpack.c.bf16 %v310_v16, %v306_v15  ;;  %v316_v26 = vld [vmem:[#allocation4 + $0x4a8] sm:$0xff] }
  0x56   :  { %4715 = vmatpush1.bf16.msra.mxu0 %v4714_v19  ;;  %v307_v19 = vld [vmem:[#allocation4 + $0x460] sm:$0xff]  ;;  %v146_v27 = vld [vmem:[%s8545_s1 + $0x18] sm:$0xff]  ;;  %v313_v36 = vld [vmem:[#allocation4 + $0x490] sm:$0xff] }
  0x57   :  { %4811 = vmatpush1.bf16.msra.mxu1 %v4810_v20  ;;  %4717 = vmatprep.subr.bf16.mxu0 %v4716_v21  ;;  %v147_v20 = vld [vmem:[%s8545_s1 + $0x20] sm:$0xff]  ;;  %v4736_v21 = vpack.c.bf16 %v308_v12, %v304_v11  ;;  %v4738_v28 = vpack.c.bf16 %v307_v19, %v303_v18  ;;  %v314_v29 = vld [vmem:[#allocation4 + $0x498] sm:$0xff]  ;;  %v320_v39 = vld [vmem:[#allocation4 + $0x4c8] sm:$0xff] }
  0x58   :  { %4813 = vmatprep.subr.bf16.mxu1 %v4812_v25  ;;  %v312_v25 = vld [vmem:[#allocation4 + $0x488] sm:$0xff]  ;;  %v318_v30 = vld [vmem:[#allocation4 + $0x4b8] sm:$0xff]  ;;  %v149_v41 = vld [vmem:[%s8545_s1 + $0x30] sm:$0xff] }
  0x59   :  { %v150_v34 = vld [vmem:[%s8545_s1 + $0x38] sm:$0xff]  ;;  %v4740_v35 = vpack.c.bf16 %v316_v26, %v312_v25  ;;  %v4836_v38 = vpack.c.bf16 %v318_v30, %v314_v29  ;;  %v324_v40 = vld [vmem:[#allocation4 + $0x4e8] sm:$0xff]  ;;  %v319_v46 = vld [vmem:[#allocation4 + $0x4c0] sm:$0xff] }
  0x5a   :  { %4719 = vmatpush1.bf16.msra.mxu0 %v4718_v31  ;;  %v4834_v31 = vpack.c.bf16 %v309_v23, %v305_v22  ;;  %v323_v47 = vld [vmem:[#allocation4 + $0x4e0] sm:$0xff]  ;;  %v153_v48 = vld [vmem:[%s8545_s1 + $0x50] sm:$0xff]  ;;  %v328_v53 = vld [vmem:[#allocation4 + $0x508] sm:$0xff] }
  0x5b   :  { %4815 = vmatpush1.bf16.msra.mxu1 %v4814_v32  ;;  %4721 = vmatprep.subr.bf16.mxu0 %v4720_v33  ;;  %v311_v32 = vld [vmem:[#allocation4 + $0x480] sm:$0xff]  ;;  %v321_v50 = vld [vmem:[#allocation4 + $0x4d0] sm:$0xff]  ;;  %v332_v54 = vld [vmem:[#allocation4 + $0x528] sm:$0xff] }
  0x5c   :  { %4817 = vmatprep.subr.bf16.mxu1 %v4816_v37  ;;  %v315_v33 = vld [vmem:[#allocation4 + $0x4a0] sm:$0xff]  ;;  %v317_v37 = vld [vmem:[#allocation4 + $0x4b0] sm:$0xff]  ;;  %v334_v58 = vld [vmem:[#allocation4 + $0x538] sm:$0xff]  ;;  %v4748_v63 = vpack.c.bf16 %v332_v54, %v328_v53 }
  0x5d   :  { %v4742_v42 = vpack.c.bf16 %v315_v33, %v311_v32  ;;  %v325_v51 = vld [vmem:[#allocation4 + $0x4f0] sm:$0xff]  ;;  %v327_v60 = vld [vmem:[#allocation4 + $0x500] sm:$0xff]  ;;  %v156_v62 = vld [vmem:[%s8545_s1 + $0x68] sm:$0xff] }
  0x5e   :  { %4723 = vmatpush1.bf16.msra.mxu0 %v4722_v43  ;;  %v322_v43 = vld [vmem:[#allocation4 + $0x4d8] sm:$0xff]  ;;  %v4842_v59 = vpack.c.bf16 %v325_v51, %v321_v50  ;;  %v329_v0 = vld [vmem:[#allocation4 + $0x510] sm:$0xff]  ;;  %v335_v10 = vld [vmem:[#allocation4 + $0x540] sm:$0xff] }
  0x5f   :  { %4819 = vmatpush1.bf16.msra.mxu1 %v4818_v44  ;;  %4725 = vmatprep.subr.bf16.mxu0 %v4724_v45  ;;  %v326_v44 = vld [vmem:[#allocation4 + $0x4f8] sm:$0xff]  ;;  %v4838_v45 = vpack.c.bf16 %v317_v37, %v313_v36  ;;  %v333_v1 = vld [vmem:[#allocation4 + $0x530] sm:$0xff]  ;;  %v339_v11 = vld [vmem:[#allocation4 + $0x560] sm:$0xff] }
  0x60   :  { %4821 = vmatprep.subr.bf16.mxu1 %v4820_v49  ;;  %v4744_v49 = vpack.c.bf16 %v324_v40, %v320_v39  ;;  %v4840_v52 = vpack.c.bf16 %v326_v44, %v322_v43  ;;  %v338_v7 = vld [vmem:[#allocation4 + $0x558] sm:$0xff]  ;;  %v4846_v9 = vpack.c.bf16 %v333_v1, %v329_v0  ;;  %v159_v12 = vld [vmem:[%s8545_s1 + $0x80] sm:$0xff]  ;;  %v341_v15 = vld [vmem:[#allocation4 + $0x570] sm:$0xff]  ;;  %v8561_v0 = vmov 0.0  }
  0x61   :  { %v348_v18 = vld [vmem:[#allocation4 + $0x5a8] sm:$0xff]  ;;  %v158_v19 = vld [vmem:[%s8545_s1 + $0x78] sm:$0xff]  ;;  %v347_v25 = vld [vmem:[#allocation4 + $0x5a0] sm:$0xff] }
  0x62   :  { %4727 = vmatpush1.bf16.msra.mxu0 %v4726_v55  ;;  %v152_v55 = vld [vmem:[%s8545_s1 + $0x48] sm:$0xff]  ;;  %v350_v22 = vld [vmem:[#allocation4 + $0x5b8] sm:$0xff]  ;;  %v349_v29 = vld [vmem:[#allocation4 + $0x5b0] sm:$0xff] }
  0x63   :  { %4823 = vmatpush1.bf16.msra.mxu1 %v4822_v56  ;;  %4729 = vmatprep.subr.bf16.mxu0 %v4728_v57  ;;  %v4746_v56 = vpack.c.bf16 %v323_v47, %v319_v46  ;;  %v330_v57 = vld [vmem:[#allocation4 + $0x518] sm:$0xff]  ;;  %v356_v32 = vld [vmem:[#allocation4 + $0x5e8] sm:$0xff]  ;;  %v161_v33 = vld [vmem:[%s8545_s1 + $0x90] sm:$0xff] }
  0x64   :  { %4825 = vmatprep.subr.bf16.mxu1 %v4824_v61  ;;  %v331_v61 = vld [vmem:[#allocation4 + $0x520] sm:$0xff]  ;;  %v4844_v2 = vpack.c.bf16 %v334_v58, %v330_v57  ;;  %v162_v26 = vld [vmem:[%s8545_s1 + $0x98] sm:$0xff]  ;;  %v165_v40 = vld [vmem:[%s8545_s1 + $0xb0] sm:$0xff] }
  0x65   :  { %v4750_v6 = vpack.c.bf16 %v331_v61, %v327_v60  ;;  %v358_v36 = vld [vmem:[#allocation4 + $0x5f8] sm:$0xff]  ;;  %v355_v39 = vld [vmem:[#allocation4 + $0x5e0] sm:$0xff]  ;;  %v357_v43 = vld [vmem:[#allocation4 + $0x5f0] sm:$0xff] }
  0x66   :  { %4731 = vmatpush1.bf16.msra.mxu0 %v4730_v3  ;;  %v336_v3 = vld [vmem:[#allocation4 + $0x548] sm:$0xff]  ;;  %v872_v50 = vld [vmem:[%s8547_s3 + $0x38] sm:$0xff]  ;;  %v869_v53 = vld [vmem:[%s8547_s3 + $0x20] sm:$0xff] }
  0x67   :  { %4827 = vmatpush1.bf16.msra.mxu1 %v4826_v4  ;;  %4733 = vmatprep.subr.bf16.mxu0 %v4732_v5  ;;  %v340_v4 = vld [vmem:[#allocation4 + $0x568] sm:$0xff]  ;;  %v155_v5 = vld [vmem:[%s8545_s1 + $0x60] sm:$0xff]  ;;  %v145_v60 = vld [vmem:[%s8545_s1 + $0x10] sm:$0xff] }
  0x68   :  { %4829 = vmatprep.subr.bf16.mxu1 %v4828_v8  ;;  %v342_v8 = vld [vmem:[#allocation4 + $0x578] sm:$0xff]  ;;  %v870_v46 = vld [vmem:[%s8547_s3 + $0x28] sm:$0xff] }
  0x69   :  { %446 = vmatmul.mubr.f32.vlgmr.msra.gmra.mrb[0].mxu0 %v143_v13  ;;  %v4848_v16 = vpack.c.bf16 %v342_v8, %v338_v7  ;;  %v164_v47 = vld [vmem:[%s8545_s1 + $0xa8] sm:$0xff] }
  0x6a   :  { %672 = vmatmul.mubr.f32.vlgmr.msra.gmra.mrb[0].mxu1 %v143_v13  ;;  %4735 = vmatpush1.bf16.msra.mxu0 %v4734_v14  ;;  %v4752_v13 = vpack.c.bf16 %v340_v4, %v336_v3  ;;  %v337_v14 = vld [vmem:[#allocation4 + $0x550] sm:$0xff]  ;;  %v874_v58 = vld [vmem:[%s8547_s3 + $0x48] sm:$0xff]  ;;  %v877_v3 = vld [vmem:[%s8547_s3 + $0x60] sm:$0xff] }
  0x6b   :  { %4831 = vmatpush1.bf16.msra.mxu1 %v4830_v17  ;;  %451 = vmatprep.mubr.f32.mxu0 %v147_v20  ;;  %v344_v17 = vld [vmem:[#allocation4 + $0x588] sm:$0xff]  ;;  %v4850_v23 = vpack.c.bf16 %v341_v15, %v337_v14  ;;  %v881_v15 = vld [vmem:[%s8547_s3 + $0x80] sm:$0xff] }
  0x6c   :  { %677 = vmatprep.mubr.f32.mxu1 %v147_v20  ;;  %4737 = vmatprep.subr.bf16.mxu0 %v4736_v21  ;;  %v4754_v20 = vpack.c.bf16 %v339_v11, %v335_v10  ;;  %v346_v21 = vld [vmem:[#allocation4 + $0x598] sm:$0xff]  ;;  %v882_v8 = vld [vmem:[%s8547_s3 + $0x88] sm:$0xff] }
  0x6d   :  { %452 = vmatmul.mubr.f32.gmra.mrb[2].mxu0 %v146_v27  ;;  %4833 = vmatprep.subr.bf16.mxu1 %v4832_v24  ;;  %v343_v24 = vld [vmem:[#allocation4 + $0x580] sm:$0xff]  ;;  %v4852_v30 = vpack.c.bf16 %v350_v22, %v346_v21  ;;  %v148_v10 = vld [vmem:[%s8545_s1 + $0x28] sm:$0xff] }
  0x6e   :  { %678 = vmatmul.mubr.f32.gmra.mrb[2].mxu1 %v146_v27  ;;  %4739 = vmatpush1.bf16.msra.mxu0 %v4738_v28  ;;  %v4756_v27 = vpack.c.bf16 %v348_v18, %v344_v17  ;;  %v345_v28 = vld [vmem:[#allocation4 + $0x590] sm:$0xff]  ;;  %v890_v21 = vld [vmem:[%s8547_s3 + $0xc8] sm:$0xff] }
  0x6f   :  { %4835 = vmatpush1.bf16.msra.mxu1 %v4834_v31  ;;  %457 = vmatprep.mubr.f32.mxu0 %v150_v34  ;;  %v352_v31 = vld [vmem:[#allocation4 + $0x5c8] sm:$0xff]  ;;  %v4854_v37 = vpack.c.bf16 %v349_v29, %v345_v28  ;;  %v883_v18 = vld [vmem:[%s8547_s3 + $0x90] sm:$0xff]  ;;  %v889_v28 = vld [vmem:[%s8547_s3 + $0xc0] sm:$0xff] }
  0x70   :  { %683 = vmatprep.mubr.f32.mxu1 %v150_v34  ;;  %4741 = vmatprep.subr.bf16.mxu0 %v4740_v35  ;;  %v4758_v34 = vpack.c.bf16 %v347_v25, %v343_v24  ;;  %v354_v35 = vld [vmem:[#allocation4 + $0x5d8] sm:$0xff]  ;;  %v894_v22 = vld [vmem:[%s8547_s3 + $0xe8] sm:$0xff]  ;;  %v893_v29 = vld [vmem:[%s8547_s3 + $0xe0] sm:$0xff] }
  0x71   :  { %458 = vmatmul.mubr.f32.gmra.mrb[4].mxu0 %v149_v41  ;;  %4837 = vmatprep.subr.bf16.mxu1 %v4836_v38  ;;  %v351_v38 = vld [vmem:[#allocation4 + $0x5c0] sm:$0xff]  ;;  %v4856_v44 = vpack.c.bf16 %v358_v36, %v354_v35  ;;  %v892_v25 = vld [vmem:[%s8547_s3 + $0xd8] sm:$0xff]  ;;  %v902_v35 = vld [vmem:[%s8547_s3 + $0x128] sm:$0xff] }
  0x72   :  { %684 = vmatmul.mubr.f32.gmra.mrb[4].mxu1 %v149_v41  ;;  %4743 = vmatpush1.bf16.msra.mxu0 %v4742_v42  ;;  %v4760_v41 = vpack.c.bf16 %v356_v32, %v352_v31  ;;  %v353_v42 = vld [vmem:[#allocation4 + $0x5d0] sm:$0xff]  ;;  %v154_v36 = vld [vmem:[%s8545_s1 + $0x58] sm:$0xff] }
  0x73   :  { %4839 = vmatpush1.bf16.msra.mxu1 %v4838_v45  ;;  %463 = vmatprep.mubr.f32.mxu0 %v153_v48  ;;  %v866_v45 = vld [vmem:[%s8547_s3 + $0x8] sm:$0xff]  ;;  %v4858_v51 = vpack.c.bf16 %v357_v43, %v353_v42  ;;  %v891_v31 = vld [vmem:[%s8547_s3 + $0xd0] sm:$0xff]  ;;  %v901_v42 = vld [vmem:[%s8547_s3 + $0x120] sm:$0xff] }
  0x74   :  { %689 = vmatprep.mubr.f32.mxu1 %v153_v48  ;;  %4745 = vmatprep.subr.bf16.mxu0 %v4744_v49  ;;  %v4762_v48 = vpack.c.bf16 %v355_v39, %v351_v38  ;;  %v868_v49 = vld [vmem:[%s8547_s3 + $0x18] sm:$0xff]  ;;  %v6554_v54 = vpack.c.bf16 %v870_v46, %v866_v45  ;;  %v895_v32 = vld [vmem:[%s8547_s3 + $0xf0] sm:$0xff] }
  0x75   :  { %464 = vmatmul.mubr.f32.gmra.mrb[6].mxu0 %v152_v55  ;;  %4841 = vmatprep.subr.bf16.mxu1 %v4840_v52  ;;  %v865_v52 = vld [vmem:[%s8547_s3] sm:$0xff]  ;;  %v6562_v57 = vpack.c.bf16 %v872_v50, %v868_v49  ;;  %v900_v38 = vld [vmem:[%s8547_s3 + $0x118] sm:$0xff]  ;;  %v903_v45 = vld [vmem:[%s8547_s3 + $0x130] sm:$0xff] }
  0x76   :  { %690 = vmatmul.mubr.f32.gmra.mrb[6].mxu1 %v152_v55  ;;  %4747 = vmatpush1.bf16.msra.mxu0 %v4746_v56  ;;  %8601 = vst [vmem:[#allocation10_spill] sm:$0xff] %v6554_v54  ;;  %v867_v55 = vld [vmem:[%s8547_s3 + $0x10] sm:$0xff]  ;;  %v6573_v61 = vpack.c.bf16 %v869_v53, %v865_v52  ;;  %v904_v39 = vld [vmem:[%s8547_s3 + $0x138] sm:$0xff] }
  0x77   :  { %4843 = vmatpush1.bf16.msra.mxu1 %v4842_v59  ;;  %469 = vmatprep.mubr.f32.mxu0 %v156_v62  ;;  %v871_v56 = vld [vmem:[%s8547_s3 + $0x30] sm:$0xff]  ;;  %8602 = vst [vmem:[#allocation11_spill] sm:$0xff] %v6562_v57  ;;  %v878_v59 = vld [vmem:[%s8547_s3 + $0x68] sm:$0xff]  ;;  %v6724_v46 = vpack.c.bf16 %v904_v39, %v900_v38  ;;  %v912_v52 = vld [vmem:[%s8547_s3 + $0x178] sm:$0xff] }
  0x78   :  { %695 = vmatprep.mubr.f32.mxu1 %v156_v62  ;;  %4749 = vmatprep.subr.bf16.mxu0 %v4748_v63  ;;  %v876_v62 = vld [vmem:[%s8547_s3 + $0x58] sm:$0xff]  ;;  %v6582_v1 = vpack.c.bf16 %v871_v56, %v867_v55  ;;  %v6592_v4 = vpack.c.bf16 %v878_v59, %v874_v58  ;;  %v157_v49 = vld [vmem:[%s8545_s1 + $0x70] sm:$0xff]  ;;  %v905_v55 = vld [vmem:[%s8547_s3 + $0x140] sm:$0xff] }
  0x79   :  { %470 = vmatmul.mubr.f32.gmra.mrb[8].mxu0 %v155_v5  ;;  %4845 = vmatprep.subr.bf16.mxu1 %v4844_v2  ;;  %v880_v63 = vld [vmem:[%s8547_s3 + $0x78] sm:$0xff]  ;;  %v873_v2 = vld [vmem:[%s8547_s3 + $0x40] sm:$0xff]  ;;  %v907_v59 = vld [vmem:[%s8547_s3 + $0x150] sm:$0xff] }
  0x7a   :  { %696 = vmatmul.mubr.f32.gmra.mrb[8].mxu1 %v155_v5  ;;  %4751 = vmatpush1.bf16.msra.mxu0 %v4750_v6  ;;  %v875_v5 = vld [vmem:[%s8547_s3 + $0x50] sm:$0xff]  ;;  %v6601_v7 = vpack.c.bf16 %v880_v63, %v876_v62  ;;  %v6613_v11 = vpack.c.bf16 %v877_v3, %v873_v2  ;;  %v909_v56 = vld [vmem:[%s8547_s3 + $0x160] sm:$0xff]  ;;  %v914_v63 = vld [vmem:[%s8547_s3 + $0x188] sm:$0xff] }
  0x7b   :  { %4847 = vmatpush1.bf16.msra.mxu1 %v4846_v9  ;;  %475 = vmatprep.mubr.f32.mxu0 %v159_v12  ;;  %v879_v6 = vld [vmem:[%s8547_s3 + $0x70] sm:$0xff]  ;;  %v886_v9 = vld [vmem:[%s8547_s3 + $0xa8] sm:$0xff]  ;;  %v166_v38 = vld [vmem:[%s8545_s1 + $0xb8] sm:$0xff] }
  0x7c   :  { %701 = vmatprep.mubr.f32.mxu1 %v159_v12  ;;  %4753 = vmatprep.subr.bf16.mxu0 %v4752_v13  ;;  %v884_v12 = vld [vmem:[%s8547_s3 + $0x98] sm:$0xff]  ;;  %v6623_v14 = vpack.c.bf16 %v879_v6, %v875_v5  ;;  %v6633_v17 = vpack.c.bf16 %v886_v9, %v882_v8  ;;  %v918_v2 = vld [vmem:[%s8547_s3 + $0x1a8] sm:$0xff]  ;;  %v6777_v5 = vpack.c.bf16 %v909_v56, %v905_v55 }
  0x7d   :  { %476 = vmatmul.mubr.f32.gmra.mrb[10].mxu0 %v158_v19  ;;  %4849 = vmatprep.subr.bf16.mxu1 %v4848_v16  ;;  %v888_v13 = vld [vmem:[%s8547_s3 + $0xb8] sm:$0xff]  ;;  %v885_v16 = vld [vmem:[%s8547_s3 + $0xa0] sm:$0xff]  ;;  %v160_v3 = vld [vmem:[%s8545_s1 + $0x88] sm:$0xff] }
  0x7e   :  { %702 = vmatmul.mubr.f32.gmra.mrb[10].mxu1 %v158_v19  ;;  %4755 = vmatpush1.bf16.msra.mxu0 %v4754_v20  ;;  %v887_v19 = vld [vmem:[%s8547_s3 + $0xb0] sm:$0xff]  ;;  %v6642_v20 = vpack.c.bf16 %v888_v13, %v884_v12  ;;  %v6654_v24 = vpack.c.bf16 %v885_v16, %v881_v15  ;;  %v916_v6 = vld [vmem:[%s8547_s3 + $0x198] sm:$0xff]  ;;  %v917_v12 = vld [vmem:[%s8547_s3 + $0x1a0] sm:$0xff]  ;;  %v6797_v13 = vpack.c.bf16 %v918_v2, %v914_v63 }
  0x7f   :  { %4851 = vmatpush1.bf16.msra.mxu1 %v4850_v23  ;;  %481 = vmatprep.mubr.f32.mxu0 %v162_v26  ;;  %v151_v23 = vld [vmem:[%s8545_s1 + $0x40] sm:$0xff]  ;;  %v920_v8 = vld [vmem:[%s8547_s3 + $0x1b8] sm:$0xff]  ;;  %v915_v15 = vld [vmem:[%s8547_s3 + $0x190] sm:$0xff] }
  0x80   :  { %707 = vmatprep.mubr.f32.mxu1 %v162_v26  ;;  %4757 = vmatprep.subr.bf16.mxu0 %v4756_v27  ;;  %v896_v26 = vld [vmem:[%s8547_s3 + $0xf8] sm:$0xff]  ;;  %v6664_v27 = vpack.c.bf16 %v887_v19, %v883_v18  ;;  %v919_v16 = vld [vmem:[%s8547_s3 + $0x1b0] sm:$0xff]  ;;  %v6806_v18 = vpack.c.bf16 %v920_v8, %v916_v6  ;;  %v922_v19 = vld [vmem:[%s8547_s3 + $0x1c8] sm:$0xff] }
  0x81   :  { %482 = vmatmul.mubr.f32.gmra.mrb[12].mxu0 %v161_v33  ;;  %4853 = vmatprep.subr.bf16.mxu1 %v4852_v30  ;;  %v6674_v30 = vpack.c.bf16 %v894_v22, %v890_v21  ;;  %v926_v21 = vld [vmem:[%s8547_s3 + $0x1e8] sm:$0xff]  ;;  %v163_v22 = vld [vmem:[%s8545_s1 + $0xa0] sm:$0xff] }
  0x82   :  { %708 = vmatmul.mubr.f32.gmra.mrb[12].mxu1 %v161_v33  ;;  %4759 = vmatpush1.bf16.msra.mxu0 %v4758_v34  ;;  %v6683_v33 = vpack.c.bf16 %v896_v26, %v892_v25  ;;  %v898_v34 = vld [vmem:[%s8547_s3 + $0x108] sm:$0xff]  ;;  %v924_v25 = vld [vmem:[%s8547_s3 + $0x1d8] sm:$0xff] }
  0x83   :  { %4855 = vmatpush1.bf16.msra.mxu1 %v4854_v37  ;;  %487 = vmatprep.mubr.f32.mxu0 %v165_v40  ;;  %v6695_v37 = vpack.c.bf16 %v893_v29, %v889_v28  ;;  %v6715_v43 = vpack.c.bf16 %v902_v35, %v898_v34  ;;  %v928_v26 = vld [vmem:[%s8547_s3 + $0x1f8] sm:$0xff]  ;;  %v6828_v28 = vpack.c.bf16 %v919_v16, %v915_v15  ;;  %v921_v29 = vld [vmem:[%s8547_s3 + $0x1c0] sm:$0xff]  ;;  %v923_v34 = vld [vmem:[%s8547_s3 + $0x1d0] sm:$0xff] }
  0x84   :  { %713 = vmatprep.mubr.f32.mxu1 %v165_v40  ;;  %4761 = vmatprep.subr.bf16.mxu0 %v4760_v41  ;;  %v6705_v40 = vpack.c.bf16 %v895_v32, %v891_v31  ;;  %v897_v41 = vld [vmem:[%s8547_s3 + $0x100] sm:$0xff]  ;;  %v6838_v32 = vpack.c.bf16 %v926_v21, %v922_v19  ;;  %v927_v35 = vld [vmem:[%s8547_s3 + $0x1f0] sm:$0xff] }
  0x85   :  { %488 = vmatmul.mubr.f32.gmra.mrb[14].mxu0 %v164_v47  ;;  %4857 = vmatprep.subr.bf16.mxu1 %v4856_v44  ;;  %v899_v44 = vld [vmem:[%s8547_s3 + $0x110] sm:$0xff]  ;;  %v6736_v50 = vpack.c.bf16 %v901_v42, %v897_v41  ;;  %v925_v31 = vld [vmem:[%s8547_s3 + $0x1e0] sm:$0xff]  ;;  %v6857_v41 = vpack.c.bf16 %v927_v35, %v923_v34  ;;  %v70_v42 = vlaneseq }
  0x86   :  { %714 = vmatmul.mubr.f32.gmra.mrb[14].mxu1 %v164_v47  ;;  %4763 = vmatpush1.bf16.msra.mxu0 %v4762_v48  ;;  %v906_v47 = vld [vmem:[%s8547_s3 + $0x148] sm:$0xff]  ;;  %v6746_v53 = vpack.c.bf16 %v903_v45, %v899_v44  ;;  %v6853_v39 = vpack.c.bf16 %v925_v31, %v921_v29 }
  0x87   :  { %4859 = vmatpush1.bf16.msra.mxu1 %v4858_v51  ;;  %558 = vmatprep.mubr.f32.mxu0 %v8561_v0  ;;  %v910_v48 = vld [vmem:[%s8547_s3 + $0x168] sm:$0xff]  ;;  %v908_v51 = vld [vmem:[%s8547_s3 + $0x158] sm:$0xff]  ;;  %8603 = vst [vmem:[#allocation12_spill] sm:$0xff] %v6857_v41  ;;  %v6904_v44 = vshrl.u32 %v70_v42, 7 }
  0x88   :  { %784 = vmatprep.mubr.f32.mxu1 %v8561_v0  ;;  %4861 = vmatprep.subr.bf16.mxu0 %v6554_v54  ;;  %v6756_v58 = vpack.c.bf16 %v910_v48, %v906_v47  ;;  %v6765_v62 = vpack.c.bf16 %v912_v52, %v908_v51  ;;  %v359_v47 = vld [vmem:[%s8548_s4] sm:$0xf] }
  0x89   :  { %559 = vmatmul.mubr.f32.vlgmr.msra.gmra.mrb[0].mxu0 %v145_v60  ;;  %4893 = vmatprep.subr.bf16.mxu1 %v6562_v57  ;;  %8604 = vst [vmem:[#allocation13_spill] sm:$0xff] %v6904_v44  ;;  %v8560_v45 = vsub.s32 0, %v6904_v44  ;;  %v8558_v51 = vsub.s32 1, %v6904_v44  ;;  %v8557_v56 = vsub.s32 3, %v6904_v44 }
  0x8a   :  { %785 = vmatmul.mubr.f32.vlgmr.msra.gmra.mrb[0].mxu1 %v145_v60  ;;  %4863 = vmatpush1.bf16.msra.mxu0 %v6573_v61  ;;  %v911_v60 = vld [vmem:[%s8547_s3 + $0x170] sm:$0xff] }
  0x8b   :  { %4895 = vmatpush1.bf16.msra.mxu1 %v6582_v1  ;;  %564 = vmatprep.mubr.f32.mxu0 %v8561_v0  ;;  %v6787_v9 = vpack.c.bf16 %v911_v60, %v907_v59  ;;  %v6923_v60 = vrot.slane %v359_v47, %v8560_v45  ;;  %v6931_v2 = vrot.slane %v359_v47, %v8558_v51 }
  0x8c   :  { %790 = vmatprep.mubr.f32.mxu1 %v8561_v0  ;;  %4865 = vmatprep.subr.bf16.mxu0 %v6592_v4  ;;  %v6935_v6 = vrot.slane %v359_v47, %v8557_v56 }
  0x8d   :  { %565 = vmatmul.mubr.f32.gmra.mrb[2].mxu0 %v148_v10  ;;  %4897 = vmatprep.subr.bf16.mxu1 %v6601_v7 }
  0x8e   :  { %791 = vmatmul.mubr.f32.gmra.mrb[2].mxu1 %v148_v10  ;;  %4867 = vmatpush1.bf16.msra.mxu0 %v6613_v11  ;;  %v913_v10 = vld [vmem:[%s8547_s3 + $0x180] sm:$0xff] }
  0x8f   :  { %4899 = vmatpush1.bf16.msra.mxu1 %v6623_v14  ;;  %570 = vmatprep.mubr.f32.mxu0 %v8561_v0 }
  0x90   :  { %796 = vmatprep.mubr.f32.mxu1 %v8561_v0  ;;  %4869 = vmatprep.subr.bf16.mxu0 %v6633_v17 }
  0x91   :  { %571 = vmatmul.mubr.f32.gmra.mrb[4].mxu0 %v151_v23  ;;  %4901 = vmatprep.subr.bf16.mxu1 %v6642_v20 }
  0x92   :  { %797 = vmatmul.mubr.f32.gmra.mrb[4].mxu1 %v151_v23  ;;  %4871 = vmatpush1.bf16.msra.mxu0 %v6654_v24  ;;  %v6818_v23 = vpack.c.bf16 %v917_v12, %v913_v10 }
  0x93   :  { %4903 = vmatpush1.bf16.msra.mxu1 %v6664_v27  ;;  %576 = vmatprep.mubr.f32.mxu0 %v8561_v0 }
  0x94   :  { %802 = vmatprep.mubr.f32.mxu1 %v8561_v0  ;;  %4873 = vmatprep.subr.bf16.mxu0 %v6674_v30 }
  0x95   :  { %577 = vmatmul.mubr.f32.gmra.mrb[6].mxu0 %v154_v36  ;;  %4905 = vmatprep.subr.bf16.mxu1 %v6683_v33 }
  0x96   :  { %803 = vmatmul.mubr.f32.gmra.mrb[6].mxu1 %v154_v36  ;;  %4875 = vmatpush1.bf16.msra.mxu0 %v6695_v37  ;;  %v6847_v36 = vpack.c.bf16 %v928_v26, %v924_v25  ;;  %v6949_v25 = vand.u32 127, %v70_v42 }
  0x97   :  { %4907 = vmatpush1.bf16.msra.mxu1 %v6705_v40  ;;  %582 = vmatprep.mubr.f32.mxu0 %v8561_v0 }
  0x98   :  { %808 = vmatprep.mubr.f32.mxu1 %v8561_v0  ;;  %4877 = vmatprep.subr.bf16.mxu0 %v6715_v43  ;;  %v6963_v56 = vadd.s32 384, %v6949_v25  ;;  %vm72_vm0 = vcmp.lt.s32.totalorder %v6949_v25, 64 }
  0x99   :  { %583 = vmatmul.mubr.f32.gmra.mrb[8].mxu0 %v157_v49  ;;  %4909 = vmatprep.subr.bf16.mxu1 %v6724_v46 }
  0x9a   :  { %809 = vmatmul.mubr.f32.gmra.mrb[8].mxu1 %v157_v49  ;;  %4879 = vmatpush1.bf16.msra.mxu0 %v6736_v50  ;;  %v8559_v49 = vsub.s32 2, %v6904_v44  ;;  %8607 = vst [vmem:[#allocation16_spill] sm:$0xff] %v6963_v56  ;;  %vm134_vm3 = vcmp.lt.s32.totalorder %v6963_v56, 448 }
  0x9b   :  { %4911 = vmatpush1.bf16.msra.mxu1 %v6746_v53  ;;  %588 = vmatprep.mubr.f32.mxu0 %v8561_v0 }
  0x9c   :  { %814 = vmatprep.mubr.f32.mxu1 %v8561_v0  ;;  %4881 = vmatprep.subr.bf16.mxu0 %v6756_v58  ;;  %v6927_v63 = vrot.slane %v359_v47, %v8559_v49 }
  0x9d   :  { %589 = vmatmul.mubr.f32.gmra.mrb[10].mxu0 %v160_v3  ;;  %4913 = vmatprep.subr.bf16.mxu1 %v6765_v62 }
  0x9e   :  { %815 = vmatmul.mubr.f32.gmra.mrb[10].mxu1 %v160_v3  ;;  %4883 = vmatpush1.bf16.msra.mxu0 %v6777_v5 }
  0x9f   :  { %4915 = vmatpush1.bf16.msra.mxu1 %v6787_v9  ;;  %594 = vmatprep.mubr.f32.mxu0 %v8561_v0 }
  0xa0   :  { %820 = vmatprep.mubr.f32.mxu1 %v8561_v0  ;;  %4885 = vmatprep.subr.bf16.mxu0 %v6797_v13 }
  0xa1   :  { %595 = vmatmul.mubr.f32.gmra.mrb[12].mxu0 %v163_v22  ;;  %4917 = vmatprep.subr.bf16.mxu1 %v6806_v18 }
  0xa2   :  { %821 = vmatmul.mubr.f32.gmra.mrb[12].mxu1 %v163_v22  ;;  %4887 = vmatpush1.bf16.msra.mxu0 %v6818_v23 }
  0xa3   :  { %4919 = vmatpush1.bf16.msra.mxu1 %v6828_v28  ;;  %600 = vmatprep.mubr.f32.mxu0 %v8561_v0 }
  0xa4   :  { %826 = vmatprep.mubr.f32.mxu1 %v8561_v0  ;;  %4889 = vmatprep.subr.bf16.mxu0 %v6838_v32 }
  0xa5   :  { %601 = vmatmul.mubr.f32.gmra.mrb[14].mxu0 %v166_v38  ;;  %4921 = vmatprep.subr.bf16.mxu1 %v6847_v36 }
  0xa6   :  { %827 = vmatmul.mubr.f32.gmra.mrb[14].mxu1 %v166_v38  ;;  %4891 = vmatpush1.bf16.msra.mxu0 %v6853_v39 }
  0xa7   :  { %4923 = vmatpush1.bf16.msra.mxu1 %v6857_v41  ;;  %1006 = vmatprep.mubr.f32.mxu0 %v8561_v0 }
  0xa8   :  { %1077 = vmatprep.mubr.f32.mxu1 %v8561_v0  ;;  %4925 = vmatprep.subr.bf16.mxu0 %v6554_v54 }
  0xa9   :  { %1007 = vmatmul.mubr.f32.vlgmr.msra.gmra.mrb[16].mxu0 %v8561_v0  ;;  %4957 = vmatprep.subr.bf16.mxu1 %v6562_v57 }
  0xaa   :  { %1078 = vmatmul.mubr.f32.vlgmr.msra.gmra.mrb[16].mxu1 %v8561_v0  ;;  %4927 = vmatpush1.bf16.msra.mxu0 %v6573_v61 }
  0xab   :  { %4959 = vmatpush1.bf16.msra.mxu1 %v6582_v1  ;;  %4929 = vmatprep.subr.bf16.mxu0 %v6592_v4 }
  0xac   :  { %4961 = vmatprep.subr.bf16.mxu1 %v6601_v7  ;;  %1199 = vmatprep.mubr.f32.mxu0 %v8561_v0 }
  0xad   :  { %1270 = vmatprep.mubr.f32.mxu1 %v8561_v0 }
  0xae   :  { %4931 = vmatpush1.bf16.msra.mxu0 %v6613_v11 }
  0xaf   :  { %4963 = vmatpush1.bf16.msra.mxu1 %v6623_v14  ;;  %4933 = vmatprep.subr.bf16.mxu0 %v6633_v17 }
  0xb0   :  { %4965 = vmatprep.subr.bf16.mxu1 %v6642_v20 }
  0xb2   :  { %4935 = vmatpush1.bf16.msra.mxu0 %v6654_v24 }
  0xb3   :  { %4967 = vmatpush1.bf16.msra.mxu1 %v6664_v27  ;;  %4937 = vmatprep.subr.bf16.mxu0 %v6674_v30 }
  0xb4   :  { %4969 = vmatprep.subr.bf16.mxu1 %v6683_v33 }
  0xb6   :  { %4939 = vmatpush1.bf16.msra.mxu0 %v6695_v37 }
  0xb7   :  { %4971 = vmatpush1.bf16.msra.mxu1 %v6705_v40  ;;  %4941 = vmatprep.subr.bf16.mxu0 %v6715_v43 }
  0xb8   :  { %4973 = vmatprep.subr.bf16.mxu1 %v6724_v46 }
  0xba   :  { %4943 = vmatpush1.bf16.msra.mxu0 %v6736_v50 }
  0xbb   :  { %4975 = vmatpush1.bf16.msra.mxu1 %v6746_v53  ;;  %4945 = vmatprep.subr.bf16.mxu0 %v6756_v58 }
  0xbc   :  { %4977 = vmatprep.subr.bf16.mxu1 %v6765_v62 }
  0xbe   :  { %4947 = vmatpush1.bf16.msra.mxu0 %v6777_v5 }
  0xbf   :  { %4979 = vmatpush1.bf16.msra.mxu1 %v6787_v9  ;;  %4949 = vmatprep.subr.bf16.mxu0 %v6797_v13 }
  0xc0   :  { %4981 = vmatprep.subr.bf16.mxu1 %v6806_v18 }
  0xc2   :  { %4951 = vmatpush1.bf16.msra.mxu0 %v6818_v23 }
  0xc3   :  { %4983 = vmatpush1.bf16.msra.mxu1 %v6828_v28  ;;  %4953 = vmatprep.subr.bf16.mxu0 %v6838_v32 }
  0xc4   :  { %4985 = vmatprep.subr.bf16.mxu1 %v6847_v36 }
  0xc6   :  { %4955 = vmatpush1.bf16.msra.mxu0 %v6853_v39 }
  0xc7   :  { %4987 = vmatpush1.bf16.msra.mxu1 %v6857_v41  ;;  %4989 = vmatprep.subr.bf16.mxu0 %v6554_v54 }
  0xc8   :  { %5021 = vmatprep.subr.bf16.mxu1 %v6562_v57 }
 0x15c   :  { %v6910_v48 = vpop.f32.mrb[0].mxu0 }
 0x15d   :  { %v6914_v52 = vpop.f32.mrb[0].mxu1  ;;  %v6916_v55 = vpop.f32.mrb[1].mxu0 }
 0x15e   :  { %v6919_v59 = vpop.f32.mrb[1].mxu1 }
 0x160   :  { %v566_v3 = vpop.f32.mrb[2].mxu0 }
 0x161   :  { %v6938_v8 = vadd.f32 %v566_v3, %v6923_v60  ;;  %v792_v10 = vpop.f32.mrb[2].mxu1  ;;  %v568_v12 = vpop.f32.mrb[3].mxu0 }
 0x162   :  { %v6941_v15 = vadd.f32 %v792_v10, %v6927_v63  ;;  %v6944_v16 = vadd.f32 %v568_v12, %v6931_v2  ;;  %v794_v19 = vpop.f32.mrb[3].mxu1  ;;  %v6956_v10 = vadd.s32 128, %v6949_v25  ;;  %v6959_v12 = vadd.s32 256, %v6949_v25 }
 0x163   :  { %v6947_v21 = vadd.f32 %v794_v19, %v6935_v6 }
 0x164   :  { %v572_v22 = vpop.f32.mrb[4].mxu0  ;;  %8605 = vst [vmem:[#allocation14_spill] sm:$0xff] %v6956_v10  ;;  %8606 = vst [vmem:[#allocation15_spill] sm:$0xff] %v6959_v12  ;;  %vm100_vm1 = vcmp.lt.s32.totalorder %v6956_v10, 192  ;;  %vm117_vm2 = vcmp.lt.s32.totalorder %v6959_v12, 320 }
 0x165   :  { %v6000_v26 = vadd.f32 %v572_v22, %v6923_v60  ;;  %v798_v29 = vpop.f32.mrb[4].mxu1  ;;  %v574_v31 = vpop.f32.mrb[5].mxu0 }
 0x166   :  { %v6016_v34 = vadd.f32 %v798_v29, %v6927_v63  ;;  %v6001_v35 = vadd.f32 %v574_v31, %v6931_v2  ;;  %v800_v38 = vpop.f32.mrb[5].mxu1 }
 0x167   :  { %v6017_v47 = vadd.f32 %v800_v38, %v6935_v6 }
 0x168   :  { %v578_v3 = vpop.f32.mrb[6].mxu0 }
 0x169   :  { %v6002_v42 = vadd.f32 %v578_v3, %v6923_v60  ;;  %v804_v19 = vpop.f32.mrb[6].mxu1  ;;  %v580_v22 = vpop.f32.mrb[7].mxu0 }
 0x16a   :  { %v6018_v29 = vadd.f32 %v804_v19, %v6927_v63  ;;  %v6003_v31 = vadd.f32 %v580_v22, %v6931_v2  ;;  %v806_v51 = vpop.f32.mrb[7].mxu1 }
 0x16b   :  { %v6019_v38 = vadd.f32 %v806_v51, %v6935_v6 }
 0x16c   :  { %v584_v49 = vpop.f32.mrb[8].mxu0 }
 0x16d   :  { %v6004_v3 = vadd.f32 %v584_v49, %v6923_v60  ;;  %v810_v45 = vpop.f32.mrb[8].mxu1  ;;  %v586_v0 = vpop.f32.mrb[9].mxu0 }
 0x16e   :  { %v6020_v19 = vadd.f32 %v810_v45, %v6927_v63  ;;  %v6005_v22 = vadd.f32 %v586_v0, %v6931_v2  ;;  %v812_v44 = vpop.f32.mrb[9].mxu1 }
 0x16f   :  { %v6021_v51 = vadd.f32 %v812_v44, %v6935_v6  ;;  %v6978_v57 = vsel %vm72_vm0, %v6002_v42, %v6004_v3  ;;  %v6982_v54 = vsel %vm72_vm0, %v6004_v3, %v6002_v42 }
 0x170   :  { %8608 = vst [vmem:[#allocation17_spill] sm:$0xff] %v6978_v57  ;;  %8609 = vst [vmem:[#allocation18_spill] sm:$0xff] %v6982_v54  ;;  %v590_v49 = vpop.f32.mrb[10].mxu0  ;;  %v6986_v41 = vsel %vm117_vm2, %v6018_v29, %v6020_v19  ;;  %v6990_v45 = vsel %vm100_vm1, %v6003_v31, %v6005_v22  ;;  %v6994_v0 = vsel %vm117_vm2, %v6020_v19, %v6018_v29 }
 0x171   :  { %8610 = vst [vmem:[#allocation19_spill] sm:$0xff] %v6986_v41  ;;  %8611 = vst [vmem:[#allocation20_spill] sm:$0xff] %v6990_v45  ;;  %v6998_v44 = vsel %vm100_vm1, %v6005_v22, %v6003_v31  ;;  %v6006_v42 = vadd.f32 %v590_v49, %v6923_v60  ;;  %v816_v3 = vpop.f32.mrb[10].mxu1  ;;  %v592_v54 = vpop.f32.mrb[11].mxu0  ;;  %v7003_v57 = vsel %vm134_vm3, %v6019_v38, %v6021_v51 }
 0x172   :  { %8612 = vst [vmem:[#allocation21_spill] sm:$0xff] %v6994_v0  ;;  %8613 = vst [vmem:[#allocation22_spill] sm:$0xff] %v6998_v44  ;;  %v7007_v41 = vsel %vm134_vm3, %v6021_v51, %v6019_v38  ;;  %v6022_v45 = vadd.f32 %v816_v3, %v6927_v63  ;;  %v6007_v29 = vadd.f32 %v592_v54, %v6931_v2  ;;  %v818_v19 = vpop.f32.mrb[11].mxu1 }
 0x173   :  { %8614 = vst [vmem:[#allocation23_spill] sm:$0xff] %v7007_v41  ;;  %v6023_v31 = vadd.f32 %v818_v19, %v6935_v6  ;;  %v7014_v22 = vsel %vm72_vm0, %v6000_v26, %v6006_v42  ;;  %v7018_v49 = vsel %vm72_vm0, %v6006_v42, %v6000_v26 }
 0x174   :  { %8615 = vst [vmem:[#allocation24_spill] sm:$0xff] %v7018_v49  ;;  %v596_v44 = vpop.f32.mrb[12].mxu0  ;;  %v7022_v38 = vsel %vm117_vm2, %v6016_v34, %v6022_v45  ;;  %v7026_v51 = vsel %vm100_vm1, %v6001_v35, %v6007_v29  ;;  %v7030_v54 = vsel %vm117_vm2, %v6022_v45, %v6016_v34  ;;  %v7034_v3 = vsel %vm100_vm1, %v6007_v29, %v6001_v35 }
 0x175   :  { %8616 = vst [vmem:[#allocation25_spill] sm:$0xff] %v7034_v3  ;;  %v6008_v26 = vadd.f32 %v596_v44, %v6923_v60  ;;  %v822_v42 = vpop.f32.mrb[12].mxu1  ;;  %v598_v19 = vpop.f32.mrb[13].mxu0  ;;  %v7039_v49 = vsel %vm134_vm3, %v6017_v47, %v6023_v31  ;;  %v7043_v41 = vsel %vm134_vm3, %v6023_v31, %v6017_v47 }
 0x176   :  { %8617 = vst [vmem:[#allocation26_spill] sm:$0xff] %v7043_v41  ;;  %v6024_v0 = vadd.f32 %v822_v42, %v6927_v63  ;;  %v6009_v34 = vadd.f32 %v598_v19, %v6931_v2  ;;  %v824_v45 = vpop.f32.mrb[13].mxu1 }
 0x177   :  { %v6025_v35 = vadd.f32 %v824_v45, %v6935_v6  ;;  %v7051_v44 = vsel %vm72_vm0, %v6938_v8, %v6008_v26  ;;  %v7056_v29 = vsel %vm72_vm0, %v6008_v26, %v6938_v8  ;;  %v5996_v26 = vadd.f32 %v6910_v48, %v6923_v60 }
 0x178   :  { %8618 = vst [vmem:[#allocation27_spill] sm:$0xff] %v7056_v29  ;;  %v602_v3 = vpop.f32.mrb[14].mxu0  ;;  %v7061_v47 = vsel %vm117_vm2, %v6941_v15, %v6024_v0  ;;  %v7066_v31 = vsel %vm100_vm1, %v6944_v16, %v6009_v34  ;;  %v7071_v42 = vsel %vm117_vm2, %v6024_v0, %v6941_v15  ;;  %v7076_v8 = vsel %vm100_vm1, %v6009_v34, %v6944_v16 }
 0x179   :  { %8619 = vst [vmem:[#allocation28_spill] sm:$0xff] %v7076_v8  ;;  %v6010_v19 = vadd.f32 %v602_v3, %v6923_v60  ;;  %v828_v45 = vpop.f32.mrb[14].mxu1  ;;  %v604_v29 = vpop.f32.mrb[15].mxu0  ;;  %v7084_v41 = vsel %vm134_vm3, %v6947_v21, %v6025_v35  ;;  %v7089_v15 = vsel %vm134_vm3, %v6025_v35, %v6947_v21  ;;  %v6012_v16 = vadd.f32 %v6914_v52, %v6927_v63 }
 0x17a   :  { %8620 = vst [vmem:[#allocation29_spill] sm:$0xff] %v7089_v15  ;;  %v5997_v48 = vadd.f32 %v6916_v55, %v6931_v2  ;;  %v6026_v60 = vadd.f32 %v828_v45, %v6927_v63  ;;  %v6011_v0 = vadd.f32 %v604_v29, %v6931_v2  ;;  %v830_v3 = vpop.f32.mrb[15].mxu1  ;;  %v6013_v34 = vadd.f32 %v6919_v59, %v6935_v6 }
 0x17b   :  { %v6027_v8 = vadd.f32 %v830_v3, %v6935_v6  ;;  %v938_v21 = vsel %vm72_vm0, %v5996_v26, %v6010_v19  ;;  %v7104_v35 = vsel %vm72_vm0, %v6010_v19, %v5996_v26 }
 0x17c   :  { %8621 = vst [vmem:[#allocation30_spill] sm:$0xff] %v7104_v35  ;;  %v1008_v52 = vpop.f32.mrb[16].mxu0  ;;  %v940_v55 = vsel %vm117_vm2, %v6012_v16, %v6026_v60  ;;  %v939_v63 = vsel %vm100_vm1, %v5997_v48, %v6011_v0  ;;  %v7112_v2 = vsel %vm117_vm2, %v6026_v60, %v6012_v16  ;;  %v7116_v59 = vsel %vm100_vm1, %v6011_v0, %v5997_v48 }
 0x17d   :  { %8622 = vst [vmem:[#allocation31_spill] sm:$0xff] %v7112_v2  ;;  %8623 = vst [vmem:[#allocation32_spill] sm:$0xff] %v7116_v59  ;;  %v1084_v6 = vadd.f32 %v1008_v52, %v938_v21  ;;  %v1079_v29 = vpop.f32.mrb[16].mxu1  ;;  %v1010_v45 = vpop.f32.mrb[17].mxu0  ;;  %v941_v26 = vsel %vm134_vm3, %v6013_v34, %v6027_v8  ;;  %v7122_v19 = vsel %vm134_vm3, %v6027_v8, %v6013_v34 }
 0x17e   :  { %8624 = vst [vmem:[#allocation33_spill] sm:$0xff] %v7122_v19  ;;  %v1086_v3 = vadd.f32 %v1079_v29, %v940_v55  ;;  %v1085_v35 = vadd.f32 %v1010_v45, %v939_v63  ;;  %v1081_v15 = vpop.f32.mrb[17].mxu1  ;;  %v6389_v45 = vmov 7  }
 0x17f   :  { %v4509_v12 = vmul.f32 -1.442695, %v1084_v6  ;;  %v1087_v16 = vadd.f32 %v1081_v15, %v941_v26 }
 0x180   :  { %v4510_v60 = vmul.f32 -1.442695, %v1085_v35  ;;  %v7130_v35 = vld [vmem:[%s8544_s0] sm:$0xff] }
 0x181   :  { %6075 = vpow2.f32 %v4509_v12  ;;  %v4511_v48 = vmul.f32 -1.442695, %v1087_v16 }
 0x182   :  { %6077 = vpow2.f32 %v4510_v60  ;;  %v8627_v60 = vmov 0.0  }
 0x183   :  { %6079 = vpow2.f32 %v4511_v48  ;;  %v8628_v48 = vld [vmem:[#allocation12_spill] sm:$0xff] }
 0x184   :  { %6081 = vtanh.f32 %v1086_v3 }
 0x18b   :  { %v6076_v0 = vpop.eup %6075 }
 0x18c   :  { %v6078_v21 = vpop.eup %6077  ;;  %v1091_v52 = vadd.f32 1.0, %v6076_v0  ;;  %v8629_v0 = vld [vmem:[#allocation10_spill] sm:$0xff] }
 0x18d   :  { %v1097_v10 = vadd.f32 1.0, %v6078_v21  ;;  %v6080_v56 = vpop.eup %6079  ;;  %v8630_v21 = vld [vmem:[#allocation11_spill] sm:$0xff] }
 0x18e   :  { %6083 = vrcp.f32 %v1091_v52  ;;  %v6082_v8 = vpop.eup %6081  ;;  %v1104_v29 = vadd.f32 1.0, %v6080_v56 }
 0x18f   :  { %6085 = vrcp.f32 %v1097_v10  ;;  %v1112_v10 = vsel %vm72_vm0, 0, %v6389_v45 }
 0x190   :  { %6087 = vrcp.f32 %v1104_v29  ;;  %vm7135_vm6 = vcmp.lt.s32.totalorder %v1112_v10, %v7130_v35 }
 0x198   :  { %v6084_v34 = vpop.eup %6083 }
 0x199   :  { %v6086_v55 = vpop.eup %6085  ;;  %v1108_v63 = vmul.f32 %v6084_v34, %v6082_v8 }
 0x19a   :  { %v1107_v6 = vmul.f32 0.0, %v6086_v55  ;;  %v6088_v12 = vpop.eup %6087 }
 0x19c   :  { %v7124_v15 = vadd.f32 %v1108_v63, %v1107_v6 }
 0x19e   :  { %6089 = vtanh.f32 %v7124_v15 }
 0x1a8   :  { %v6090_v26 = vpop.eup %6089 }
 0x1a9   :  { %v1111_v3 = vmul.f32 %v6090_v26, %v6088_v12 }
 0x1ab   :  { %4512 = vmatmul.mubr.msk.f32.vlgmr.msra.gmra.mrb[18].mxu0 %vm7135_vm6, %v1111_v3  ;;  %4513 = vmatmul.mubr.msk.f32.vlgmr.msra.gmra.mrb[18].mxu1 %vm7135_vm6, %v1111_v3  ;;  %v7145_v16 = vsel %vm7135_vm6, %v1111_v3, 0.0 }
 0x1ac   :  { %4991 = vmatpush1.bf16.msra.mxu0 %v6573_v61  ;;  %5023 = vmatpush1.bf16.msra.mxu1 %v6582_v1  ;;  %1117 = vst.msk [vmem:[#allocation3] sm:$0xff] %vm1116_vm4, %v7145_v16 }
 0x1ad   :  { %1120 = vst.msk [vmem:[#allocation3 + $0x38] sm:$0xff] %vm1119_vm5, %v7145_v16  ;;  %4993 = vmatprep.subr.bf16.mxu0 %v6592_v4  ;;  %5025 = vmatprep.subr.bf16.mxu1 %v6601_v7 }
 0x1ae   :  { %1392 = vmatprep.mubr.f32.mxu0 %v8627_v60  ;;  %1463 = vmatprep.mubr.f32.mxu1 %v8627_v60 }
 0x1b0   :  { %4995 = vmatpush1.bf16.msra.mxu0 %v6613_v11  ;;  %5027 = vmatpush1.bf16.msra.mxu1 %v6623_v14 }
 0x1b1   :  { %4997 = vmatprep.subr.bf16.mxu0 %v6633_v17  ;;  %5029 = vmatprep.subr.bf16.mxu1 %v6642_v20 }
 0x1b4   :  { %4999 = vmatpush1.bf16.msra.mxu0 %v6654_v24  ;;  %5031 = vmatpush1.bf16.msra.mxu1 %v6664_v27 }
 0x1b5   :  { %5001 = vmatprep.subr.bf16.mxu0 %v6674_v30  ;;  %5033 = vmatprep.subr.bf16.mxu1 %v6683_v33 }
 0x1b8   :  { %5003 = vmatpush1.bf16.msra.mxu0 %v6695_v37  ;;  %5035 = vmatpush1.bf16.msra.mxu1 %v6705_v40 }
 0x1b9   :  { %5005 = vmatprep.subr.bf16.mxu0 %v6715_v43  ;;  %5037 = vmatprep.subr.bf16.mxu1 %v6724_v46 }
 0x1bc   :  { %5007 = vmatpush1.bf16.msra.mxu0 %v6736_v50  ;;  %5039 = vmatpush1.bf16.msra.mxu1 %v6746_v53 }
 0x1bd   :  { %5009 = vmatprep.subr.bf16.mxu0 %v6756_v58  ;;  %5041 = vmatprep.subr.bf16.mxu1 %v6765_v62 }
 0x1c0   :  { %5011 = vmatpush1.bf16.msra.mxu0 %v6777_v5  ;;  %5043 = vmatpush1.bf16.msra.mxu1 %v6787_v9 }
 0x1c1   :  { %5013 = vmatprep.subr.bf16.mxu0 %v6797_v13  ;;  %5045 = vmatprep.subr.bf16.mxu1 %v6806_v18 }
 0x1c4   :  { %5015 = vmatpush1.bf16.msra.mxu0 %v6818_v23  ;;  %5047 = vmatpush1.bf16.msra.mxu1 %v6828_v28 }
 0x1c5   :  { %5017 = vmatprep.subr.bf16.mxu0 %v6838_v32  ;;  %5049 = vmatprep.subr.bf16.mxu1 %v6847_v36 }
 0x1c8   :  { %5019 = vmatpush1.bf16.msra.mxu0 %v6853_v39  ;;  %5051 = vmatpush1.bf16.msra.mxu1 %v8628_v48 }
 0x1c9   :  { %5053 = vmatprep.subr.bf16.mxu0 %v8629_v0  ;;  %5085 = vmatprep.subr.bf16.mxu1 %v8630_v21 }
 0x27e   :  { %v1201_v52 = vpop.f32.mrb[18].mxu0  ;;  %v1272_v8 = vpop.f32.mrb[18].mxu1 }
 0x27f   :  { %v1277_v34 = vadd.f32 %v1201_v52, %v7051_v44  ;;  %v1279_v55 = vadd.f32 %v1272_v8, %v7061_v47  ;;  %v1203_v63 = vpop.f32.mrb[19].mxu0  ;;  %v1274_v29 = vpop.f32.mrb[19].mxu1  ;;  %v6390_v8 = vmov 6  }
 0x280   :  { %v1278_v6 = vadd.f32 %v1203_v63, %v7066_v31  ;;  %v1280_v12 = vadd.f32 %v1274_v29, %v7084_v41  ;;  %v1305_v41 = vsel %vm72_vm0, 1, %v6390_v8 }
 0x281   :  { %v4514_v45 = vmul.f32 -1.442695, %v1277_v34  ;;  %v1115_v34 = vsel %vm7135_vm6, %v7124_v15, 0.0  ;;  %vm7195_vm7 = vcmp.lt.s32.totalorder %v1305_v41, %v7130_v35 }
 0x282   :  { %v4515_v10 = vmul.f32 -1.442695, %v1278_v6  ;;  %v4516_v26 = vmul.f32 -1.442695, %v1280_v12 }
 0x283   :  { %6091 = vpow2.f32 %v4514_v45 }
 0x284   :  { %6093 = vpow2.f32 %v4515_v10 }
 0x285   :  { %6095 = vpow2.f32 %v4516_v26 }
 0x286   :  { %6097 = vtanh.f32 %v1279_v55 }
 0x28d   :  { %v6092_v3 = vpop.eup %6091 }
 0x28e   :  { %v6094_v19 = vpop.eup %6093  ;;  %v1284_v59 = vadd.f32 1.0, %v6092_v3 }
 0x28f   :  { %v1290_v2 = vadd.f32 1.0, %v6094_v19  ;;  %v6096_v44 = vpop.eup %6095  ;;  %v8631_v19 = vmov 0 }
 0x290   :  { %6099 = vrcp.f32 %v1284_v59  ;;  %v6098_v47 = vpop.eup %6097  ;;  %v1297_v29 = vadd.f32 1.0, %v6096_v44  ;;  %v8632_v19 = vsel %vm7195_vm7, 4294967295, %v8631_v19 }
 0x291   :  { %6101 = vrcp.f32 %v1290_v2  ;;  %8633 = vst [vmem:[#allocation12_spill] sm:$0xff] %v8632_v19 }
 0x292   :  { %6103 = vrcp.f32 %v1297_v29 }
 0x29a   :  { %v6100_v52 = vpop.eup %6099 }
 0x29b   :  { %v6102_v31 = vpop.eup %6101  ;;  %v1301_v63 = vmul.f32 %v6100_v52, %v6098_v47 }
 0x29c   :  { %v1300_v6 = vmul.f32 %v6102_v31, %v1115_v34  ;;  %v6104_v55 = vpop.eup %6103 }
 0x29e   :  { %v1302_v2 = vadd.f32 %v1301_v63, %v1300_v6 }
 0x2a0   :  { %6105 = vtanh.f32 %v1302_v2  ;;  %v7201_v59 = vsel %vm7195_vm7, %v1302_v2, %v1115_v34 }
 0x2aa   :  { %v6106_v12 = vpop.eup %6105 }
 0x2ab   :  { %v1304_v45 = vmul.f32 %v6106_v12, %v6104_v55 }
 0x2ad   :  { %v7206_v15 = vsel %vm7195_vm7, %v1304_v45, %v7145_v16  ;;  %v1309_v10 = vsel %vm7195_vm7, %v1304_v45, 0.0  ;;  %v6391_v45 = vmov 5  }
 0x2ae   :  { %1311 = vst.msk [vmem:[#allocation3 + $0x8] sm:$0xff] %vm1116_vm4, %v1309_v10  ;;  %1393 = vmatmul.mubr.f32.vlgmr.msra.gmra.mrb[20].mxu0 %v7206_v15  ;;  %1464 = vmatmul.mubr.f32.vlgmr.msra.gmra.mrb[20].mxu1 %v7206_v15 }
 0x2af   :  { %1313 = vst.msk [vmem:[#allocation3 + $0x30] sm:$0xff] %vm1119_vm5, %v1309_v10  ;;  %5055 = vmatpush1.bf16.msra.mxu0 %v6573_v61  ;;  %5087 = vmatpush1.bf16.msra.mxu1 %v6582_v1 }
 0x2b0   :  { %5057 = vmatprep.subr.bf16.mxu0 %v6592_v4  ;;  %5089 = vmatprep.subr.bf16.mxu1 %v6601_v7 }
 0x2b1   :  { %1585 = vmatprep.mubr.f32.mxu0 %v8627_v60  ;;  %1656 = vmatprep.mubr.f32.mxu1 %v8627_v60 }
 0x2b3   :  { %5059 = vmatpush1.bf16.msra.mxu0 %v6613_v11  ;;  %5091 = vmatpush1.bf16.msra.mxu1 %v6623_v14 }
 0x2b4   :  { %5061 = vmatprep.subr.bf16.mxu0 %v6633_v17  ;;  %5093 = vmatprep.subr.bf16.mxu1 %v6642_v20 }
 0x2b7   :  { %5063 = vmatpush1.bf16.msra.mxu0 %v6654_v24  ;;  %5095 = vmatpush1.bf16.msra.mxu1 %v6664_v27 }
 0x2b8   :  { %5065 = vmatprep.subr.bf16.mxu0 %v6674_v30  ;;  %5097 = vmatprep.subr.bf16.mxu1 %v6683_v33 }
 0x2bb   :  { %5067 = vmatpush1.bf16.msra.mxu0 %v6695_v37  ;;  %5099 = vmatpush1.bf16.msra.mxu1 %v6705_v40 }
 0x2bc   :  { %5069 = vmatprep.subr.bf16.mxu0 %v6715_v43  ;;  %5101 = vmatprep.subr.bf16.mxu1 %v6724_v46 }
 0x2bf   :  { %5071 = vmatpush1.bf16.msra.mxu0 %v6736_v50  ;;  %5103 = vmatpush1.bf16.msra.mxu1 %v6746_v53 }
 0x2c0   :  { %5073 = vmatprep.subr.bf16.mxu0 %v6756_v58  ;;  %5105 = vmatprep.subr.bf16.mxu1 %v6765_v62 }
 0x2c3   :  { %5075 = vmatpush1.bf16.msra.mxu0 %v6777_v5  ;;  %5107 = vmatpush1.bf16.msra.mxu1 %v6787_v9 }
 0x2c4   :  { %5077 = vmatprep.subr.bf16.mxu0 %v6797_v13  ;;  %5109 = vmatprep.subr.bf16.mxu1 %v6806_v18 }
 0x2c7   :  { %5079 = vmatpush1.bf16.msra.mxu0 %v6818_v23  ;;  %5111 = vmatpush1.bf16.msra.mxu1 %v6828_v28 }
 0x2c8   :  { %5081 = vmatprep.subr.bf16.mxu0 %v6838_v32  ;;  %5113 = vmatprep.subr.bf16.mxu1 %v6847_v36 }
 0x2cb   :  { %5083 = vmatpush1.bf16.msra.mxu0 %v6853_v39  ;;  %5115 = vmatpush1.bf16.msra.mxu1 %v8628_v48 }
 0x2cc   :  { %5117 = vmatprep.subr.bf16.mxu0 %v8629_v0  ;;  %5149 = vmatprep.subr.bf16.mxu1 %v8630_v21 }
 0x381   :  { %v1394_v16 = vpop.f32.mrb[20].mxu0  ;;  %v1465_v26 = vpop.f32.mrb[20].mxu1 }
 0x382   :  { %v1470_v3 = vadd.f32 %v1394_v16, %v7014_v22  ;;  %v1472_v44 = vadd.f32 %v1465_v26, %v7022_v38  ;;  %v1396_v47 = vpop.f32.mrb[21].mxu0  ;;  %v1467_v52 = vpop.f32.mrb[21].mxu1 }
 0x383   :  { %v1471_v8 = vadd.f32 %v1396_v47, %v7026_v51  ;;  %v1473_v41 = vadd.f32 %v1467_v52, %v7039_v49  ;;  %v1498_v49 = vsel %vm72_vm0, 2, %v6391_v45 }
 0x384   :  { %v4517_v31 = vmul.f32 -1.442695, %v1470_v3  ;;  %vm7256_vm8 = vcmp.lt.s32.totalorder %v1498_v49, %v7130_v35  ;;  %v8634_v3 = vmov 0 }
 0x385   :  { %v4518_v34 = vmul.f32 -1.442695, %v1471_v8  ;;  %v4519_v63 = vmul.f32 -1.442695, %v1473_v41  ;;  %v8635_v3 = vsel %vm7256_vm8, 4294967295, %v8634_v3 }
 0x386   :  { %6107 = vpow2.f32 %v4517_v31  ;;  %8636 = vst [vmem:[#allocation10_spill] sm:$0xff] %v8635_v3 }
 0x387   :  { %6109 = vpow2.f32 %v4518_v34 }
 0x388   :  { %6111 = vpow2.f32 %v4519_v63  ;;  %v8637_v63 = vld [vmem:[#allocation17_spill] sm:$0xff] }
 0x389   :  { %6113 = vtanh.f32 %v1472_v44 }
 0x390   :  { %v6108_v29 = vpop.eup %6107 }
 0x391   :  { %v6110_v6 = vpop.eup %6109  ;;  %v1477_v2 = vadd.f32 1.0, %v6108_v29 }
 0x392   :  { %v1483_v55 = vadd.f32 1.0, %v6110_v6  ;;  %v6112_v22 = vpop.eup %6111  ;;  %v8638_v6 = vld [vmem:[#allocation19_spill] sm:$0xff] }
 0x393   :  { %6115 = vrcp.f32 %v1477_v2  ;;  %v6114_v38 = vpop.eup %6113  ;;  %v1490_v16 = vadd.f32 1.0, %v6112_v22 }
 0x394   :  { %6117 = vrcp.f32 %v1483_v55 }
 0x395   :  { %6119 = vrcp.f32 %v1490_v16 }
 0x39d   :  { %v6116_v12 = vpop.eup %6115 }
 0x39e   :  { %v6118_v51 = vpop.eup %6117  ;;  %v1494_v10 = vmul.f32 %v6116_v12, %v6114_v38  ;;  %v8639_v38 = vld [vmem:[#allocation20_spill] sm:$0xff] }
 0x39f   :  { %v1493_v26 = vmul.f32 %v6118_v51, %v7201_v59  ;;  %v6120_v52 = vpop.eup %6119 }
 0x3a1   :  { %v1495_v44 = vadd.f32 %v1494_v10, %v1493_v26 }
 0x3a3   :  { %6121 = vtanh.f32 %v1495_v44  ;;  %v7263_v47 = vsel %vm7256_vm8, %v1495_v44, %v7201_v59 }
 0x3ad   :  { %v6122_v8 = vpop.eup %6121 }
 0x3ae   :  { %v1497_v41 = vmul.f32 %v6122_v8, %v6120_v52 }
 0x3b0   :  { %v7268_v31 = vsel %vm7256_vm8, %v1497_v41, %v7206_v15  ;;  %v1502_v34 = vsel %vm7256_vm8, %v1497_v41, 0.0 }
 0x3b1   :  { %1504 = vst.msk [vmem:[#allocation3 + $0x10] sm:$0xff] %vm1116_vm4, %v1502_v34  ;;  %1586 = vmatmul.mubr.f32.vlgmr.msra.gmra.mrb[22].mxu0 %v7268_v31  ;;  %1657 = vmatmul.mubr.f32.vlgmr.msra.gmra.mrb[22].mxu1 %v7268_v31 }
 0x3b2   :  { %1506 = vst.msk [vmem:[#allocation3 + $0x28] sm:$0xff] %vm1119_vm5, %v1502_v34  ;;  %5119 = vmatpush1.bf16.msra.mxu0 %v6573_v61  ;;  %5151 = vmatpush1.bf16.msra.mxu1 %v6582_v1 }
 0x3b3   :  { %5121 = vmatprep.subr.bf16.mxu0 %v6592_v4  ;;  %5153 = vmatprep.subr.bf16.mxu1 %v6601_v7 }
 0x3b4   :  { %1776 = vmatprep.mubr.f32.mxu0 %v8627_v60  ;;  %1847 = vmatprep.mubr.f32.mxu1 %v8627_v60 }
 0x3b6   :  { %5123 = vmatpush1.bf16.msra.mxu0 %v6613_v11  ;;  %5155 = vmatpush1.bf16.msra.mxu1 %v6623_v14 }
 0x3b7   :  { %5125 = vmatprep.subr.bf16.mxu0 %v6633_v17  ;;  %5157 = vmatprep.subr.bf16.mxu1 %v6642_v20 }
 0x3ba   :  { %5127 = vmatpush1.bf16.msra.mxu0 %v6654_v24  ;;  %5159 = vmatpush1.bf16.msra.mxu1 %v6664_v27 }
 0x3bb   :  { %5129 = vmatprep.subr.bf16.mxu0 %v6674_v30  ;;  %5161 = vmatprep.subr.bf16.mxu1 %v6683_v33 }
 0x3be   :  { %5131 = vmatpush1.bf16.msra.mxu0 %v6695_v37  ;;  %5163 = vmatpush1.bf16.msra.mxu1 %v6705_v40 }
 0x3bf   :  { %5133 = vmatprep.subr.bf16.mxu0 %v6715_v43  ;;  %5165 = vmatprep.subr.bf16.mxu1 %v6724_v46 }
 0x3c2   :  { %5135 = vmatpush1.bf16.msra.mxu0 %v6736_v50  ;;  %5167 = vmatpush1.bf16.msra.mxu1 %v6746_v53 }
 0x3c3   :  { %5137 = vmatprep.subr.bf16.mxu0 %v6756_v58  ;;  %5169 = vmatprep.subr.bf16.mxu1 %v6765_v62 }
 0x3c6   :  { %5139 = vmatpush1.bf16.msra.mxu0 %v6777_v5  ;;  %5171 = vmatpush1.bf16.msra.mxu1 %v6787_v9 }
 0x3c7   :  { %5141 = vmatprep.subr.bf16.mxu0 %v6797_v13  ;;  %5173 = vmatprep.subr.bf16.mxu1 %v6806_v18 }
 0x3ca   :  { %5143 = vmatpush1.bf16.msra.mxu0 %v6818_v23  ;;  %5175 = vmatpush1.bf16.msra.mxu1 %v6828_v28 }
 0x3cb   :  { %5145 = vmatprep.subr.bf16.mxu0 %v6838_v32  ;;  %5177 = vmatprep.subr.bf16.mxu1 %v6847_v36 }
 0x3ce   :  { %5147 = vmatpush1.bf16.msra.mxu0 %v6853_v39  ;;  %5179 = vmatpush1.bf16.msra.mxu1 %v8628_v48 }
 0x3cf   :  { %5181 = vmatprep.subr.bf16.mxu0 %v8629_v0  ;;  %5213 = vmatprep.subr.bf16.mxu1 %v8630_v21 }
 0x484   :  { %v1587_v59 = vpop.f32.mrb[22].mxu0  ;;  %v1658_v15 = vpop.f32.mrb[22].mxu1 }
 0x485   :  { %v1663_v29 = vadd.f32 %v1587_v59, %v8637_v63  ;;  %v1665_v2 = vadd.f32 %v1658_v15, %v8638_v6  ;;  %v1589_v55 = vpop.f32.mrb[23].mxu0  ;;  %v1660_v22 = vpop.f32.mrb[23].mxu1  ;;  %v6392_v59 = vmov 4  }
 0x486   :  { %v1664_v12 = vadd.f32 %v1589_v55, %v8639_v38  ;;  %v1666_v45 = vadd.f32 %v1660_v22, %v7003_v57  ;;  %v1691_v57 = vsel %vm72_vm0, 3, %v6392_v59  ;;  %v8640_v55 = vmov 0  ;;  %v8646_v59 = vld [vmem:[#allocation23_spill] sm:$0xff] }
 0x487   :  { %v4520_v49 = vmul.f32 -1.442695, %v1663_v29  ;;  %vm7318_vm9 = vcmp.lt.s32.totalorder %v1691_v57, %v7130_v35 }
 0x488   :  { %v4521_v51 = vmul.f32 -1.442695, %v1664_v12  ;;  %v4522_v10 = vmul.f32 -1.442695, %v1666_v45  ;;  %v8641_v55 = vsel %vm7318_vm9, 4294967295, %v8640_v55 }
 0x489   :  { %6123 = vpow2.f32 %v4520_v49  ;;  %8642 = vst [vmem:[#allocation11_spill] sm:$0xff] %v8641_v55 }
 0x48a   :  { %6125 = vpow2.f32 %v4521_v51 }
 0x48b   :  { %6127 = vpow2.f32 %v4522_v10  ;;  %v8643_v10 = vld [vmem:[#allocation18_spill] sm:$0xff] }
 0x48c   :  { %6129 = vtanh.f32 %v1665_v2 }
 0x493   :  { %v6124_v16 = vpop.eup %6123 }
 0x494   :  { %v6126_v26 = vpop.eup %6125  ;;  %v1670_v44 = vadd.f32 1.0, %v6124_v16 }
 0x495   :  { %v1676_v52 = vadd.f32 1.0, %v6126_v26  ;;  %v6128_v8 = vpop.eup %6127  ;;  %v8644_v26 = vld [vmem:[#allocation21_spill] sm:$0xff] }
 0x496   :  { %6131 = vrcp.f32 %v1670_v44  ;;  %v6130_v41 = vpop.eup %6129  ;;  %v1683_v29 = vadd.f32 1.0, %v6128_v8 }
 0x497   :  { %6133 = vrcp.f32 %v1676_v52 }
 0x498   :  { %6135 = vrcp.f32 %v1683_v29 }
 0x4a0   :  { %v6132_v34 = vpop.eup %6131 }
 0x4a1   :  { %v6134_v15 = vpop.eup %6133  ;;  %v1687_v63 = vmul.f32 %v6132_v34, %v6130_v41  ;;  %v8645_v41 = vld [vmem:[#allocation22_spill] sm:$0xff] }
 0x4a2   :  { %v1686_v6 = vmul.f32 %v6134_v15, %v7263_v47  ;;  %v6136_v38 = vpop.eup %6135 }
 0x4a4   :  { %v1688_v2 = vadd.f32 %v1687_v63, %v1686_v6 }
 0x4a6   :  { %6137 = vtanh.f32 %v1688_v2  ;;  %v7325_v22 = vsel %vm7318_vm9, %v1688_v2, %v7263_v47 }
 0x4b0   :  { %v6138_v12 = vpop.eup %6137 }
 0x4b1   :  { %v1690_v45 = vmul.f32 %v6138_v12, %v6136_v38 }
 0x4b3   :  { %v7330_v49 = vsel %vm7318_vm9, %v1690_v45, %v7268_v31  ;;  %v1695_v51 = vsel %vm7318_vm9, %v1690_v45, 0.0 }
 0x4b4   :  { %1697 = vst.msk [vmem:[#allocation3 + $0x18] sm:$0xff] %vm1116_vm4, %v1695_v51  ;;  %1777 = vmatmul.mubr.f32.vlgmr.msra.gmra.mrb[24].mxu0 %v7330_v49  ;;  %1848 = vmatmul.mubr.f32.vlgmr.msra.gmra.mrb[24].mxu1 %v7330_v49 }
 0x4b5   :  { %1699 = vst.msk [vmem:[#allocation3 + $0x20] sm:$0xff] %vm1119_vm5, %v1695_v51  ;;  %5183 = vmatpush1.bf16.msra.mxu0 %v6573_v61  ;;  %5215 = vmatpush1.bf16.msra.mxu1 %v6582_v1 }
 0x4b6   :  { %5185 = vmatprep.subr.bf16.mxu0 %v6592_v4  ;;  %5217 = vmatprep.subr.bf16.mxu1 %v6601_v7 }
 0x4b7   :  { %1965 = vmatprep.mubr.f32.mxu0 %v8627_v60  ;;  %2036 = vmatprep.mubr.f32.mxu1 %v8627_v60 }
 0x4b9   :  { %5187 = vmatpush1.bf16.msra.mxu0 %v6613_v11  ;;  %5219 = vmatpush1.bf16.msra.mxu1 %v6623_v14 }
 0x4ba   :  { %5189 = vmatprep.subr.bf16.mxu0 %v6633_v17  ;;  %5221 = vmatprep.subr.bf16.mxu1 %v6642_v20 }
 0x4bd   :  { %5191 = vmatpush1.bf16.msra.mxu0 %v6654_v24  ;;  %5223 = vmatpush1.bf16.msra.mxu1 %v6664_v27 }
 0x4be   :  { %5193 = vmatprep.subr.bf16.mxu0 %v6674_v30  ;;  %5225 = vmatprep.subr.bf16.mxu1 %v6683_v33 }
 0x4c1   :  { %5195 = vmatpush1.bf16.msra.mxu0 %v6695_v37  ;;  %5227 = vmatpush1.bf16.msra.mxu1 %v6705_v40 }
 0x4c2   :  { %5197 = vmatprep.subr.bf16.mxu0 %v6715_v43  ;;  %5229 = vmatprep.subr.bf16.mxu1 %v6724_v46 }
 0x4c5   :  { %5199 = vmatpush1.bf16.msra.mxu0 %v6736_v50  ;;  %5231 = vmatpush1.bf16.msra.mxu1 %v6746_v53 }
 0x4c6   :  { %5201 = vmatprep.subr.bf16.mxu0 %v6756_v58  ;;  %5233 = vmatprep.subr.bf16.mxu1 %v6765_v62 }
 0x4c9   :  { %5203 = vmatpush1.bf16.msra.mxu0 %v6777_v5  ;;  %5235 = vmatpush1.bf16.msra.mxu1 %v6787_v9 }
 0x4ca   :  { %5205 = vmatprep.subr.bf16.mxu0 %v6797_v13  ;;  %5237 = vmatprep.subr.bf16.mxu1 %v6806_v18 }
 0x4cd   :  { %5207 = vmatpush1.bf16.msra.mxu0 %v6818_v23  ;;  %5239 = vmatpush1.bf16.msra.mxu1 %v6828_v28 }
 0x4ce   :  { %5209 = vmatprep.subr.bf16.mxu0 %v6838_v32  ;;  %5241 = vmatprep.subr.bf16.mxu1 %v6847_v36 }
 0x4d1   :  { %5211 = vmatpush1.bf16.msra.mxu0 %v6853_v39  ;;  %5243 = vmatpush1.bf16.msra.mxu1 %v8628_v48 }
 0x4d2   :  { %5245 = vmatprep.subr.bf16.mxu0 %v8629_v0  ;;  %5277 = vmatprep.subr.bf16.mxu1 %v8630_v21 }
 0x587   :  { %v1778_v47 = vpop.f32.mrb[24].mxu0  ;;  %v1849_v31 = vpop.f32.mrb[24].mxu1 }
 0x588   :  { %v1854_v16 = vadd.f32 %v1778_v47, %v8643_v10  ;;  %v1856_v44 = vadd.f32 %v1849_v31, %v8644_v26  ;;  %v1780_v52 = vpop.f32.mrb[25].mxu0  ;;  %v1851_v8 = vpop.f32.mrb[25].mxu1  ;;  %v6393_v31 = vmov 3  }
 0x589   :  { %v1855_v34 = vadd.f32 %v1780_v52, %v8645_v41  ;;  %v1857_v57 = vadd.f32 %v1851_v8, %v8646_v59  ;;  %v1882_v10 = vsel %vm72_vm0, 4, %v6393_v31  ;;  %v8647_v41 = vmov 0  ;;  %v8652_v31 = vld [vmem:[#allocation26_spill] sm:$0xff] }
 0x58a   :  { %v4523_v15 = vmul.f32 -1.442695, %v1854_v16  ;;  %vm7380_vm10 = vcmp.lt.s32.totalorder %v1882_v10, %v7130_v35 }
 0x58b   :  { %v4524_v63 = vmul.f32 -1.442695, %v1855_v34  ;;  %v4525_v29 = vmul.f32 -1.442695, %v1857_v57  ;;  %v8648_v41 = vsel %vm7380_vm10, 4294967295, %v8647_v41 }
 0x58c   :  { %6139 = vpow2.f32 %v4523_v15  ;;  %8649 = vst [vmem:[#allocation17_spill] sm:$0xff] %v8648_v41 }
 0x58d   :  { %6141 = vpow2.f32 %v4524_v63 }
 0x58e   :  { %6143 = vpow2.f32 %v4525_v29 }
 0x58f   :  { %6145 = vtanh.f32 %v1856_v44 }
 0x596   :  { %v6140_v6 = vpop.eup %6139 }
 0x597   :  { %v6142_v2 = vpop.eup %6141  ;;  %v1861_v38 = vadd.f32 1.0, %v6140_v6  ;;  %v8650_v6 = vld [vmem:[#allocation24_spill] sm:$0xff] }
 0x598   :  { %v1867_v12 = vadd.f32 1.0, %v6142_v2  ;;  %v6144_v45 = vpop.eup %6143 }
 0x599   :  { %6147 = vrcp.f32 %v1861_v38  ;;  %v6146_v51 = vpop.eup %6145  ;;  %v1874_v52 = vadd.f32 1.0, %v6144_v45 }
 0x59a   :  { %6149 = vrcp.f32 %v1867_v12 }
 0x59b   :  { %6151 = vrcp.f32 %v1874_v52 }
 0x5a3   :  { %v6148_v47 = vpop.eup %6147 }
 0x5a4   :  { %v6150_v16 = vpop.eup %6149  ;;  %v1878_v26 = vmul.f32 %v6148_v47, %v6146_v51  ;;  %v8651_v51 = vld [vmem:[#allocation25_spill] sm:$0xff] }
 0x5a5   :  { %v1877_v8 = vmul.f32 %v6150_v16, %v7325_v22  ;;  %v6152_v59 = vpop.eup %6151 }
 0x5a7   :  { %v1879_v44 = vadd.f32 %v1878_v26, %v1877_v8 }
 0x5a9   :  { %6153 = vtanh.f32 %v1879_v44  ;;  %v7387_v34 = vsel %vm7380_vm10, %v1879_v44, %v7325_v22 }
 0x5b3   :  { %v6154_v57 = vpop.eup %6153 }
 0x5b4   :  { %v1881_v15 = vmul.f32 %v6154_v57, %v6152_v59 }
 0x5b6   :  { %v7392_v63 = vsel %vm7380_vm10, %v1881_v15, %v7330_v49  ;;  %v1886_v29 = vsel %vm7380_vm10, %v1881_v15, 0.0  ;;  %v6394_v15 = vmov 2  }
 0x5b7   :  { %1887 = vst.msk [vmem:[#allocation3 + $0x20] sm:$0xff] %vm1116_vm4, %v1886_v29  ;;  %1966 = vmatmul.mubr.f32.vlgmr.msra.gmra.mrb[26].mxu0 %v7392_v63  ;;  %2037 = vmatmul.mubr.f32.vlgmr.msra.gmra.mrb[26].mxu1 %v7392_v63 }
 0x5b8   :  { %1888 = vst.msk [vmem:[#allocation3 + $0x18] sm:$0xff] %vm1119_vm5, %v1886_v29  ;;  %5247 = vmatpush1.bf16.msra.mxu0 %v6573_v61  ;;  %5279 = vmatpush1.bf16.msra.mxu1 %v6582_v1  ;;  %v2071_v29 = vsel %vm72_vm0, 5, %v6394_v15 }
 0x5b9   :  { %5249 = vmatprep.subr.bf16.mxu0 %v6592_v4  ;;  %5281 = vmatprep.subr.bf16.mxu1 %v6601_v7  ;;  %vm7442_vm11 = vcmp.lt.s32.totalorder %v2071_v29, %v7130_v35  ;;  %v2464_v29 = vld [vmem:[%s8549_s5 + $0x10] sm:$0xff] }
 0x5ba   :  { %2154 = vmatprep.mubr.f32.mxu0 %v8627_v60  ;;  %2225 = vmatprep.mubr.f32.mxu1 %v8627_v60 }
 0x5bc   :  { %5251 = vmatpush1.bf16.msra.mxu0 %v6613_v11  ;;  %5283 = vmatpush1.bf16.msra.mxu1 %v6623_v14 }
 0x5bd   :  { %5253 = vmatprep.subr.bf16.mxu0 %v6633_v17  ;;  %5285 = vmatprep.subr.bf16.mxu1 %v6642_v20 }
 0x5c0   :  { %5255 = vmatpush1.bf16.msra.mxu0 %v6654_v24  ;;  %5287 = vmatpush1.bf16.msra.mxu1 %v6664_v27 }
 0x5c1   :  { %5257 = vmatprep.subr.bf16.mxu0 %v6674_v30  ;;  %5289 = vmatprep.subr.bf16.mxu1 %v6683_v33 }
 0x5c4   :  { %5259 = vmatpush1.bf16.msra.mxu0 %v6695_v37  ;;  %5291 = vmatpush1.bf16.msra.mxu1 %v6705_v40 }
 0x5c5   :  { %5261 = vmatprep.subr.bf16.mxu0 %v6715_v43  ;;  %5293 = vmatprep.subr.bf16.mxu1 %v6724_v46 }
 0x5c8   :  { %5263 = vmatpush1.bf16.msra.mxu0 %v6736_v50  ;;  %5295 = vmatpush1.bf16.msra.mxu1 %v6746_v53 }
 0x5c9   :  { %5265 = vmatprep.subr.bf16.mxu0 %v6756_v58  ;;  %5297 = vmatprep.subr.bf16.mxu1 %v6765_v62 }
 0x5cc   :  { %5267 = vmatpush1.bf16.msra.mxu0 %v6777_v5  ;;  %5299 = vmatpush1.bf16.msra.mxu1 %v6787_v9 }
 0x5cd   :  { %5269 = vmatprep.subr.bf16.mxu0 %v6797_v13  ;;  %5301 = vmatprep.subr.bf16.mxu1 %v6806_v18 }
 0x5d0   :  { %5271 = vmatpush1.bf16.msra.mxu0 %v6818_v23  ;;  %5303 = vmatpush1.bf16.msra.mxu1 %v6828_v28 }
 0x5d1   :  { %5273 = vmatprep.subr.bf16.mxu0 %v6838_v32  ;;  %5305 = vmatprep.subr.bf16.mxu1 %v6847_v36 }
 0x5d4   :  { %5275 = vmatpush1.bf16.msra.mxu0 %v6853_v39  ;;  %5307 = vmatpush1.bf16.msra.mxu1 %v8628_v48 }
 0x5d5   :  { %5309 = vmatprep.subr.bf16.mxu0 %v8629_v0  ;;  %5341 = vmatprep.subr.bf16.mxu1 %v8630_v21 }
 0x68a   :  { %v1967_v22 = vpop.f32.mrb[26].mxu0  ;;  %v2038_v49 = vpop.f32.mrb[26].mxu1 }
 0x68b   :  { %v2043_v2 = vadd.f32 %v1967_v22, %v8650_v6  ;;  %v2045_v38 = vadd.f32 %v2038_v49, %v7030_v54  ;;  %v1969_v12 = vpop.f32.mrb[27].mxu0  ;;  %v2040_v45 = vpop.f32.mrb[27].mxu1 }
 0x68c   :  { %v2044_v47 = vadd.f32 %v1969_v12, %v8651_v51  ;;  %v2046_v10 = vadd.f32 %v2040_v45, %v8652_v31  ;;  %v8653_v12 = vmov 0 }
 0x68d   :  { %v4526_v16 = vmul.f32 -1.442695, %v2043_v2  ;;  %v8654_v12 = vsel %vm7442_vm11, 4294967295, %v8653_v12 }
 0x68e   :  { %v4527_v26 = vmul.f32 -1.442695, %v2044_v47  ;;  %v4528_v52 = vmul.f32 -1.442695, %v2046_v10  ;;  %8655 = vst [vmem:[#allocation19_spill] sm:$0xff] %v8654_v12 }
 0x68f   :  { %6155 = vpow2.f32 %v4526_v16 }
 0x690   :  { %6157 = vpow2.f32 %v4527_v26 }
 0x691   :  { %6159 = vpow2.f32 %v4528_v52  ;;  %v2463_v52 = vld [vmem:[%s8549_s5 + $0x8] sm:$0xff] }
 0x692   :  { %6161 = vtanh.f32 %v2045_v38 }
 0x699   :  { %v6156_v0 = vpop.eup %6155 }
 0x69a   :  { %v6158_v8 = vpop.eup %6157  ;;  %v2050_v21 = vadd.f32 1.0, %v6156_v0  ;;  %v2467_v0 = vld [vmem:[%s8549_s5 + $0x28] sm:$0xff] }
 0x69b   :  { %v2056_v44 = vadd.f32 1.0, %v6158_v8  ;;  %v6160_v54 = vpop.eup %6159  ;;  %v2465_v8 = vld [vmem:[%s8549_s5 + $0x18] sm:$0xff] }
 0x69c   :  { %6163 = vrcp.f32 %v2050_v21  ;;  %v6162_v59 = vpop.eup %6161  ;;  %v2063_v6 = vadd.f32 1.0, %v6160_v54  ;;  %v5372_v21 = vpack.c.bf16 %v2467_v0, %v2463_v52  ;;  %v2462_v54 = vld [vmem:[%s8549_s5] sm:$0xff]  ;;  %v2501_v52 = vld [vmem:[%s8549_s5 + $0x138] sm:$0xff] }
 0x69d   :  { %6165 = vrcp.f32 %v2056_v44  ;;  %v2469_v44 = vld [vmem:[%s8549_s5 + $0x38] sm:$0xff]  ;;  %v2494_v0 = vld [vmem:[%s8549_s5 + $0x100] sm:$0xff] }
 0x69e   :  { %6167 = vrcp.f32 %v2063_v6  ;;  %v2471_v6 = vld [vmem:[%s8549_s5 + $0x48] sm:$0xff] }
 0x6a6   :  { %v6164_v57 = vpop.eup %6163 }
 0x6a7   :  { %v6166_v22 = vpop.eup %6165  ;;  %v2067_v49 = vmul.f32 %v6164_v57, %v6162_v59  ;;  %v2466_v59 = vld [vmem:[%s8549_s5 + $0x20] sm:$0xff]  ;;  %v5404_v57 = vpack.c.bf16 %v2469_v44, %v2465_v8 }
 0x6a8   :  { %v2066_v2 = vmul.f32 %v6166_v22, %v7387_v34  ;;  %v6168_v51 = vpop.eup %6167  ;;  %v5374_v15 = vpack.c.bf16 %v2466_v59, %v2462_v54  ;;  %v2468_v22 = vld [vmem:[%s8549_s5 + $0x30] sm:$0xff]  ;;  %v2498_v8 = vld [vmem:[%s8549_s5 + $0x120] sm:$0xff] }
 0x6a9   :  { %v5390_v44 = vpack.c.bf16 %v2498_v8, %v2494_v0  ;;  %v2496_v54 = vld [vmem:[%s8549_s5 + $0x110] sm:$0xff]  ;;  %v8665_v8 = vld [vmem:[#allocation31_spill] sm:$0xff] }
 0x6aa   :  { %v2068_v38 = vadd.f32 %v2067_v49, %v2066_v2  ;;  %v5406_v49 = vpack.c.bf16 %v2468_v22, %v2464_v29  ;;  %v2475_v2 = vld [vmem:[%s8549_s5 + $0x68] sm:$0xff]  ;;  %v2500_v59 = vld [vmem:[%s8549_s5 + $0x130] sm:$0xff]  ;;  %v2505_v22 = vld [vmem:[%s8549_s5 + $0x158] sm:$0xff] }
 0x6ab   :  { %v2507_v29 = vld [vmem:[%s8549_s5 + $0x168] sm:$0xff] }
 0x6ac   :  { %6169 = vtanh.f32 %v2068_v38  ;;  %v7449_v45 = vsel %vm7442_vm11, %v2068_v38, %v7387_v34  ;;  %v2473_v38 = vld [vmem:[%s8549_s5 + $0x58] sm:$0xff] }
 0x6b6   :  { %v6170_v47 = vpop.eup %6169 }
 0x6b7   :  { %v2070_v31 = vmul.f32 %v6170_v47, %v6168_v51  ;;  %v5376_v51 = vpack.c.bf16 %v2475_v2, %v2471_v6  ;;  %v2477_v47 = vld [vmem:[%s8549_s5 + $0x78] sm:$0xff]  ;;  %v2502_v2 = vld [vmem:[%s8549_s5 + $0x140] sm:$0xff] }
 0x6b8   :  { %v2509_v6 = vld [vmem:[%s8549_s5 + $0x178] sm:$0xff] }
 0x6b9   :  { %v7454_v10 = vsel %vm7442_vm11, %v2070_v31, %v7392_v63  ;;  %v2075_v16 = vsel %vm7442_vm11, %v2070_v31, 0.0  ;;  %v2470_v31 = vld [vmem:[%s8549_s5 + $0x40] sm:$0xff] }
 0x6ba   :  { %2076 = vst.msk [vmem:[#allocation3 + $0x28] sm:$0xff] %vm1116_vm4, %v2075_v16  ;;  %2155 = vmatmul.mubr.f32.vlgmr.msra.gmra.mrb[28].mxu0 %v7454_v10  ;;  %2226 = vmatmul.mubr.f32.vlgmr.msra.gmra.mrb[28].mxu1 %v7454_v10 }
 0x6bb   :  { %2077 = vst.msk [vmem:[#allocation3 + $0x10] sm:$0xff] %vm1119_vm5, %v2075_v16  ;;  %5311 = vmatpush1.bf16.msra.mxu0 %v6573_v61  ;;  %5343 = vmatpush1.bf16.msra.mxu1 %v6582_v1  ;;  %v5408_v16 = vpack.c.bf16 %v2477_v47, %v2473_v38  ;;  %v2506_v38 = vld [vmem:[%s8549_s5 + $0x160] sm:$0xff] }
 0x6bc   :  { %5313 = vmatprep.subr.bf16.mxu0 %v6592_v4  ;;  %5345 = vmatprep.subr.bf16.mxu1 %v6601_v7  ;;  %v8656_v4 = vld [vmem:[#allocation27_spill] sm:$0xff]  ;;  %v5394_v47 = vpack.c.bf16 %v2506_v38, %v2502_v2 }
 0x6bd   :  { %2343 = vmatprep.mubr.f32.mxu0 %v8627_v60  ;;  %2414 = vmatprep.mubr.f32.mxu1 %v8627_v60 }
 0x6bf   :  { %5315 = vmatpush1.bf16.msra.mxu0 %v6613_v11  ;;  %5347 = vmatpush1.bf16.msra.mxu1 %v6623_v14 }
 0x6c0   :  { %5317 = vmatprep.subr.bf16.mxu0 %v6633_v17  ;;  %5349 = vmatprep.subr.bf16.mxu1 %v6642_v20  ;;  %v8657_v20 = vld [vmem:[#allocation28_spill] sm:$0xff] }
 0x6c3   :  { %5319 = vmatpush1.bf16.msra.mxu0 %v6654_v24  ;;  %5351 = vmatpush1.bf16.msra.mxu1 %v6664_v27  ;;  %v8658_v27 = vld [vmem:[#allocation29_spill] sm:$0xff] }
 0x6c4   :  { %5321 = vmatprep.subr.bf16.mxu0 %v6674_v30  ;;  %5353 = vmatprep.subr.bf16.mxu1 %v6683_v33 }
 0x6c7   :  { %5323 = vmatpush1.bf16.msra.mxu0 %v6695_v37  ;;  %5355 = vmatpush1.bf16.msra.mxu1 %v6705_v40 }
 0x6c8   :  { %5325 = vmatprep.subr.bf16.mxu0 %v6715_v43  ;;  %5357 = vmatprep.subr.bf16.mxu1 %v6724_v46 }
 0x6cb   :  { %5327 = vmatpush1.bf16.msra.mxu0 %v6736_v50  ;;  %5359 = vmatpush1.bf16.msra.mxu1 %v6746_v53 }
 0x6cc   :  { %5329 = vmatprep.subr.bf16.mxu0 %v6756_v58  ;;  %5361 = vmatprep.subr.bf16.mxu1 %v6765_v62 }
 0x6cf   :  { %5331 = vmatpush1.bf16.msra.mxu0 %v6777_v5  ;;  %5363 = vmatpush1.bf16.msra.mxu1 %v6787_v9  ;;  %v6395_v9 = vmov 1  }
 0x6d0   :  { %5333 = vmatprep.subr.bf16.mxu0 %v6797_v13  ;;  %5365 = vmatprep.subr.bf16.mxu1 %v6806_v18  ;;  %v2260_v13 = vsel %vm72_vm0, 6, %v6395_v9  ;;  %v2486_v9 = vld [vmem:[%s8549_s5 + $0xc0] sm:$0xff] }
 0x6d1   :  { %vm7502_vm12 = vcmp.lt.s32.totalorder %v2260_v13, %v7130_v35  ;;  %v2490_v13 = vld [vmem:[%s8549_s5 + $0xe0] sm:$0xff] }
 0x6d3   :  { %5335 = vmatpush1.bf16.msra.mxu0 %v6818_v23  ;;  %5367 = vmatpush1.bf16.msra.mxu1 %v6828_v28 }
 0x6d4   :  { %5337 = vmatprep.subr.bf16.mxu0 %v6838_v32  ;;  %5369 = vmatprep.subr.bf16.mxu1 %v6847_v36  ;;  %v8659_v36 = vmov 0 }
 0x6d5   :  { %v8660_v36 = vsel %vm7502_vm12, 4294967295, %v8659_v36 }
 0x6d6   :  { %8661 = vst [vmem:[#allocation20_spill] sm:$0xff] %v8660_v36 }
 0x6d7   :  { %5339 = vmatpush1.bf16.msra.mxu0 %v6853_v39  ;;  %5371 = vmatpush1.bf16.msra.mxu1 %v8628_v48 }
 0x6d8   :  { %5373 = vmatprep.subr.bf16.mxu0 %v5372_v21  ;;  %5405 = vmatprep.subr.bf16.mxu1 %v5404_v57  ;;  %v5422_v57 = vpack.c.bf16 %v2500_v59, %v2496_v54  ;;  %v8666_v59 = vld [vmem:[#allocation32_spill] sm:$0xff] }
 0x78d   :  { %v2156_v61 = vpop.f32.mrb[28].mxu0  ;;  %v2227_v1 = vpop.f32.mrb[28].mxu1 }
 0x78e   :  { %v2232_v7 = vadd.f32 %v2156_v61, %v8656_v4  ;;  %v2234_v11 = vadd.f32 %v2227_v1, %v7071_v42  ;;  %v2158_v14 = vpop.f32.mrb[29].mxu0  ;;  %v2229_v17 = vpop.f32.mrb[29].mxu1  ;;  %v2472_v1 = vld [vmem:[%s8549_s5 + $0x50] sm:$0xff] }
 0x78f   :  { %v2233_v24 = vadd.f32 %v2158_v14, %v8657_v20  ;;  %v2235_v30 = vadd.f32 %v2229_v17, %v8658_v27  ;;  %v2476_v4 = vld [vmem:[%s8549_s5 + $0x70] sm:$0xff]  ;;  %v2483_v14 = vld [vmem:[%s8549_s5 + $0xa8] sm:$0xff]  ;;  %v2481_v17 = vld [vmem:[%s8549_s5 + $0x98] sm:$0xff] }
 0x790   :  { %v4529_v33 = vmul.f32 -1.442695, %v2232_v7  ;;  %v5410_v7 = vpack.c.bf16 %v2476_v4, %v2472_v1  ;;  %v2478_v27 = vld [vmem:[%s8549_s5 + $0x80] sm:$0xff]  ;;  %v2515_v1 = vld [vmem:[%s8549_s5 + $0x1a8] sm:$0xff]  ;;  %v2513_v4 = vld [vmem:[%s8549_s5 + $0x198] sm:$0xff] }
 0x791   :  { %v4530_v37 = vmul.f32 -1.442695, %v2233_v24  ;;  %v4531_v40 = vmul.f32 -1.442695, %v2235_v30  ;;  %v2485_v24 = vld [vmem:[%s8549_s5 + $0xb8] sm:$0xff]  ;;  %v2482_v30 = vld [vmem:[%s8549_s5 + $0xa0] sm:$0xff] }
 0x792   :  { %6171 = vpow2.f32 %v4529_v33  ;;  %v5412_v33 = vpack.c.bf16 %v2485_v24, %v2481_v17  ;;  %v2514_v17 = vld [vmem:[%s8549_s5 + $0x1a0] sm:$0xff] }
 0x793   :  { %6173 = vpow2.f32 %v4530_v37  ;;  %v5382_v37 = vpack.c.bf16 %v2482_v30, %v2478_v27  ;;  %v2512_v27 = vld [vmem:[%s8549_s5 + $0x190] sm:$0xff] }
 0x794   :  { %6175 = vpow2.f32 %v4531_v40  ;;  %v2480_v40 = vld [vmem:[%s8549_s5 + $0x90] sm:$0xff] }
 0x795   :  { %6177 = vtanh.f32 %v2234_v11  ;;  %v2479_v11 = vld [vmem:[%s8549_s5 + $0x88] sm:$0xff]  ;;  %v2516_v30 = vld [vmem:[%s8549_s5 + $0x1b0] sm:$0xff] }
 0x796   :  { %v5380_v20 = vpack.c.bf16 %v2483_v14, %v2479_v11  ;;  %v2517_v11 = vld [vmem:[%s8549_s5 + $0x1b8] sm:$0xff]  ;;  %v2510_v14 = vld [vmem:[%s8549_s5 + $0x180] sm:$0xff] }
 0x797   :  { %v5398_v24 = vpack.c.bf16 %v2514_v17, %v2510_v14  ;;  %v6396_v14 = vmov 0  }
 0x798   :  { %v7731_v17 = vsel %vm72_vm0, 7, %v6396_v14  ;;  %v2845_v14 = vld [vmem:[#allocation6 + $0x138] sm:$0xff] }
 0x799   :  { %8668 = vst [vmem:[#allocation22_spill] sm:$0xff] %v7731_v17 }
 0x79c   :  { %v6172_v43 = vpop.eup %6171 }
 0x79d   :  { %v6174_v46 = vpop.eup %6173  ;;  %v2239_v50 = vadd.f32 1.0, %v6172_v43  ;;  %v2484_v43 = vld [vmem:[%s8549_s5 + $0xb0] sm:$0xff] }
 0x79e   :  { %v2245_v53 = vadd.f32 1.0, %v6174_v46  ;;  %v6176_v58 = vpop.eup %6175  ;;  %v5414_v46 = vpack.c.bf16 %v2484_v43, %v2480_v40  ;;  %v2523_v40 = vld [vmem:[%s8549_s5 + $0x1e8] sm:$0xff]  ;;  %v2521_v43 = vld [vmem:[%s8549_s5 + $0x1d8] sm:$0xff] }
 0x79f   :  { %6179 = vrcp.f32 %v2239_v50  ;;  %v6178_v62 = vpop.eup %6177  ;;  %v2252_v28 = vadd.f32 1.0, %v6176_v58  ;;  %v2487_v50 = vld [vmem:[%s8549_s5 + $0xc8] sm:$0xff]  ;;  %v2489_v58 = vld [vmem:[%s8549_s5 + $0xd8] sm:$0xff] }
 0x7a0   :  { %6181 = vrcp.f32 %v2245_v53  ;;  %v2491_v53 = vld [vmem:[%s8549_s5 + $0xe8] sm:$0xff] }
 0x7a1   :  { %6183 = vrcp.f32 %v2252_v28  ;;  %v2488_v28 = vld [vmem:[%s8549_s5 + $0xd0] sm:$0xff] }
 0x7a9   :  { %v6180_v5 = vpop.eup %6179 }
 0x7aa   :  { %v6182_v18 = vpop.eup %6181  ;;  %v2256_v23 = vmul.f32 %v6180_v5, %v6178_v62  ;;  %v5384_v62 = vpack.c.bf16 %v2491_v53, %v2487_v50  ;;  %v2493_v5 = vld [vmem:[%s8549_s5 + $0xf8] sm:$0xff] }
 0x7ab   :  { %v2255_v32 = vmul.f32 %v6182_v18, %v7449_v45  ;;  %v6184_v48 = vpop.eup %6183  ;;  %v5416_v18 = vpack.c.bf16 %v2493_v5, %v2489_v58  ;;  %v2518_v58 = vld [vmem:[%s8549_s5 + $0x1c0] sm:$0xff]  ;;  %v2520_v5 = vld [vmem:[%s8549_s5 + $0x1d0] sm:$0xff] }
 0x7ad   :  { %v7506_v39 = vadd.f32 %v2256_v23, %v2255_v32  ;;  %v5386_v23 = vpack.c.bf16 %v2490_v13, %v2486_v9  ;;  %v2492_v32 = vld [vmem:[%s8549_s5 + $0xf0] sm:$0xff] }
 0x7ae   :  { %v2524_v13 = vld [vmem:[%s8549_s5 + $0x1f0] sm:$0xff] }
 0x7af   :  { %6185 = vtanh.f32 %v7506_v39  ;;  %v2263_v42 = vsel %vm7502_vm12, %v7506_v39, %v7449_v45 }
 0x7b9   :  { %v6186_v34 = vpop.eup %6185 }
 0x7ba   :  { %v2259_v63 = vmul.f32 %v6186_v34, %v6184_v48  ;;  %v5418_v48 = vpack.c.bf16 %v2492_v32, %v2488_v28  ;;  %v2495_v34 = vld [vmem:[%s8549_s5 + $0x108] sm:$0xff]  ;;  %v2809_v32 = vld [vmem:[#allocation6 + $0x18] sm:$0xff] }
 0x7bb   :  { %v2811_v28 = vld [vmem:[#allocation6 + $0x28] sm:$0xff] }
 0x7bc   :  { %v2262_v35 = vsel %vm7502_vm12, %v2259_v63, %v7454_v10  ;;  %v2264_v26 = vsel %vm7502_vm12, %v2259_v63, 0.0  ;;  %v2474_v10 = vld [vmem:[%s8549_s5 + $0x60] sm:$0xff]  ;;  %v2499_v63 = vld [vmem:[%s8549_s5 + $0x128] sm:$0xff] }
 0x7bd   :  { %2265 = vst.msk [vmem:[#allocation3 + $0x30] sm:$0xff] %vm1116_vm4, %v2264_v26  ;;  %2344 = vmatmul.mubr.f32.vlgmr.msra.gmra.mrb[30].mxu0 %v2262_v35  ;;  %2415 = vmatmul.mubr.f32.vlgmr.msra.gmra.mrb[30].mxu1 %v2262_v35  ;;  %v5378_v61 = vpack.c.bf16 %v2474_v10, %v2470_v31  ;;  %v2497_v35 = vld [vmem:[%s8549_s5 + $0x118] sm:$0xff]  ;;  %v2504_v31 = vld [vmem:[%s8549_s5 + $0x150] sm:$0xff] }
 0x7be   :  { %2266 = vst.msk [vmem:[#allocation3 + $0x8] sm:$0xff] %vm1119_vm5, %v2264_v26  ;;  %2612 = vmatprep.mubr.f32.mxu0 %v8627_v60  ;;  %2725 = vmatprep.mubr.f32.mxu1 %v8627_v60  ;;  %v5388_v26 = vpack.c.bf16 %v2499_v63, %v2495_v34  ;;  %v5420_v21 = vpack.c.bf16 %v2501_v52, %v2497_v35  ;;  %v2508_v10 = vld [vmem:[%s8549_s5 + $0x170] sm:$0xff]  ;;  %v2813_v34 = vld [vmem:[#allocation6 + $0x38] sm:$0xff]  ;;  %v8664_v52 = vld [vmem:[#allocation30_spill] sm:$0xff] }
 0x7bf   :  { %5375 = vmatpush1.bf16.msra.mxu0 %v5374_v15  ;;  %5407 = vmatpush1.bf16.msra.mxu1 %v5406_v49  ;;  %v2503_v15 = vld [vmem:[%s8549_s5 + $0x148] sm:$0xff]  ;;  %v7716_v63 = vpack.c.bf16 %v2813_v34, %v2809_v32 }
 0x7c0   :  { %5377 = vmatprep.subr.bf16.mxu0 %v5376_v51  ;;  %5409 = vmatprep.subr.bf16.mxu1 %v5408_v16  ;;  %v5392_v49 = vpack.c.bf16 %v2507_v29, %v2503_v15  ;;  %v5424_v51 = vpack.c.bf16 %v2509_v6, %v2505_v22  ;;  %v5426_v16 = vpack.c.bf16 %v2508_v10, %v2504_v31  ;;  %v8667_v15 = vld [vmem:[#allocation33_spill] sm:$0xff]  ;;  %v2823_v32 = vld [vmem:[#allocation6 + $0x88] sm:$0xff] }
 0x7c1   :  { %8663 = vst [vmem:[#allocation21_spill] sm:$0xff] %v7716_v63  ;;  %v2827_v34 = vld [vmem:[#allocation6 + $0xa8] sm:$0xff] }
 0x7c3   :  { %5379 = vmatpush1.bf16.msra.mxu0 %v5378_v61  ;;  %5411 = vmatpush1.bf16.msra.mxu1 %v5410_v7  ;;  %v2511_v61 = vld [vmem:[%s8549_s5 + $0x188] sm:$0xff] }
 0x7c4   :  { %5381 = vmatprep.subr.bf16.mxu0 %v5380_v20  ;;  %5413 = vmatprep.subr.bf16.mxu1 %v5412_v33  ;;  %v5396_v7 = vpack.c.bf16 %v2515_v1, %v2511_v61  ;;  %v5428_v20 = vpack.c.bf16 %v2517_v11, %v2513_v4  ;;  %v2519_v33 = vld [vmem:[%s8549_s5 + $0x1c8] sm:$0xff] }
 0x7c5   :  { %v5400_v50 = vpack.c.bf16 %v2523_v40, %v2519_v33  ;;  %v2808_v33 = vld [vmem:[#allocation6 + $0x10] sm:$0xff]  ;;  %v2815_v40 = vld [vmem:[#allocation6 + $0x48] sm:$0xff] }
 0x7c7   :  { %5383 = vmatpush1.bf16.msra.mxu0 %v5382_v37  ;;  %5415 = vmatpush1.bf16.msra.mxu1 %v5414_v46  ;;  %v5430_v37 = vpack.c.bf16 %v2516_v30, %v2512_v27  ;;  %v2525_v46 = vld [vmem:[%s8549_s5 + $0x1f8] sm:$0xff]  ;;  %v7736_v27 = vld [vmem:[%s8544_s0] sm:$0xff] }
 0x7c8   :  { %5385 = vmatprep.subr.bf16.mxu0 %v5384_v62  ;;  %5417 = vmatprep.subr.bf16.mxu1 %v5416_v18  ;;  %v5432_v53 = vpack.c.bf16 %v2525_v46, %v2521_v43  ;;  %v2522_v62 = vld [vmem:[%s8549_s5 + $0x1e0] sm:$0xff]  ;;  %v5434_v18 = vpack.c.bf16 %v2524_v13, %v2520_v5  ;;  %8669 = vst [vmem:[#allocation23_spill] sm:$0xff] %v7736_v27  ;;  %v2819_v43 = vld [vmem:[#allocation6 + $0x68] sm:$0xff]  ;;  %v2817_v46 = vld [vmem:[#allocation6 + $0x58] sm:$0xff] }
 0x7c9   :  { %v5402_v9 = vpack.c.bf16 %v2522_v62, %v2518_v58  ;;  %vm2450_vm13 = vcmp.lt.s32.totalorder %v7731_v17, %v7736_v27  ;;  %v2810_v30 = vld [vmem:[#allocation6 + $0x20] sm:$0xff]  ;;  %v2820_v13 = vld [vmem:[#allocation6 + $0x70] sm:$0xff] }
 0x7ca   :  { %v2814_v62 = vld [vmem:[#allocation6 + $0x40] sm:$0xff] }
 0x7cb   :  { %5387 = vmatpush1.bf16.msra.mxu0 %v5386_v23  ;;  %5419 = vmatpush1.bf16.msra.mxu1 %v5418_v48  ;;  %v2807_v23 = vld [vmem:[#allocation6 + $0x8] sm:$0xff]  ;;  %v2818_v5 = vld [vmem:[#allocation6 + $0x60] sm:$0xff] }
 0x7cc   :  { %5389 = vmatprep.subr.bf16.mxu0 %v5388_v26  ;;  %5421 = vmatprep.subr.bf16.mxu1 %v5420_v21  ;;  %v7714_v48 = vpack.c.bf16 %v2811_v28, %v2807_v23  ;;  %v7749_v23 = vpack.c.bf16 %v2819_v43, %v2815_v40  ;;  %v2847_v43 = vld [vmem:[#allocation6 + $0x148] sm:$0xff] }
 0x7ce   :  { %8662 = vst [vmem:[#allocation18_spill] sm:$0xff] %v7714_v48 }
 0x7cf   :  { %5391 = vmatpush1.bf16.msra.mxu0 %v5390_v44  ;;  %5423 = vmatpush1.bf16.msra.mxu1 %v5422_v57 }
 0x7d0   :  { %5393 = vmatprep.subr.bf16.mxu0 %v5392_v49  ;;  %5425 = vmatprep.subr.bf16.mxu1 %v5424_v51 }
 0x7d3   :  { %5395 = vmatpush1.bf16.msra.mxu0 %v5394_v47  ;;  %5427 = vmatpush1.bf16.msra.mxu1 %v5426_v16 }
 0x7d4   :  { %5397 = vmatprep.subr.bf16.mxu0 %v5396_v7  ;;  %5429 = vmatprep.subr.bf16.mxu1 %v5428_v20 }
 0x7d7   :  { %5399 = vmatpush1.bf16.msra.mxu0 %v5398_v24  ;;  %5431 = vmatpush1.bf16.msra.mxu1 %v5430_v37  ;;  %v2812_v37 = vld [vmem:[#allocation6 + $0x30] sm:$0xff] }
 0x7d8   :  { %5401 = vmatprep.subr.bf16.mxu0 %v5400_v50  ;;  %5433 = vmatprep.subr.bf16.mxu1 %v5432_v53  ;;  %v2821_v50 = vld [vmem:[#allocation6 + $0x78] sm:$0xff]  ;;  %v7747_v58 = vpack.c.bf16 %v2812_v37, %v2808_v33 }
 0x7d9   :  { %v7751_v28 = vpack.c.bf16 %v2821_v50, %v2817_v46  ;;  %v2457_v33 = vld [vmem:[#allocation3 + $0x18] sm:$0xff]  ;;  %v2851_v46 = vld [vmem:[#allocation6 + $0x168] sm:$0xff] }
 0x7da   :  { %v2849_v50 = vld [vmem:[#allocation6 + $0x158] sm:$0xff] }
 0x7db   :  { %5403 = vmatpush1.bf16.msra.mxu0 %v5402_v9  ;;  %5435 = vmatpush1.bf16.msra.mxu1 %v5434_v18  ;;  %v2816_v9 = vld [vmem:[#allocation6 + $0x50] sm:$0xff] }
 0x7dc   :  { %5437 = vmatprep.subr.bf16.mxu0 %v7714_v48  ;;  %5469 = vmatprep.subr.bf16.mxu1 %v7716_v63 }
 0x890   :  { %v2345_v35 = vpop.f32.mrb[30].mxu0  ;;  %v2416_v26 = vpop.f32.mrb[30].mxu1 }
 0x891   :  { %v2421_v0 = vadd.f32 %v2345_v35, %v8664_v52  ;;  %v2423_v21 = vadd.f32 %v2416_v26, %v8665_v8  ;;  %v2347_v44 = vpop.f32.mrb[31].mxu0  ;;  %v2418_v54 = vpop.f32.mrb[31].mxu1  ;;  %v2825_v35 = vld [vmem:[#allocation6 + $0x98] sm:$0xff]  ;;  %v7755_v52 = vpack.c.bf16 %v2818_v5, %v2814_v62  ;;  %v2822_v8 = vld [vmem:[#allocation6 + $0x80] sm:$0xff] }
 0x892   :  { %v2422_v57 = vadd.f32 %v2347_v44, %v8666_v59  ;;  %v2424_v29 = vadd.f32 %v2418_v54, %v8667_v15  ;;  %v2829_v26 = vld [vmem:[#allocation6 + $0xb8] sm:$0xff]  ;;  %v2824_v44 = vld [vmem:[#allocation6 + $0x90] sm:$0xff]  ;;  %v2455_v59 = vld [vmem:[#allocation3 + $0x8] sm:$0xff] }
 0x893   :  { %v4532_v22 = vmul.f32 -1.442695, %v2421_v0  ;;  %v7757_v0 = vpack.c.bf16 %v2820_v13, %v2816_v9  ;;  %v2828_v54 = vld [vmem:[#allocation6 + $0xb0] sm:$0xff]  ;;  %v7765_v15 = vpack.c.bf16 %v2829_v26, %v2825_v35  ;;  %v2853_v62 = vld [vmem:[#allocation6 + $0x178] sm:$0xff]  ;;  %v2846_v13 = vld [vmem:[#allocation6 + $0x140] sm:$0xff]  ;;  %v7805_v26 = vpack.c.bf16 %v2851_v46, %v2847_v43 }
 0x894   :  { %v4533_v49 = vmul.f32 -1.442695, %v2422_v57  ;;  %v4534_v6 = vmul.f32 -1.442695, %v2424_v29  ;;  %v7763_v57 = vpack.c.bf16 %v2827_v34, %v2823_v32  ;;  %v2831_v29 = vld [vmem:[#allocation6 + $0xc8] sm:$0xff]  ;;  %v2848_v32 = vld [vmem:[#allocation6 + $0x150] sm:$0xff] }
 0x895   :  { %6187 = vpow2.f32 %v4532_v22  ;;  %v2835_v22 = vld [vmem:[#allocation6 + $0xe8] sm:$0xff]  ;;  %v2852_v34 = vld [vmem:[#allocation6 + $0x170] sm:$0xff]  ;;  %v2458_v35 = vld [vmem:[#allocation3 + $0x20] sm:$0xff] }
 0x896   :  { %6189 = vpow2.f32 %v4533_v49  ;;  %v2833_v49 = vld [vmem:[#allocation6 + $0xd8] sm:$0xff]  ;;  %v2868_v43 = vld [vmem:[#allocation6 + $0x1f0] sm:$0xff] }
 0x897   :  { %6191 = vpow2.f32 %v4534_v6  ;;  %v2837_v6 = vld [vmem:[#allocation6 + $0xf8] sm:$0xff]  ;;  %v2460_v46 = vld [vmem:[#allocation3 + $0x30] sm:$0xff] }
 0x898   :  { %6193 = vtanh.f32 %v2423_v21  ;;  %v2826_v21 = vld [vmem:[#allocation6 + $0xa0] sm:$0xff] }
 0x89f   :  { %v6188_v2 = vpop.eup %6187 }
 0x8a0   :  { %v6190_v38 = vpop.eup %6189  ;;  %v2428_v51 = vadd.f32 1.0, %v6188_v2  ;;  %v7769_v2 = vpack.c.bf16 %v2826_v21, %v2822_v8  ;;  %v7807_v8 = vpack.c.bf16 %v2853_v62, %v2849_v50  ;;  %v2855_v21 = vld [vmem:[#allocation6 + $0x188] sm:$0xff] }
 0x8a1   :  { %v2434_v47 = vadd.f32 1.0, %v6190_v38  ;;  %v6192_v31 = vpop.eup %6191  ;;  %v7771_v38 = vpack.c.bf16 %v2828_v54, %v2824_v44  ;;  %v2859_v44 = vld [vmem:[#allocation6 + $0x1a8] sm:$0xff]  ;;  %v2857_v54 = vld [vmem:[#allocation6 + $0x198] sm:$0xff] }
 0x8a2   :  { %6195 = vrcp.f32 %v2428_v51  ;;  %v6194_v10 = vpop.eup %6193  ;;  %v2441_v4 = vadd.f32 1.0, %v6192_v31  ;;  %v2830_v51 = vld [vmem:[#allocation6 + $0xc0] sm:$0xff]  ;;  %v2832_v31 = vld [vmem:[#allocation6 + $0xd0] sm:$0xff] }
 0x8a3   :  { %6197 = vrcp.f32 %v2434_v47  ;;  %v2834_v47 = vld [vmem:[#allocation6 + $0xe0] sm:$0xff] }
 0x8a4   :  { %6199 = vrcp.f32 %v2441_v4  ;;  %v2839_v4 = vld [vmem:[#allocation6 + $0x108] sm:$0xff] }
 0x8ac   :  { %v6196_v16 = vpop.eup %6195 }
 0x8ad   :  { %v6198_v61 = vpop.eup %6197  ;;  %v2445_v1 = vmul.f32 %v6196_v16, %v6194_v10  ;;  %v2836_v10 = vld [vmem:[#allocation6 + $0xf0] sm:$0xff] }
 0x8ae   :  { %v2444_v7 = vmul.f32 %v6198_v61, %v2263_v42  ;;  %v6200_v20 = vpop.eup %6199  ;;  %v2806_v42 = vld [vmem:[#allocation6] sm:$0xff]  ;;  %v2456_v16 = vld [vmem:[#allocation3 + $0x10] sm:$0xff]  ;;  %v7777_v61 = vpack.c.bf16 %v2835_v22, %v2831_v29  ;;  %v7813_v22 = vpack.c.bf16 %v2852_v34, %v2848_v32 }
 0x8af   :  { %v7745_v53 = vpack.c.bf16 %v2810_v30, %v2806_v42  ;;  %v2840_v42 = vld [vmem:[#allocation6 + $0x110] sm:$0xff]  ;;  %v2526_v34 = vld [vmem:[%s8551_s7] sm:$0xf] }
 0x8b0   :  { %v2446_v11 = vadd.f32 %v2445_v1, %v2444_v7  ;;  %v7779_v1 = vpack.c.bf16 %v2837_v6, %v2833_v49  ;;  %v2843_v7 = vld [vmem:[#allocation6 + $0x128] sm:$0xff]  ;;  %v2844_v30 = vld [vmem:[#allocation6 + $0x130] sm:$0xff]  ;;  %v2854_v49 = vld [vmem:[#allocation6 + $0x180] sm:$0xff] }
 0x8b1   :  { %v7791_v37 = vpack.c.bf16 %v2843_v7, %v2839_v4  ;;  %v7799_v9 = vpack.c.bf16 %v2844_v30, %v2840_v42  ;;  %v2858_v6 = vld [vmem:[#allocation6 + $0x1a0] sm:$0xff]  ;;  %v2863_v4 = vld [vmem:[#allocation6 + $0x1c8] sm:$0xff] }
 0x8b2   :  { %6201 = vtanh.f32 %v2446_v11  ;;  %v2841_v11 = vld [vmem:[#allocation6 + $0x118] sm:$0xff]  ;;  %v2867_v7 = vld [vmem:[#allocation6 + $0x1e8] sm:$0xff]  ;;  %v2862_v42 = vld [vmem:[#allocation6 + $0x1c0] sm:$0xff] }
 0x8b3   :  { %v7793_v40 = vpack.c.bf16 %v2845_v14, %v2841_v11  ;;  %v2865_v11 = vld [vmem:[#allocation6 + $0x1d8] sm:$0xff]  ;;  %v2866_v30 = vld [vmem:[#allocation6 + $0x1e0] sm:$0xff]  ;;  %v7833_v50 = vpack.c.bf16 %v2867_v7, %v2863_v4 }
 0x8b4   :  { %v2869_v14 = vld [vmem:[#allocation6 + $0x1f8] sm:$0xff] }
 0x8b5   :  { %v7835_v62 = vpack.c.bf16 %v2869_v14, %v2865_v11 }
 0x8b7   :  { %8670 = vst [vmem:[#allocation24_spill] sm:$0xff] %v7835_v62 }
 0x8bc   :  { %v6202_v24 = vpop.eup %6201 }
 0x8bd   :  { %v2448_v45 = vmul.f32 %v6202_v24, %v6200_v20  ;;  %v7783_v20 = vpack.c.bf16 %v2834_v47, %v2830_v51  ;;  %v7785_v24 = vpack.c.bf16 %v2836_v10, %v2832_v31  ;;  %v2856_v51 = vld [vmem:[#allocation6 + $0x190] sm:$0xff]  ;;  %v2459_v31 = vld [vmem:[#allocation3 + $0x28] sm:$0xff]  ;;  %v7819_v10 = vpack.c.bf16 %v2859_v44, %v2855_v21 }
 0x8be   :  { %v2860_v47 = vld [vmem:[#allocation6 + $0x1b0] sm:$0xff] }
 0x8bf   :  { %v2451_v39 = vsel %vm2450_vm13, %v2448_v45, 0.0  ;;  %v2838_v45 = vld [vmem:[#allocation6 + $0x100] sm:$0xff] }
 0x8c0   :  { %2452 = vst.msk [vmem:[#allocation3 + $0x38] sm:$0xff] %vm1116_vm4, %v2451_v39 }
 0x8c1   :  { %2453 = vst.msk [vmem:[#allocation3] sm:$0xff] %vm1119_vm5, %v2451_v39  ;;  %v2842_v39 = vld [vmem:[#allocation6 + $0x120] sm:$0xff] }
 0x8c2   :  { %v7797_v5 = vpack.c.bf16 %v2842_v39, %v2838_v45  ;;  %v7825_v45 = vpack.c.bf16 %v2858_v6, %v2854_v49  ;;  %v7827_v39 = vpack.c.bf16 %v2860_v47, %v2856_v51 }
 0x8c7   :  { %v2461_v32 = vld [vmem:[#allocation3 + $0x38] sm:$0xff] }
 0x8c8   :  { %v2454_v18 = vld [vmem:[#allocation3] sm:$0xff] }
 0x8c9   :  { %2613 = vmatmul.mubr.f32.vlgmr.msra.gmra.mrb[32].mxu0 %v2454_v18  ;;  %2726 = vmatmul.mubr.f32.vlgmr.msra.gmra.mrb[32].mxu1 %v2454_v18  ;;  %v2850_v18 = vld [vmem:[#allocation6 + $0x160] sm:$0xff] }
 0x8ca   :  { %5439 = vmatpush1.bf16.msra.mxu0 %v7745_v53  ;;  %5471 = vmatpush1.bf16.msra.mxu1 %v7747_v58  ;;  %v7811_v29 = vpack.c.bf16 %v2850_v18, %v2846_v13  ;;  %v7839_v13 = vpack.c.bf16 %v2866_v30, %v2862_v42 }
 0x8cb   :  { %2618 = vmatprep.mubr.f32.mxu0 %v8627_v60  ;;  %2731 = vmatprep.mubr.f32.mxu1 %v8627_v60 }
 0x8cc   :  { %5441 = vmatprep.subr.bf16.mxu0 %v7749_v23  ;;  %5473 = vmatprep.subr.bf16.mxu1 %v7751_v28  ;;  %8671 = vst [vmem:[#allocation25_spill] sm:$0xff] %v7839_v13 }
 0x8cd   :  { %2619 = vmatmul.mubr.f32.gmra.mrb[34].mxu0 %v2455_v59  ;;  %2732 = vmatmul.mubr.f32.gmra.mrb[34].mxu1 %v2455_v59  ;;  %v2861_v59 = vld [vmem:[#allocation6 + $0x1b8] sm:$0xff] }
 0x8ce   :  { %5443 = vmatpush1.bf16.msra.mxu0 %v7755_v52  ;;  %5475 = vmatpush1.bf16.msra.mxu1 %v7757_v0 }
 0x8cf   :  { %2624 = vmatprep.mubr.f32.mxu0 %v8627_v60  ;;  %2737 = vmatprep.mubr.f32.mxu1 %v8627_v60 }
 0x8d0   :  { %5445 = vmatprep.subr.bf16.mxu0 %v7763_v57  ;;  %5477 = vmatprep.subr.bf16.mxu1 %v7765_v15 }
 0x8d1   :  { %2625 = vmatmul.mubr.f32.gmra.mrb[36].mxu0 %v2456_v16  ;;  %2738 = vmatmul.mubr.f32.gmra.mrb[36].mxu1 %v2456_v16  ;;  %v7821_v16 = vpack.c.bf16 %v2861_v59, %v2857_v54  ;;  %v8673_v59 = vld [vmem:[#allocation13_spill] sm:$0xff] }
 0x8d2   :  { %5447 = vmatpush1.bf16.msra.mxu0 %v7769_v2  ;;  %5479 = vmatpush1.bf16.msra.mxu1 %v7771_v38  ;;  %v8674_v49 = vsub.s32 0, %v8673_v59  ;;  %v8675_v51 = vsub.s32 2, %v8673_v59  ;;  %v8677_v7 = vsub.s32 3, %v8673_v59 }
 0x8d3   :  { %2630 = vmatprep.mubr.f32.mxu0 %v8627_v60  ;;  %2743 = vmatprep.mubr.f32.mxu1 %v8627_v60 }
 0x8d4   :  { %5449 = vmatprep.subr.bf16.mxu0 %v7777_v61  ;;  %5481 = vmatprep.subr.bf16.mxu1 %v7779_v1  ;;  %v7902_v6 = vrot.slane %v2526_v34, %v8674_v49  ;;  %v7906_v47 = vrot.slane %v2526_v34, %v8675_v51  ;;  %v7914_v11 = vrot.slane %v2526_v34, %v8677_v7 }
 0x8d5   :  { %2631 = vmatmul.mubr.f32.gmra.mrb[38].mxu0 %v2457_v33  ;;  %2744 = vmatmul.mubr.f32.gmra.mrb[38].mxu1 %v2457_v33  ;;  %v2864_v33 = vld [vmem:[#allocation6 + $0x1d0] sm:$0xff] }
 0x8d6   :  { %5451 = vmatpush1.bf16.msra.mxu0 %v7783_v20  ;;  %5483 = vmatpush1.bf16.msra.mxu1 %v7785_v24  ;;  %v7841_v18 = vpack.c.bf16 %v2868_v43, %v2864_v33 }
 0x8d7   :  { %2636 = vmatprep.mubr.f32.mxu0 %v8627_v60  ;;  %2749 = vmatprep.mubr.f32.mxu1 %v8627_v60 }
 0x8d8   :  { %5453 = vmatprep.subr.bf16.mxu0 %v7791_v37  ;;  %5485 = vmatprep.subr.bf16.mxu1 %v7793_v40  ;;  %8672 = vst [vmem:[#allocation26_spill] sm:$0xff] %v7841_v18 }
 0x8d9   :  { %2637 = vmatmul.mubr.f32.gmra.mrb[40].mxu0 %v2458_v35  ;;  %2750 = vmatmul.mubr.f32.gmra.mrb[40].mxu1 %v2458_v35 }
 0x8da   :  { %5455 = vmatpush1.bf16.msra.mxu0 %v7797_v5  ;;  %5487 = vmatpush1.bf16.msra.mxu1 %v7799_v9 }
 0x8db   :  { %2642 = vmatprep.mubr.f32.mxu0 %v8627_v60  ;;  %2755 = vmatprep.mubr.f32.mxu1 %v8627_v60 }
 0x8dc   :  { %5457 = vmatprep.subr.bf16.mxu0 %v7805_v26  ;;  %5489 = vmatprep.subr.bf16.mxu1 %v7807_v8 }
 0x8dd   :  { %2643 = vmatmul.mubr.f32.gmra.mrb[42].mxu0 %v2459_v31  ;;  %2756 = vmatmul.mubr.f32.gmra.mrb[42].mxu1 %v2459_v31  ;;  %v8676_v31 = vsub.s32 1, %v8673_v59 }
 0x8de   :  { %5459 = vmatpush1.bf16.msra.mxu0 %v7811_v29  ;;  %5491 = vmatpush1.bf16.msra.mxu1 %v7813_v22 }
 0x8df   :  { %2648 = vmatprep.mubr.f32.mxu0 %v8627_v60  ;;  %2761 = vmatprep.mubr.f32.mxu1 %v8627_v60  ;;  %v7910_v4 = vrot.slane %v2526_v34, %v8676_v31 }
 0x8e0   :  { %5461 = vmatprep.subr.bf16.mxu0 %v7819_v10  ;;  %5493 = vmatprep.subr.bf16.mxu1 %v7821_v16 }
 0x8e1   :  { %2649 = vmatmul.mubr.f32.gmra.mrb[44].mxu0 %v2460_v46  ;;  %2762 = vmatmul.mubr.f32.gmra.mrb[44].mxu1 %v2460_v46 }
 0x8e2   :  { %5463 = vmatpush1.bf16.msra.mxu0 %v7825_v45  ;;  %5495 = vmatpush1.bf16.msra.mxu1 %v7827_v39 }
 0x8e3   :  { %2654 = vmatprep.mubr.f32.mxu0 %v8627_v60  ;;  %2767 = vmatprep.mubr.f32.mxu1 %v8627_v60 }
 0x8e4   :  { %5465 = vmatprep.subr.bf16.mxu0 %v7833_v50  ;;  %5497 = vmatprep.subr.bf16.mxu1 %v7835_v62 }
 0x8e5   :  { %2655 = vmatmul.mubr.f32.gmra.mrb[46].mxu0 %v2461_v32  ;;  %2768 = vmatmul.mubr.f32.gmra.mrb[46].mxu1 %v2461_v32 }
 0x8e6   :  { %5467 = vmatpush1.bf16.msra.mxu0 %v7839_v13  ;;  %5499 = vmatpush1.bf16.msra.mxu1 %v7841_v18 }
 0x8e7   :  { %2946 = vmatprep.mubr.f32.mxu0 %v8627_v60  ;;  %3017 = vmatprep.mubr.f32.mxu1 %v8627_v60 }
 0x8e8   :  { %5501 = vmatprep.subr.bf16.mxu0 %v7714_v48  ;;  %5533 = vmatprep.subr.bf16.mxu1 %v7716_v63 }
 0x8e9   :  { %2947 = vmatmul.mubr.f32.vlgmr.msra.gmra.mrb[48].mxu0 %v8627_v60  ;;  %3018 = vmatmul.mubr.f32.vlgmr.msra.gmra.mrb[48].mxu1 %v8627_v60 }
 0x8ea   :  { %5503 = vmatpush1.bf16.msra.mxu0 %v7745_v53  ;;  %5535 = vmatpush1.bf16.msra.mxu1 %v7747_v58 }
 0x8eb   :  { %5505 = vmatprep.subr.bf16.mxu0 %v7749_v23  ;;  %5537 = vmatprep.subr.bf16.mxu1 %v7751_v28 }
 0x8ec   :  { %3130 = vmatprep.mubr.f32.mxu0 %v8627_v60  ;;  %3201 = vmatprep.mubr.f32.mxu1 %v8627_v60 }
 0x8ee   :  { %5507 = vmatpush1.bf16.msra.mxu0 %v7755_v52  ;;  %5539 = vmatpush1.bf16.msra.mxu1 %v7757_v0 }
 0x8ef   :  { %5509 = vmatprep.subr.bf16.mxu0 %v7763_v57  ;;  %5541 = vmatprep.subr.bf16.mxu1 %v7765_v15 }
 0x8f2   :  { %5511 = vmatpush1.bf16.msra.mxu0 %v7769_v2  ;;  %5543 = vmatpush1.bf16.msra.mxu1 %v7771_v38 }
 0x8f3   :  { %5513 = vmatprep.subr.bf16.mxu0 %v7777_v61  ;;  %5545 = vmatprep.subr.bf16.mxu1 %v7779_v1 }
 0x8f6   :  { %5515 = vmatpush1.bf16.msra.mxu0 %v7783_v20  ;;  %5547 = vmatpush1.bf16.msra.mxu1 %v7785_v24 }
 0x8f7   :  { %5517 = vmatprep.subr.bf16.mxu0 %v7791_v37  ;;  %5549 = vmatprep.subr.bf16.mxu1 %v7793_v40 }
 0x8fa   :  { %5519 = vmatpush1.bf16.msra.mxu0 %v7797_v5  ;;  %5551 = vmatpush1.bf16.msra.mxu1 %v7799_v9 }
 0x8fb   :  { %5521 = vmatprep.subr.bf16.mxu0 %v7805_v26  ;;  %5553 = vmatprep.subr.bf16.mxu1 %v7807_v8 }
 0x8fe   :  { %5523 = vmatpush1.bf16.msra.mxu0 %v7811_v29  ;;  %5555 = vmatpush1.bf16.msra.mxu1 %v7813_v22 }
 0x8ff   :  { %5525 = vmatprep.subr.bf16.mxu0 %v7819_v10  ;;  %5557 = vmatprep.subr.bf16.mxu1 %v7821_v16 }
 0x902   :  { %5527 = vmatpush1.bf16.msra.mxu0 %v7825_v45  ;;  %5559 = vmatpush1.bf16.msra.mxu1 %v7827_v39 }
 0x903   :  { %5529 = vmatprep.subr.bf16.mxu0 %v7833_v50  ;;  %5561 = vmatprep.subr.bf16.mxu1 %v7835_v62 }
 0x906   :  { %5531 = vmatpush1.bf16.msra.mxu0 %v7839_v13  ;;  %5563 = vmatpush1.bf16.msra.mxu1 %v7841_v18 }
 0x907   :  { %5565 = vmatprep.subr.bf16.mxu0 %v7714_v48  ;;  %5597 = vmatprep.subr.bf16.mxu1 %v7716_v63 }
 0x99c   :  { %v7892_v35 = vpop.f32.mrb[32].mxu0  ;;  %v7894_v21 = vpop.f32.mrb[32].mxu1 }
 0x99d   :  { %v7896_v44 = vpop.f32.mrb[33].mxu0  ;;  %v7898_v54 = vpop.f32.mrb[33].mxu1 }
 0x9a0   :  { %v2620_v14 = vpop.f32.mrb[34].mxu0  ;;  %v2733_v42 = vpop.f32.mrb[34].mxu1 }
 0x9a1   :  { %v7917_v30 = vadd.f32 %v2620_v14, %v7902_v6  ;;  %v7920_v33 = vadd.f32 %v2733_v42, %v7906_v47  ;;  %v2622_v43 = vpop.f32.mrb[35].mxu0  ;;  %v2735_v46 = vpop.f32.mrb[35].mxu1 }
 0x9a2   :  { %v7923_v32 = vadd.f32 %v2622_v43, %v7910_v4  ;;  %v7926_v49 = vadd.f32 %v2735_v46, %v7914_v11 }
 0x9a4   :  { %v2626_v51 = vpop.f32.mrb[36].mxu0  ;;  %v2739_v59 = vpop.f32.mrb[36].mxu1 }
 0x9a5   :  { %v2627_v34 = vadd.f32 %v2626_v51, %v7902_v6  ;;  %v2740_v31 = vadd.f32 %v2739_v59, %v7906_v47  ;;  %v2628_v7 = vpop.f32.mrb[37].mxu0  ;;  %v2741_v14 = vpop.f32.mrb[37].mxu1 }
 0x9a6   :  { %v2629_v27 = vadd.f32 %v2628_v7, %v7910_v4  ;;  %v2742_v42 = vadd.f32 %v2741_v14, %v7914_v11 }
 0x9a8   :  { %v2632_v17 = vpop.f32.mrb[38].mxu0  ;;  %v2745_v36 = vpop.f32.mrb[38].mxu1 }
 0x9a9   :  { %v2633_v43 = vadd.f32 %v2632_v17, %v7902_v6  ;;  %v2746_v12 = vadd.f32 %v2745_v36, %v7906_v47  ;;  %v2634_v46 = vpop.f32.mrb[39].mxu0  ;;  %v2747_v41 = vpop.f32.mrb[39].mxu1 }
 0x9aa   :  { %v2635_v55 = vadd.f32 %v2634_v46, %v7910_v4  ;;  %v2748_v51 = vadd.f32 %v2747_v41, %v7914_v11 }
 0x9ac   :  { %v2638_v3 = vpop.f32.mrb[40].mxu0  ;;  %v2751_v59 = vpop.f32.mrb[40].mxu1 }
 0x9ad   :  { %v2639_v19 = vadd.f32 %v2638_v3, %v7902_v6  ;;  %v2752_v7 = vadd.f32 %v2751_v59, %v7906_v47  ;;  %v2640_v63 = vpop.f32.mrb[41].mxu0  ;;  %v2753_v14 = vpop.f32.mrb[41].mxu1 }
 0x9ae   :  { %v2641_v48 = vadd.f32 %v2640_v63, %v7910_v4  ;;  %v2754_v17 = vadd.f32 %v2753_v14, %v7914_v11 }
 0x9af   :  { %v7942_v36 = vsel %vm72_vm0, %v2633_v43, %v2639_v19  ;;  %v7946_v46 = vsel %vm117_vm2, %v2746_v12, %v2752_v7  ;;  %v7950_v41 = vsel %vm72_vm0, %v2639_v19, %v2633_v43  ;;  %v7954_v3 = vsel %vm117_vm2, %v2752_v7, %v2746_v12 }
 0x9b0   :  { %8678 = vst [vmem:[#allocation27_spill] sm:$0xff] %v7942_v36  ;;  %8680 = vst [vmem:[#allocation28_spill] sm:$0xff] %v7946_v46  ;;  %v2644_v59 = vpop.f32.mrb[42].mxu0  ;;  %v2757_v63 = vpop.f32.mrb[42].mxu1  ;;  %v7958_v14 = vsel %vm100_vm1, %v2635_v55, %v2641_v48  ;;  %v7962_v36 = vsel %vm134_vm3, %v2748_v51, %v2754_v17  ;;  %v7966_v46 = vsel %vm100_vm1, %v2641_v48, %v2635_v55 }
 0x9b1   :  { %8681 = vst [vmem:[#allocation29_spill] sm:$0xff] %v7950_v41  ;;  %8682 = vst [vmem:[#allocation30_spill] sm:$0xff] %v7954_v3  ;;  %v7970_v19 = vsel %vm134_vm3, %v2754_v17, %v2748_v51  ;;  %v2645_v12 = vadd.f32 %v2644_v59, %v7902_v6  ;;  %v2758_v43 = vadd.f32 %v2757_v63, %v7906_v47  ;;  %v2646_v7 = vpop.f32.mrb[43].mxu0  ;;  %v2759_v3 = vpop.f32.mrb[43].mxu1 }
 0x9b2   :  { %8684 = vst [vmem:[#allocation31_spill] sm:$0xff] %v7958_v14  ;;  %8686 = vst [vmem:[#allocation32_spill] sm:$0xff] %v7962_v36  ;;  %v2647_v41 = vadd.f32 %v2646_v7, %v7910_v4  ;;  %v2760_v14 = vadd.f32 %v2759_v3, %v7914_v11 }
 0x9b3   :  { %8687 = vst [vmem:[#allocation33_spill] sm:$0xff] %v7966_v46  ;;  %8688 = vst [vmem:[#allocation13_spill] sm:$0xff] %v7970_v19  ;;  %v7978_v36 = vsel %vm72_vm0, %v2627_v34, %v2645_v12  ;;  %v7982_v55 = vsel %vm117_vm2, %v2740_v31, %v2758_v43  ;;  %v7986_v48 = vsel %vm72_vm0, %v2645_v12, %v2627_v34 }
 0x9b4   :  { %8689 = vst [vmem:[#allocation15_spill] sm:$0xff] %v7986_v48  ;;  %v7990_v51 = vsel %vm117_vm2, %v2758_v43, %v2740_v31  ;;  %v2650_v17 = vpop.f32.mrb[44].mxu0  ;;  %v2763_v59 = vpop.f32.mrb[44].mxu1  ;;  %v7994_v3 = vsel %vm100_vm1, %v2629_v27, %v2647_v41  ;;  %v7998_v63 = vsel %vm134_vm3, %v2742_v42, %v2760_v14  ;;  %v8002_v7 = vsel %vm100_vm1, %v2647_v41, %v2629_v27 }
 0x9b5   :  { %8690 = vst [vmem:[#allocation14_spill] sm:$0xff] %v7990_v51  ;;  %v8006_v34 = vsel %vm134_vm3, %v2760_v14, %v2742_v42  ;;  %v2651_v31 = vadd.f32 %v2650_v17, %v7902_v6  ;;  %v2764_v12 = vadd.f32 %v2763_v59, %v7906_v47  ;;  %v2652_v43 = vpop.f32.mrb[45].mxu0  ;;  %v2765_v51 = vpop.f32.mrb[45].mxu1 }
 0x9b6   :  { %8691 = vst [vmem:[#allocation16_spill] sm:$0xff] %v8006_v34  ;;  %v2653_v48 = vadd.f32 %v2652_v43, %v7910_v4  ;;  %v2766_v19 = vadd.f32 %v2765_v51, %v7914_v11 }
 0x9b7   :  { %v8015_v46 = vsel %vm72_vm0, %v7917_v30, %v2651_v31  ;;  %v8020_v27 = vsel %vm117_vm2, %v7920_v33, %v2764_v12  ;;  %v8025_v42 = vsel %vm72_vm0, %v2651_v31, %v7917_v30  ;;  %v8030_v41 = vsel %vm117_vm2, %v2764_v12, %v7920_v33 }
 0x9b8   :  { %8692 = vst [vmem:[#allocation34_spill] sm:$0xff] %v8025_v42  ;;  %8693 = vst [vmem:[#allocation35_spill] sm:$0xff] %v8030_v41  ;;  %v2656_v14 = vpop.f32.mrb[46].mxu0  ;;  %v2769_v51 = vpop.f32.mrb[46].mxu1  ;;  %v8035_v17 = vsel %vm100_vm1, %v7923_v32, %v2653_v48  ;;  %v8040_v59 = vsel %vm134_vm3, %v7926_v49, %v2766_v19  ;;  %v8045_v30 = vsel %vm100_vm1, %v2653_v48, %v7923_v32 }
 0x9b9   :  { %v8050_v33 = vsel %vm134_vm3, %v2766_v19, %v7926_v49  ;;  %v2615_v31 = vadd.f32 %v7892_v35, %v7902_v6  ;;  %v2728_v12 = vadd.f32 %v7894_v21, %v7906_v47  ;;  %v2657_v43 = vadd.f32 %v2656_v14, %v7902_v6  ;;  %v2658_v42 = vpop.f32.mrb[47].mxu0  ;;  %v2771_v34 = vpop.f32.mrb[47].mxu1 }
 0x9ba   :  { %8694 = vst [vmem:[#allocation36_spill] sm:$0xff] %v8050_v33  ;;  %v2770_v41 = vadd.f32 %v2769_v51, %v7906_v47  ;;  %v2617_v32 = vadd.f32 %v7896_v44, %v7910_v4  ;;  %v2730_v48 = vadd.f32 %v7898_v54, %v7914_v11  ;;  %v2659_v49 = vadd.f32 %v2658_v42, %v7910_v4 }
 0x9bb   :  { %v2772_v19 = vadd.f32 %v2771_v34, %v7914_v11  ;;  %v2878_v35 = vsel %vm72_vm0, %v2615_v31, %v2657_v43  ;;  %v8070_v6 = vsel %vm72_vm0, %v2657_v43, %v2615_v31 }
 0x9bc   :  { %v2880_v21 = vsel %vm117_vm2, %v2728_v12, %v2770_v41  ;;  %8695 = vst [vmem:[#allocation37_spill] sm:$0xff] %v8070_v6  ;;  %v8074_v44 = vsel %vm117_vm2, %v2770_v41, %v2728_v12  ;;  %v2948_v47 = vpop.f32.mrb[48].mxu0  ;;  %v3019_v54 = vpop.f32.mrb[48].mxu1  ;;  %v2879_v4 = vsel %vm100_vm1, %v2617_v32, %v2659_v49  ;;  %v8082_v34 = vsel %vm100_vm1, %v2659_v49, %v2617_v32 }
 0x9bd   :  { %8696 = vst [vmem:[#allocation38_spill] sm:$0xff] %v8074_v44  ;;  %v2881_v11 = vsel %vm134_vm3, %v2730_v48, %v2772_v19  ;;  %v8086_v25 = vsel %vm134_vm3, %v2772_v19, %v2730_v48  ;;  %v3024_v42 = vadd.f32 %v2948_v47, %v2878_v35  ;;  %v3026_v18 = vadd.f32 %v3019_v54, %v2880_v21  ;;  %v2950_v41 = vpop.f32.mrb[49].mxu0  ;;  %v3021_v14 = vpop.f32.mrb[49].mxu1 }
 0x9be   :  { %v3025_v51 = vadd.f32 %v2950_v41, %v2879_v4  ;;  %v3027_v31 = vadd.f32 %v3021_v14, %v2881_v11  ;;  %v8701_v41 = vld [vmem:[#allocation21_spill] sm:$0xff] }
 0x9bf   :  { %v4535_v12 = vmul.f32 -1.442695, %v3024_v42  ;;  %v8699_v42 = vld [vmem:[#allocation26_spill] sm:$0xff] }
 0x9c0   :  { %v4536_v43 = vmul.f32 -1.442695, %v3025_v51  ;;  %v4537_v44 = vmul.f32 -1.442695, %v3027_v31 }
 0x9c1   :  { %6203 = vpow2.f32 %v4535_v12 }
 0x9c2   :  { %6205 = vpow2.f32 %v4536_v43 }
 0x9c3   :  { %6207 = vpow2.f32 %v4537_v44  ;;  %v8698_v44 = vld [vmem:[#allocation25_spill] sm:$0xff] }
 0x9c4   :  { %6209 = vtanh.f32 %v3026_v18  ;;  %v8700_v18 = vld [vmem:[#allocation18_spill] sm:$0xff] }
 0x9cb   :  { %v6204_v6 = vpop.eup %6203 }
 0x9cc   :  { %v6206_v33 = vpop.eup %6205  ;;  %v3031_v13 = vadd.f32 1.0, %v6204_v6 }
 0x9cd   :  { %v3037_v32 = vadd.f32 1.0, %v6206_v33  ;;  %v6208_v62 = vpop.eup %6207  ;;  %v8697_v33 = vld [vmem:[#allocation24_spill] sm:$0xff] }
 0x9ce   :  { %6211 = vrcp.f32 %v3031_v13  ;;  %v6210_v48 = vpop.eup %6209  ;;  %v3044_v21 = vadd.f32 1.0, %v6208_v62 }
 0x9cf   :  { %6213 = vrcp.f32 %v3037_v32 }
 0x9d0   :  { %6215 = vrcp.f32 %v3044_v21 }
 0x9d8   :  { %v6212_v49 = vpop.eup %6211 }
 0x9d9   :  { %v6214_v19 = vpop.eup %6213  ;;  %v3048_v35 = vmul.f32 %v6212_v49, %v6210_v48 }
 0x9da   :  { %v3047_v47 = vmul.f32 0.0, %v6214_v19  ;;  %v6216_v4 = vpop.eup %6215 }
 0x9dc   :  { %v8088_v54 = vadd.f32 %v3048_v35, %v3047_v47 }
 0x9de   :  { %6217 = vtanh.f32 %v8088_v54 }
 0x9e8   :  { %v6218_v11 = vpop.eup %6217 }
 0x9e9   :  { %v8091_v6 = vmul.f32 %v6218_v11, %v6216_v4 }
 0x9eb   :  { %4538 = vmatmul.mubr.msk.f32.vlgmr.msra.gmra.mrb[50].mxu0 %vm7135_vm6, %v8091_v6  ;;  %4539 = vmatmul.mubr.msk.f32.vlgmr.msra.gmra.mrb[50].mxu1 %vm7135_vm6, %v8091_v6 }
 0x9ec   :  { %5567 = vmatpush1.bf16.msra.mxu0 %v7745_v53  ;;  %5599 = vmatpush1.bf16.msra.mxu1 %v7747_v58 }
 0x9ed   :  { %5569 = vmatprep.subr.bf16.mxu0 %v7749_v23  ;;  %5601 = vmatprep.subr.bf16.mxu1 %v7751_v28 }
 0x9ee   :  { %3314 = vmatprep.mubr.f32.mxu0 %v8627_v60  ;;  %3385 = vmatprep.mubr.f32.mxu1 %v8627_v60 }
 0x9f0   :  { %5571 = vmatpush1.bf16.msra.mxu0 %v7755_v52  ;;  %5603 = vmatpush1.bf16.msra.mxu1 %v7757_v0 }
 0x9f1   :  { %5573 = vmatprep.subr.bf16.mxu0 %v7763_v57  ;;  %5605 = vmatprep.subr.bf16.mxu1 %v7765_v15 }
 0x9f4   :  { %5575 = vmatpush1.bf16.msra.mxu0 %v7769_v2  ;;  %5607 = vmatpush1.bf16.msra.mxu1 %v7771_v38 }
 0x9f5   :  { %5577 = vmatprep.subr.bf16.mxu0 %v7777_v61  ;;  %5609 = vmatprep.subr.bf16.mxu1 %v7779_v1 }
 0x9f8   :  { %5579 = vmatpush1.bf16.msra.mxu0 %v7783_v20  ;;  %5611 = vmatpush1.bf16.msra.mxu1 %v7785_v24 }
 0x9f9   :  { %5581 = vmatprep.subr.bf16.mxu0 %v7791_v37  ;;  %5613 = vmatprep.subr.bf16.mxu1 %v7793_v40 }
 0x9fc   :  { %5583 = vmatpush1.bf16.msra.mxu0 %v7797_v5  ;;  %5615 = vmatpush1.bf16.msra.mxu1 %v7799_v9 }
 0x9fd   :  { %5585 = vmatprep.subr.bf16.mxu0 %v7805_v26  ;;  %5617 = vmatprep.subr.bf16.mxu1 %v7807_v8 }
 0xa00   :  { %5587 = vmatpush1.bf16.msra.mxu0 %v7811_v29  ;;  %5619 = vmatpush1.bf16.msra.mxu1 %v7813_v22 }
 0xa01   :  { %5589 = vmatprep.subr.bf16.mxu0 %v7819_v10  ;;  %5621 = vmatprep.subr.bf16.mxu1 %v7821_v16 }
 0xa04   :  { %5591 = vmatpush1.bf16.msra.mxu0 %v7825_v45  ;;  %5623 = vmatpush1.bf16.msra.mxu1 %v7827_v39 }
 0xa05   :  { %5593 = vmatprep.subr.bf16.mxu0 %v7833_v50  ;;  %5625 = vmatprep.subr.bf16.mxu1 %v8697_v33 }
 0xa08   :  { %5595 = vmatpush1.bf16.msra.mxu0 %v8698_v44  ;;  %5627 = vmatpush1.bf16.msra.mxu1 %v8699_v42 }
 0xa09   :  { %5629 = vmatprep.subr.bf16.mxu0 %v8700_v18  ;;  %5661 = vmatprep.subr.bf16.mxu1 %v8701_v41 }
 0xabe   :  { %v3132_v14 = vpop.f32.mrb[50].mxu0  ;;  %v3203_v51 = vpop.f32.mrb[50].mxu1 }
 0xabf   :  { %v3208_v31 = vadd.f32 %v3132_v14, %v8015_v46  ;;  %v3210_v12 = vadd.f32 %v3203_v51, %v8020_v27  ;;  %v3134_v43 = vpop.f32.mrb[51].mxu0  ;;  %v3205_v13 = vpop.f32.mrb[51].mxu1 }
 0xac0   :  { %v3209_v32 = vadd.f32 %v3134_v43, %v8035_v17  ;;  %v3211_v62 = vadd.f32 %v3205_v13, %v8040_v59  ;;  %v3053_v17 = vsel %vm7135_vm6, %v8088_v54, 0.0 }
 0xac1   :  { %v4540_v48 = vmul.f32 -1.442695, %v3208_v31 }
 0xac2   :  { %v4541_v49 = vmul.f32 -1.442695, %v3209_v32  ;;  %v4542_v19 = vmul.f32 -1.442695, %v3211_v62 }
 0xac3   :  { %6219 = vpow2.f32 %v4540_v48 }
 0xac4   :  { %6221 = vpow2.f32 %v4541_v49  ;;  %v3052_v49 = vsel %vm7135_vm6, %v8091_v6, 0.0 }
 0xac5   :  { %6223 = vpow2.f32 %v4542_v19 }
 0xac6   :  { %6225 = vtanh.f32 %v3210_v12 }
 0xacd   :  { %v6220_v35 = vpop.eup %6219 }
 0xace   :  { %v6222_v21 = vpop.eup %6221  ;;  %v3215_v47 = vadd.f32 1.0, %v6220_v35 }
 0xacf   :  { %v3221_v4 = vadd.f32 1.0, %v6222_v21  ;;  %v6224_v46 = vpop.eup %6223 }
 0xad0   :  { %6227 = vrcp.f32 %v3215_v47  ;;  %v6226_v27 = vpop.eup %6225  ;;  %v3228_v51 = vadd.f32 1.0, %v6224_v46 }
 0xad1   :  { %6229 = vrcp.f32 %v3221_v4 }
 0xad2   :  { %6231 = vrcp.f32 %v3228_v51 }
 0xada   :  { %v6228_v11 = vpop.eup %6227 }
 0xadb   :  { %v6230_v14 = vpop.eup %6229  ;;  %v3232_v59 = vmul.f32 %v6228_v11, %v6226_v27 }
 0xadc   :  { %v3231_v31 = vmul.f32 %v6230_v14, %v3053_v17  ;;  %v6232_v32 = vpop.eup %6231 }
 0xade   :  { %v3233_v43 = vadd.f32 %v3232_v59, %v3231_v31 }
 0xae0   :  { %6233 = vtanh.f32 %v3233_v43  ;;  %v8142_v12 = vsel %vm7195_vm7, %v3233_v43, %v3053_v17 }
 0xaea   :  { %v6234_v62 = vpop.eup %6233 }
 0xaeb   :  { %v3235_v48 = vmul.f32 %v6234_v62, %v6232_v32 }
 0xaed   :  { %v8149_v54 = vsel %vm7195_vm7, %v3235_v48, %v3052_v49 }
 0xaee   :  { %3315 = vmatmul.mubr.f32.vlgmr.msra.gmra.mrb[52].mxu0 %v8149_v54  ;;  %3386 = vmatmul.mubr.f32.vlgmr.msra.gmra.mrb[52].mxu1 %v8149_v54 }
 0xaef   :  { %5631 = vmatpush1.bf16.msra.mxu0 %v7745_v53  ;;  %5663 = vmatpush1.bf16.msra.mxu1 %v7747_v58 }
 0xaf0   :  { %5633 = vmatprep.subr.bf16.mxu0 %v7749_v23  ;;  %5665 = vmatprep.subr.bf16.mxu1 %v7751_v28 }
 0xaf1   :  { %3498 = vmatprep.mubr.f32.mxu0 %v8627_v60  ;;  %3569 = vmatprep.mubr.f32.mxu1 %v8627_v60 }
 0xaf3   :  { %5635 = vmatpush1.bf16.msra.mxu0 %v7755_v52  ;;  %5667 = vmatpush1.bf16.msra.mxu1 %v7757_v0 }
 0xaf4   :  { %5637 = vmatprep.subr.bf16.mxu0 %v7763_v57  ;;  %5669 = vmatprep.subr.bf16.mxu1 %v7765_v15 }
 0xaf7   :  { %5639 = vmatpush1.bf16.msra.mxu0 %v7769_v2  ;;  %5671 = vmatpush1.bf16.msra.mxu1 %v7771_v38 }
 0xaf8   :  { %5641 = vmatprep.subr.bf16.mxu0 %v7777_v61  ;;  %5673 = vmatprep.subr.bf16.mxu1 %v7779_v1 }
 0xafb   :  { %5643 = vmatpush1.bf16.msra.mxu0 %v7783_v20  ;;  %5675 = vmatpush1.bf16.msra.mxu1 %v7785_v24 }
 0xafc   :  { %5645 = vmatprep.subr.bf16.mxu0 %v7791_v37  ;;  %5677 = vmatprep.subr.bf16.mxu1 %v7793_v40 }
 0xaff   :  { %5647 = vmatpush1.bf16.msra.mxu0 %v7797_v5  ;;  %5679 = vmatpush1.bf16.msra.mxu1 %v7799_v9 }
 0xb00   :  { %5649 = vmatprep.subr.bf16.mxu0 %v7805_v26  ;;  %5681 = vmatprep.subr.bf16.mxu1 %v7807_v8 }
 0xb03   :  { %5651 = vmatpush1.bf16.msra.mxu0 %v7811_v29  ;;  %5683 = vmatpush1.bf16.msra.mxu1 %v7813_v22 }
 0xb04   :  { %5653 = vmatprep.subr.bf16.mxu0 %v7819_v10  ;;  %5685 = vmatprep.subr.bf16.mxu1 %v7821_v16 }
 0xb07   :  { %5655 = vmatpush1.bf16.msra.mxu0 %v7825_v45  ;;  %5687 = vmatpush1.bf16.msra.mxu1 %v7827_v39 }
 0xb08   :  { %5657 = vmatprep.subr.bf16.mxu0 %v7833_v50  ;;  %5689 = vmatprep.subr.bf16.mxu1 %v8697_v33 }
 0xb0b   :  { %5659 = vmatpush1.bf16.msra.mxu0 %v8698_v44  ;;  %5691 = vmatpush1.bf16.msra.mxu1 %v8699_v42 }
 0xb0c   :  { %5693 = vmatprep.subr.bf16.mxu0 %v8700_v18  ;;  %5725 = vmatprep.subr.bf16.mxu1 %v8701_v41 }
 0xbc1   :  { %v3316_v56 = vpop.f32.mrb[52].mxu0  ;;  %v3387_v6 = vpop.f32.mrb[52].mxu1 }
 0xbc2   :  { %v3392_v19 = vadd.f32 %v3316_v56, %v7978_v36  ;;  %v3394_v35 = vadd.f32 %v3387_v6, %v7982_v55  ;;  %v3318_v21 = vpop.f32.mrb[53].mxu0  ;;  %v3389_v47 = vpop.f32.mrb[53].mxu1 }
 0xbc3   :  { %v3393_v4 = vadd.f32 %v3318_v21, %v7994_v3  ;;  %v3395_v46 = vadd.f32 %v3389_v47, %v7998_v63  ;;  %v8704_v21 = vld [vmem:[#allocation27_spill] sm:$0xff] }
 0xbc4   :  { %v4543_v27 = vmul.f32 -1.442695, %v3392_v19 }
 0xbc5   :  { %v4544_v11 = vmul.f32 -1.442695, %v3393_v4  ;;  %v4545_v14 = vmul.f32 -1.442695, %v3395_v46  ;;  %v8705_v4 = vld [vmem:[#allocation28_spill] sm:$0xff] }
 0xbc6   :  { %6235 = vpow2.f32 %v4543_v27 }
 0xbc7   :  { %6237 = vpow2.f32 %v4544_v11 }
 0xbc8   :  { %6239 = vpow2.f32 %v4545_v14  ;;  %v8706_v14 = vld [vmem:[#allocation31_spill] sm:$0xff] }
 0xbc9   :  { %6241 = vtanh.f32 %v3394_v35 }
 0xbd0   :  { %v6236_v17 = vpop.eup %6235 }
 0xbd1   :  { %v6238_v59 = vpop.eup %6237  ;;  %v3399_v51 = vadd.f32 1.0, %v6236_v17 }
 0xbd2   :  { %v3405_v31 = vadd.f32 1.0, %v6238_v59  ;;  %v6240_v36 = vpop.eup %6239  ;;  %v8707_v59 = vld [vmem:[#allocation32_spill] sm:$0xff] }
 0xbd3   :  { %6243 = vrcp.f32 %v3399_v51  ;;  %v6242_v55 = vpop.eup %6241  ;;  %v3412_v32 = vadd.f32 1.0, %v6240_v36 }
 0xbd4   :  { %6245 = vrcp.f32 %v3405_v31 }
 0xbd5   :  { %6247 = vrcp.f32 %v3412_v32 }
 0xbdd   :  { %v6244_v43 = vpop.eup %6243 }
 0xbde   :  { %v6246_v13 = vpop.eup %6245  ;;  %v3416_v3 = vmul.f32 %v6244_v43, %v6242_v55 }
 0xbdf   :  { %v3415_v63 = vmul.f32 %v6246_v13, %v8142_v12  ;;  %v6248_v56 = vpop.eup %6247 }
 0xbe1   :  { %v3417_v62 = vadd.f32 %v3416_v3, %v3415_v63 }
 0xbe3   :  { %6249 = vtanh.f32 %v3417_v62  ;;  %v8195_v49 = vsel %vm7256_vm8, %v3417_v62, %v8142_v12 }
 0xbed   :  { %v6250_v6 = vpop.eup %6249 }
 0xbee   :  { %v3419_v19 = vmul.f32 %v6250_v6, %v6248_v56 }
 0xbf0   :  { %v8200_v35 = vsel %vm7256_vm8, %v3419_v19, %v8149_v54 }
 0xbf1   :  { %3499 = vmatmul.mubr.f32.vlgmr.msra.gmra.mrb[54].mxu0 %v8200_v35  ;;  %3570 = vmatmul.mubr.f32.vlgmr.msra.gmra.mrb[54].mxu1 %v8200_v35 }
 0xbf2   :  { %5695 = vmatpush1.bf16.msra.mxu0 %v7745_v53  ;;  %5727 = vmatpush1.bf16.msra.mxu1 %v7747_v58 }
 0xbf3   :  { %5697 = vmatprep.subr.bf16.mxu0 %v7749_v23  ;;  %5729 = vmatprep.subr.bf16.mxu1 %v7751_v28 }
 0xbf4   :  { %3674 = vmatprep.mubr.f32.mxu0 %v8627_v60  ;;  %3745 = vmatprep.mubr.f32.mxu1 %v8627_v60 }
 0xbf6   :  { %5699 = vmatpush1.bf16.msra.mxu0 %v7755_v52  ;;  %5731 = vmatpush1.bf16.msra.mxu1 %v7757_v0 }
 0xbf7   :  { %5701 = vmatprep.subr.bf16.mxu0 %v7763_v57  ;;  %5733 = vmatprep.subr.bf16.mxu1 %v7765_v15 }
 0xbfa   :  { %5703 = vmatpush1.bf16.msra.mxu0 %v7769_v2  ;;  %5735 = vmatpush1.bf16.msra.mxu1 %v7771_v38 }
 0xbfb   :  { %5705 = vmatprep.subr.bf16.mxu0 %v7777_v61  ;;  %5737 = vmatprep.subr.bf16.mxu1 %v7779_v1 }
 0xbfe   :  { %5707 = vmatpush1.bf16.msra.mxu0 %v7783_v20  ;;  %5739 = vmatpush1.bf16.msra.mxu1 %v7785_v24 }
 0xbff   :  { %5709 = vmatprep.subr.bf16.mxu0 %v7791_v37  ;;  %5741 = vmatprep.subr.bf16.mxu1 %v7793_v40 }
 0xc02   :  { %5711 = vmatpush1.bf16.msra.mxu0 %v7797_v5  ;;  %5743 = vmatpush1.bf16.msra.mxu1 %v7799_v9 }
 0xc03   :  { %5713 = vmatprep.subr.bf16.mxu0 %v7805_v26  ;;  %5745 = vmatprep.subr.bf16.mxu1 %v7807_v8 }
 0xc06   :  { %5715 = vmatpush1.bf16.msra.mxu0 %v7811_v29  ;;  %5747 = vmatpush1.bf16.msra.mxu1 %v7813_v22 }
 0xc07   :  { %5717 = vmatprep.subr.bf16.mxu0 %v7819_v10  ;;  %5749 = vmatprep.subr.bf16.mxu1 %v7821_v16 }
 0xc0a   :  { %5719 = vmatpush1.bf16.msra.mxu0 %v7825_v45  ;;  %5751 = vmatpush1.bf16.msra.mxu1 %v7827_v39 }
 0xc0b   :  { %5721 = vmatprep.subr.bf16.mxu0 %v7833_v50  ;;  %5753 = vmatprep.subr.bf16.mxu1 %v8697_v33 }
 0xc0e   :  { %5723 = vmatpush1.bf16.msra.mxu0 %v8698_v44  ;;  %5755 = vmatpush1.bf16.msra.mxu1 %v8699_v42 }
 0xc0f   :  { %5757 = vmatprep.subr.bf16.mxu0 %v8700_v18  ;;  %5789 = vmatprep.subr.bf16.mxu1 %v8701_v41 }
 0xcc4   :  { %v3500_v12 = vpop.f32.mrb[54].mxu0  ;;  %v3571_v54 = vpop.f32.mrb[54].mxu1 }
 0xcc5   :  { %v3576_v47 = vadd.f32 %v3500_v12, %v8704_v21  ;;  %v3578_v46 = vadd.f32 %v3571_v54, %v8705_v4  ;;  %v3502_v27 = vpop.f32.mrb[55].mxu0  ;;  %v3573_v11 = vpop.f32.mrb[55].mxu1 }
 0xcc6   :  { %v3577_v17 = vadd.f32 %v3502_v27, %v8706_v14  ;;  %v3579_v51 = vadd.f32 %v3573_v11, %v8707_v59  ;;  %v8709_v14 = vld [vmem:[#allocation29_spill] sm:$0xff]  ;;  %v8710_v59 = vld [vmem:[#allocation30_spill] sm:$0xff] }
 0xcc7   :  { %v4546_v31 = vmul.f32 -1.442695, %v3576_v47 }
 0xcc8   :  { %v4547_v36 = vmul.f32 -1.442695, %v3577_v17  ;;  %v4548_v55 = vmul.f32 -1.442695, %v3579_v51 }
 0xcc9   :  { %6251 = vpow2.f32 %v4546_v31 }
 0xcca   :  { %6253 = vpow2.f32 %v4547_v36 }
 0xccb   :  { %6255 = vpow2.f32 %v4548_v55  ;;  %v8711_v55 = vld [vmem:[#allocation33_spill] sm:$0xff] }
 0xccc   :  { %6257 = vtanh.f32 %v3578_v46 }
 0xcd3   :  { %v6252_v43 = vpop.eup %6251 }
 0xcd4   :  { %v6254_v13 = vpop.eup %6253  ;;  %v3583_v3 = vadd.f32 1.0, %v6252_v43 }
 0xcd5   :  { %v3589_v32 = vadd.f32 1.0, %v6254_v13  ;;  %v6256_v63 = vpop.eup %6255  ;;  %v8712_v13 = vld [vmem:[#allocation13_spill] sm:$0xff] }
 0xcd6   :  { %6259 = vrcp.f32 %v3583_v3  ;;  %v6258_v62 = vpop.eup %6257  ;;  %v3596_v19 = vadd.f32 1.0, %v6256_v63 }
 0xcd7   :  { %6261 = vrcp.f32 %v3589_v32 }
 0xcd8   :  { %6263 = vrcp.f32 %v3596_v19 }
 0xce0   :  { %v6260_v48 = vpop.eup %6259 }
 0xce1   :  { %v6262_v56 = vpop.eup %6261  ;;  %v3600_v6 = vmul.f32 %v6260_v48, %v6258_v62 }
 0xce2   :  { %v3599_v12 = vmul.f32 %v6262_v56, %v8195_v49  ;;  %v6264_v4 = vpop.eup %6263 }
 0xce4   :  { %v3601_v54 = vadd.f32 %v3600_v6, %v3599_v12 }
 0xce6   :  { %6265 = vtanh.f32 %v3601_v54  ;;  %v8246_v47 = vsel %vm7318_vm9, %v3601_v54, %v8195_v49 }
 0xcf0   :  { %v6266_v46 = vpop.eup %6265 }
 0xcf1   :  { %v3603_v27 = vmul.f32 %v6266_v46, %v6264_v4 }
 0xcf3   :  { %v8251_v11 = vsel %vm7318_vm9, %v3603_v27, %v8200_v35 }
 0xcf4   :  { %3675 = vmatmul.mubr.f32.vlgmr.msra.gmra.mrb[56].mxu0 %v8251_v11  ;;  %3746 = vmatmul.mubr.f32.vlgmr.msra.gmra.mrb[56].mxu1 %v8251_v11 }
 0xcf5   :  { %5759 = vmatpush1.bf16.msra.mxu0 %v7745_v53  ;;  %5791 = vmatpush1.bf16.msra.mxu1 %v7747_v58 }
 0xcf6   :  { %5761 = vmatprep.subr.bf16.mxu0 %v7749_v23  ;;  %5793 = vmatprep.subr.bf16.mxu1 %v7751_v28 }
 0xcf7   :  { %3850 = vmatprep.mubr.f32.mxu0 %v8627_v60  ;;  %3921 = vmatprep.mubr.f32.mxu1 %v8627_v60 }
 0xcf9   :  { %5763 = vmatpush1.bf16.msra.mxu0 %v7755_v52  ;;  %5795 = vmatpush1.bf16.msra.mxu1 %v7757_v0 }
 0xcfa   :  { %5765 = vmatprep.subr.bf16.mxu0 %v7763_v57  ;;  %5797 = vmatprep.subr.bf16.mxu1 %v7765_v15 }
 0xcfd   :  { %5767 = vmatpush1.bf16.msra.mxu0 %v7769_v2  ;;  %5799 = vmatpush1.bf16.msra.mxu1 %v7771_v38 }
 0xcfe   :  { %5769 = vmatprep.subr.bf16.mxu0 %v7777_v61  ;;  %5801 = vmatprep.subr.bf16.mxu1 %v7779_v1 }
 0xd01   :  { %5771 = vmatpush1.bf16.msra.mxu0 %v7783_v20  ;;  %5803 = vmatpush1.bf16.msra.mxu1 %v7785_v24 }
 0xd02   :  { %5773 = vmatprep.subr.bf16.mxu0 %v7791_v37  ;;  %5805 = vmatprep.subr.bf16.mxu1 %v7793_v40 }
 0xd05   :  { %5775 = vmatpush1.bf16.msra.mxu0 %v7797_v5  ;;  %5807 = vmatpush1.bf16.msra.mxu1 %v7799_v9 }
 0xd06   :  { %5777 = vmatprep.subr.bf16.mxu0 %v7805_v26  ;;  %5809 = vmatprep.subr.bf16.mxu1 %v7807_v8 }
 0xd09   :  { %5779 = vmatpush1.bf16.msra.mxu0 %v7811_v29  ;;  %5811 = vmatpush1.bf16.msra.mxu1 %v7813_v22 }
 0xd0a   :  { %5781 = vmatprep.subr.bf16.mxu0 %v7819_v10  ;;  %5813 = vmatprep.subr.bf16.mxu1 %v7821_v16 }
 0xd0d   :  { %5783 = vmatpush1.bf16.msra.mxu0 %v7825_v45  ;;  %5815 = vmatpush1.bf16.msra.mxu1 %v7827_v39 }
 0xd0e   :  { %5785 = vmatprep.subr.bf16.mxu0 %v7833_v50  ;;  %5817 = vmatprep.subr.bf16.mxu1 %v8697_v33 }
 0xd11   :  { %5787 = vmatpush1.bf16.msra.mxu0 %v8698_v44  ;;  %5819 = vmatpush1.bf16.msra.mxu1 %v8699_v42 }
 0xd12   :  { %5821 = vmatprep.subr.bf16.mxu0 %v8700_v18  ;;  %5853 = vmatprep.subr.bf16.mxu1 %v8701_v41 }
 0xdc7   :  { %v3676_v49 = vpop.f32.mrb[56].mxu0  ;;  %v3747_v35 = vpop.f32.mrb[56].mxu1 }
 0xdc8   :  { %v3752_v17 = vadd.f32 %v3676_v49, %v8709_v14  ;;  %v3754_v51 = vadd.f32 %v3747_v35, %v8710_v59  ;;  %v3678_v31 = vpop.f32.mrb[57].mxu0  ;;  %v3749_v36 = vpop.f32.mrb[57].mxu1 }
 0xdc9   :  { %v3753_v43 = vadd.f32 %v3678_v31, %v8711_v55  ;;  %v3755_v3 = vadd.f32 %v3749_v36, %v8712_v13  ;;  %v8714_v55 = vld [vmem:[#allocation15_spill] sm:$0xff]  ;;  %v8715_v13 = vld [vmem:[#allocation14_spill] sm:$0xff] }
 0xdca   :  { %v4549_v32 = vmul.f32 -1.442695, %v3752_v17 }
 0xdcb   :  { %v4550_v63 = vmul.f32 -1.442695, %v3753_v43  ;;  %v4551_v62 = vmul.f32 -1.442695, %v3755_v3 }
 0xdcc   :  { %6267 = vpow2.f32 %v4549_v32 }
 0xdcd   :  { %6269 = vpow2.f32 %v4550_v63 }
 0xdce   :  { %6271 = vpow2.f32 %v4551_v62 }
 0xdcf   :  { %6273 = vtanh.f32 %v3754_v51 }
 0xdd6   :  { %v6268_v48 = vpop.eup %6267 }
 0xdd7   :  { %v6270_v56 = vpop.eup %6269  ;;  %v3759_v6 = vadd.f32 1.0, %v6268_v48  ;;  %v8716_v48 = vld [vmem:[#allocation16_spill] sm:$0xff] }
 0xdd8   :  { %v3765_v19 = vadd.f32 1.0, %v6270_v56  ;;  %v6272_v12 = vpop.eup %6271 }
 0xdd9   :  { %6275 = vrcp.f32 %v3759_v6  ;;  %v6274_v54 = vpop.eup %6273  ;;  %v3772_v27 = vadd.f32 1.0, %v6272_v12 }
 0xdda   :  { %6277 = vrcp.f32 %v3765_v19 }
 0xddb   :  { %6279 = vrcp.f32 %v3772_v27 }
 0xde3   :  { %v6276_v21 = vpop.eup %6275 }
 0xde4   :  { %v6278_v4 = vpop.eup %6277  ;;  %v3776_v46 = vmul.f32 %v6276_v21, %v6274_v54 }
 0xde5   :  { %v3775_v49 = vmul.f32 %v6278_v4, %v8246_v47  ;;  %v6280_v59 = vpop.eup %6279 }
 0xde7   :  { %v3777_v35 = vadd.f32 %v3776_v46, %v3775_v49 }
 0xde9   :  { %6281 = vtanh.f32 %v3777_v35  ;;  %v8297_v17 = vsel %vm7380_vm10, %v3777_v35, %v8246_v47 }
 0xdf3   :  { %v6282_v51 = vpop.eup %6281 }
 0xdf4   :  { %v3779_v31 = vmul.f32 %v6282_v51, %v6280_v59  ;;  %v4324_v51 = vld [vmem:[%s8552_s8 + $0x78] sm:$0xff] }
 0xdf6   :  { %v8302_v36 = vsel %vm7380_vm10, %v3779_v31, %v8251_v11 }
 0xdf7   :  { %3851 = vmatmul.mubr.f32.vlgmr.msra.gmra.mrb[58].mxu0 %v8302_v36  ;;  %3922 = vmatmul.mubr.f32.vlgmr.msra.gmra.mrb[58].mxu1 %v8302_v36 }
 0xdf8   :  { %5823 = vmatpush1.bf16.msra.mxu0 %v7745_v53  ;;  %5855 = vmatpush1.bf16.msra.mxu1 %v7747_v58 }
 0xdf9   :  { %5825 = vmatprep.subr.bf16.mxu0 %v7749_v23  ;;  %5857 = vmatprep.subr.bf16.mxu1 %v7751_v28 }
 0xdfa   :  { %4026 = vmatprep.mubr.f32.mxu0 %v8627_v60  ;;  %4097 = vmatprep.mubr.f32.mxu1 %v8627_v60 }
 0xdfc   :  { %5827 = vmatpush1.bf16.msra.mxu0 %v7755_v52  ;;  %5859 = vmatpush1.bf16.msra.mxu1 %v7757_v0 }
 0xdfd   :  { %5829 = vmatprep.subr.bf16.mxu0 %v7763_v57  ;;  %5861 = vmatprep.subr.bf16.mxu1 %v7765_v15 }
 0xe00   :  { %5831 = vmatpush1.bf16.msra.mxu0 %v7769_v2  ;;  %5863 = vmatpush1.bf16.msra.mxu1 %v7771_v38 }
 0xe01   :  { %5833 = vmatprep.subr.bf16.mxu0 %v7777_v61  ;;  %5865 = vmatprep.subr.bf16.mxu1 %v7779_v1 }
 0xe04   :  { %5835 = vmatpush1.bf16.msra.mxu0 %v7783_v20  ;;  %5867 = vmatpush1.bf16.msra.mxu1 %v7785_v24 }
 0xe05   :  { %5837 = vmatprep.subr.bf16.mxu0 %v7791_v37  ;;  %5869 = vmatprep.subr.bf16.mxu1 %v7793_v40 }
 0xe08   :  { %5839 = vmatpush1.bf16.msra.mxu0 %v7797_v5  ;;  %5871 = vmatpush1.bf16.msra.mxu1 %v7799_v9 }
 0xe09   :  { %5841 = vmatprep.subr.bf16.mxu0 %v7805_v26  ;;  %5873 = vmatprep.subr.bf16.mxu1 %v7807_v8 }
 0xe0c   :  { %5843 = vmatpush1.bf16.msra.mxu0 %v7811_v29  ;;  %5875 = vmatpush1.bf16.msra.mxu1 %v7813_v22 }
 0xe0d   :  { %5845 = vmatprep.subr.bf16.mxu0 %v7819_v10  ;;  %5877 = vmatprep.subr.bf16.mxu1 %v7821_v16 }
 0xe10   :  { %5847 = vmatpush1.bf16.msra.mxu0 %v7825_v45  ;;  %5879 = vmatpush1.bf16.msra.mxu1 %v7827_v39 }
 0xe11   :  { %5849 = vmatprep.subr.bf16.mxu0 %v7833_v50  ;;  %5881 = vmatprep.subr.bf16.mxu1 %v8697_v33 }
 0xe14   :  { %5851 = vmatpush1.bf16.msra.mxu0 %v8698_v44  ;;  %5883 = vmatpush1.bf16.msra.mxu1 %v8699_v42 }
 0xe15   :  { %5885 = vmatprep.subr.bf16.mxu0 %v8700_v18  ;;  %5917 = vmatprep.subr.bf16.mxu1 %v8701_v41 }
 0xeca   :  { %v3852_v47 = vpop.f32.mrb[58].mxu0  ;;  %v3923_v11 = vpop.f32.mrb[58].mxu1 }
 0xecb   :  { %v3928_v43 = vadd.f32 %v3852_v47, %v8714_v55  ;;  %v3930_v3 = vadd.f32 %v3923_v11, %v8715_v13  ;;  %v3854_v32 = vpop.f32.mrb[59].mxu0  ;;  %v3925_v63 = vpop.f32.mrb[59].mxu1  ;;  %v4310_v13 = vld [vmem:[%s8552_s8 + $0x8] sm:$0xff] }
 0xecc   :  { %v3929_v62 = vadd.f32 %v3854_v32, %v8002_v7  ;;  %v3931_v56 = vadd.f32 %v3925_v63, %v8716_v48  ;;  %v6397_v32 = vmov 0.0|0.0   ;;  %v4311_v63 = vld [vmem:[%s8552_s8 + $0x10] sm:$0xff] }
 0xecd   :  { %v4552_v6 = vmul.f32 -1.442695, %v3928_v43 }
 0xece   :  { %v4553_v19 = vmul.f32 -1.442695, %v3929_v62  ;;  %v4554_v12 = vmul.f32 -1.442695, %v3931_v56  ;;  %v4312_v62 = vld [vmem:[%s8552_s8 + $0x18] sm:$0xff]  ;;  %v4313_v56 = vld [vmem:[%s8552_s8 + $0x20] sm:$0xff] }
 0xecf   :  { %6283 = vpow2.f32 %v4552_v6  ;;  %v5952_v48 = vpack.c.bf16 %v4312_v62, %v4311_v63  ;;  %v4314_v6 = vld [vmem:[%s8552_s8 + $0x28] sm:$0xff] }
 0xed0   :  { %6285 = vpow2.f32 %v4553_v19  ;;  %v5955_v19 = vpack.c.bf16 %v4314_v6, %v4313_v56 }
 0xed1   :  { %6287 = vpow2.f32 %v4554_v12  ;;  %v4315_v12 = vld [vmem:[%s8552_s8 + $0x30] sm:$0xff] }
 0xed2   :  { %6289 = vtanh.f32 %v3930_v3 }
 0xed9   :  { %v6284_v18 = vpop.eup %6283 }
 0xeda   :  { %v6286_v54 = vpop.eup %6285  ;;  %v3935_v41 = vadd.f32 1.0, %v6284_v18  ;;  %v4316_v18 = vld [vmem:[%s8552_s8 + $0x38] sm:$0xff] }
 0xedb   :  { %v3941_v21 = vadd.f32 1.0, %v6286_v54  ;;  %v6288_v4 = vpop.eup %6287  ;;  %v5958_v54 = vpack.c.bf16 %v4316_v18, %v4315_v12 }
 0xedc   :  { %6291 = vrcp.f32 %v3935_v41  ;;  %v6290_v46 = vpop.eup %6289  ;;  %v3948_v35 = vadd.f32 1.0, %v6288_v4  ;;  %v4317_v41 = vld [vmem:[%s8552_s8 + $0x40] sm:$0xff] }
 0xedd   :  { %6293 = vrcp.f32 %v3941_v21  ;;  %v4318_v21 = vld [vmem:[%s8552_s8 + $0x48] sm:$0xff] }
 0xede   :  { %6295 = vrcp.f32 %v3948_v35  ;;  %v5961_v4 = vpack.c.bf16 %v4318_v21, %v4317_v41  ;;  %v4322_v35 = vld [vmem:[%s8552_s8 + $0x68] sm:$0xff] }
 0xee6   :  { %v6292_v27 = vpop.eup %6291 }
 0xee7   :  { %v6294_v49 = vpop.eup %6293  ;;  %v3952_v7 = vmul.f32 %v6292_v27, %v6290_v46  ;;  %v4319_v46 = vld [vmem:[%s8552_s8 + $0x50] sm:$0xff]  ;;  %v4320_v27 = vld [vmem:[%s8552_s8 + $0x58] sm:$0xff] }
 0xee8   :  { %v3951_v14 = vmul.f32 %v6294_v49, %v8297_v17  ;;  %v6296_v47 = vpop.eup %6295  ;;  %v5964_v49 = vpack.c.bf16 %v4320_v27, %v4319_v46 }
 0xeea   :  { %v3953_v59 = vadd.f32 %v3952_v7, %v3951_v14  ;;  %v4321_v7 = vld [vmem:[%s8552_s8 + $0x60] sm:$0xff] }
 0xeeb   :  { %v5967_v14 = vpack.c.bf16 %v4322_v35, %v4321_v7 }
 0xeec   :  { %6297 = vtanh.f32 %v3953_v59  ;;  %v8348_v31 = vsel %vm7442_vm11, %v3953_v59, %v8297_v17  ;;  %v4323_v59 = vld [vmem:[%s8552_s8 + $0x70] sm:$0xff] }
 0xef6   :  { %v6298_v11 = vpop.eup %6297 }
 0xef7   :  { %v3955_v55 = vmul.f32 %v6298_v11, %v6296_v47  ;;  %v5970_v47 = vpack.c.bf16 %v4324_v51, %v4323_v59  ;;  %v4404_v11 = vld [vmem:[%s8554_s10 + $0x8] sm:$0xff] }
 0xef9   :  { %v8353_v43 = vsel %vm7442_vm11, %v3955_v55, %v8302_v36  ;;  %v4309_v36 = vld [vmem:[%s8552_s8] sm:$0xff]  ;;  %v4405_v55 = vld [vmem:[%s8554_s10 + $0x10] sm:$0xff] }
 0xefa   :  { %4027 = vmatmul.mubr.f32.vlgmr.msra.gmra.mrb[60].mxu0 %v8353_v43  ;;  %4098 = vmatmul.mubr.f32.vlgmr.msra.gmra.mrb[60].mxu1 %v8353_v43  ;;  %v5949_v3 = vpack.c.bf16 %v4310_v13, %v4309_v36 }
 0xefb   :  { %5887 = vmatpush1.bf16.msra.mxu0 %v7745_v53  ;;  %5919 = vmatpush1.bf16.msra.mxu1 %v7747_v58 }
 0xefc   :  { %5889 = vmatprep.subr.bf16.mxu0 %v7749_v23  ;;  %5921 = vmatprep.subr.bf16.mxu1 %v7751_v28  ;;  %v8718_v23 = vld [vmem:[#allocation34_spill] sm:$0xff] }
 0xefd   :  { %4202 = vmatprep.mubr.f32.mxu0 %v8627_v60  ;;  %4273 = vmatprep.mubr.f32.mxu1 %v8627_v60 }
 0xeff   :  { %5891 = vmatpush1.bf16.msra.mxu0 %v7755_v52  ;;  %5923 = vmatpush1.bf16.msra.mxu1 %v7757_v0  ;;  %v8719_v52 = vld [vmem:[#allocation35_spill] sm:$0xff] }
 0xf00   :  { %5893 = vmatprep.subr.bf16.mxu0 %v7763_v57  ;;  %5925 = vmatprep.subr.bf16.mxu1 %v7765_v15 }
 0xf03   :  { %5895 = vmatpush1.bf16.msra.mxu0 %v7769_v2  ;;  %5927 = vmatpush1.bf16.msra.mxu1 %v7771_v38  ;;  %v8720_v38 = vld [vmem:[#allocation36_spill] sm:$0xff] }
 0xf04   :  { %5897 = vmatprep.subr.bf16.mxu0 %v7777_v61  ;;  %5929 = vmatprep.subr.bf16.mxu1 %v7779_v1 }
 0xf07   :  { %5899 = vmatpush1.bf16.msra.mxu0 %v7783_v20  ;;  %5931 = vmatpush1.bf16.msra.mxu1 %v7785_v24 }
 0xf08   :  { %5901 = vmatprep.subr.bf16.mxu0 %v7791_v37  ;;  %5933 = vmatprep.subr.bf16.mxu1 %v7793_v40 }
 0xf0b   :  { %5903 = vmatpush1.bf16.msra.mxu0 %v7797_v5  ;;  %5935 = vmatpush1.bf16.msra.mxu1 %v7799_v9 }
 0xf0c   :  { %5905 = vmatprep.subr.bf16.mxu0 %v7805_v26  ;;  %5937 = vmatprep.subr.bf16.mxu1 %v7807_v8 }
 0xf0f   :  { %5907 = vmatpush1.bf16.msra.mxu0 %v7811_v29  ;;  %5939 = vmatpush1.bf16.msra.mxu1 %v7813_v22 }
 0xf10   :  { %5909 = vmatprep.subr.bf16.mxu0 %v7819_v10  ;;  %5941 = vmatprep.subr.bf16.mxu1 %v7821_v16 }
 0xf13   :  { %5911 = vmatpush1.bf16.msra.mxu0 %v7825_v45  ;;  %5943 = vmatpush1.bf16.msra.mxu1 %v7827_v39 }
 0xf14   :  { %5913 = vmatprep.subr.bf16.mxu0 %v7833_v50  ;;  %5945 = vmatprep.subr.bf16.mxu1 %v8697_v33  ;;  %v4417_v50 = vld [vmem:[%s8554_s10 + $0x70] sm:$0xff] }
 0xf17   :  { %5915 = vmatpush1.bf16.msra.mxu0 %v8698_v44  ;;  %5947 = vmatpush1.bf16.msra.mxu1 %v8699_v42 }
 0xf18   :  { %5948 = vmatprep.subr.bf16.mxu0 %v6397_v32  ;;  %5972 = vmatprep.subr.bf16.mxu1 %v6397_v32 }
 0xfcd   :  { %v4028_v53 = vpop.f32.mrb[60].mxu0  ;;  %v4099_v58 = vpop.f32.mrb[60].mxu1 }
 0xfce   :  { %v4104_v28 = vadd.f32 %v4028_v53, %v8718_v23  ;;  %v4106_v0 = vadd.f32 %v4099_v58, %v8719_v52  ;;  %v4030_v57 = vpop.f32.mrb[61].mxu0  ;;  %v4101_v15 = vpop.f32.mrb[61].mxu1  ;;  %v4406_v53 = vld [vmem:[%s8554_s10 + $0x18] sm:$0xff]  ;;  %v4407_v23 = vld [vmem:[%s8554_s10 + $0x20] sm:$0xff] }
 0xfcf   :  { %v4105_v2 = vadd.f32 %v4030_v57, %v8045_v30  ;;  %v4107_v61 = vadd.f32 %v4101_v15, %v8720_v38  ;;  %v5976_v58 = vpack.c.bf16 %v4406_v53, %v4405_v55  ;;  %v4410_v57 = vld [vmem:[%s8554_s10 + $0x38] sm:$0xff]  ;;  %v4412_v38 = vld [vmem:[%s8554_s10 + $0x48] sm:$0xff] }
 0xfd0   :  { %v4555_v1 = vmul.f32 -1.442695, %v4104_v28  ;;  %v4408_v28 = vld [vmem:[%s8554_s10 + $0x28] sm:$0xff] }
 0xfd1   :  { %v4556_v20 = vmul.f32 -1.442695, %v4105_v2  ;;  %v4557_v24 = vmul.f32 -1.442695, %v4107_v61  ;;  %v5979_v52 = vpack.c.bf16 %v4408_v28, %v4407_v23  ;;  %v4411_v2 = vld [vmem:[%s8554_s10 + $0x40] sm:$0xff] }
 0xfd2   :  { %6299 = vpow2.f32 %v4555_v1  ;;  %v5985_v61 = vpack.c.bf16 %v4412_v38, %v4411_v2  ;;  %v4413_v1 = vld [vmem:[%s8554_s10 + $0x50] sm:$0xff] }
 0xfd3   :  { %6301 = vpow2.f32 %v4556_v20  ;;  %v4414_v20 = vld [vmem:[%s8554_s10 + $0x58] sm:$0xff] }
 0xfd4   :  { %6303 = vpow2.f32 %v4557_v24  ;;  %v5988_v24 = vpack.c.bf16 %v4414_v20, %v4413_v1 }
 0xfd5   :  { %6305 = vtanh.f32 %v4106_v0  ;;  %v4409_v0 = vld [vmem:[%s8554_s10 + $0x30] sm:$0xff] }
 0xfd6   :  { %v5982_v15 = vpack.c.bf16 %v4410_v57, %v4409_v0 }
 0xfdc   :  { %v6300_v37 = vpop.eup %6299 }
 0xfdd   :  { %v6302_v40 = vpop.eup %6301  ;;  %v4111_v5 = vadd.f32 1.0, %v6300_v37  ;;  %v4415_v37 = vld [vmem:[%s8554_s10 + $0x60] sm:$0xff] }
 0xfde   :  { %v4117_v9 = vadd.f32 1.0, %v6302_v40  ;;  %v6304_v26 = vpop.eup %6303  ;;  %v4416_v40 = vld [vmem:[%s8554_s10 + $0x68] sm:$0xff] }
 0xfdf   :  { %6307 = vrcp.f32 %v4111_v5  ;;  %v6306_v8 = vpop.eup %6305  ;;  %v4124_v16 = vadd.f32 1.0, %v6304_v26  ;;  %v5991_v5 = vpack.c.bf16 %v4416_v40, %v4415_v37 }
 0xfe0   :  { %6309 = vrcp.f32 %v4117_v9 }
 0xfe1   :  { %6311 = vrcp.f32 %v4124_v16 }
 0xfe9   :  { %v6308_v29 = vpop.eup %6307 }
 0xfea   :  { %v6310_v22 = vpop.eup %6309  ;;  %v4128_v10 = vmul.f32 %v6308_v29, %v6306_v8  ;;  %v8722_v8 = vld [vmem:[#allocation37_spill] sm:$0xff] }
 0xfeb   :  { %v4127_v45 = vmul.f32 %v6310_v22, %v8348_v31  ;;  %v6312_v33 = vpop.eup %6311  ;;  %v8723_v22 = vld [vmem:[#allocation38_spill] sm:$0xff] }
 0xfed   :  { %v8394_v39 = vadd.f32 %v4128_v10, %v4127_v45 }
 0xfef   :  { %6313 = vtanh.f32 %v8394_v39  ;;  %v4133_v30 = vsel %vm7502_vm12, %v8394_v39, %v8348_v31  ;;  %v4418_v31 = vld [vmem:[%s8554_s10 + $0x78] sm:$0xff] }
 0xff0   :  { %v5994_v39 = vpack.c.bf16 %v4418_v31, %v4417_v50 }
 0xff9   :  { %v6314_v44 = vpop.eup %6313 }
 0xffa   :  { %v4131_v42 = vmul.f32 %v6314_v44, %v6312_v33 }
 0xffc   :  { %v8404_v17 = vsel %vm7502_vm12, %v4131_v42, %v8353_v43 }
 0xffd   :  { %4203 = vmatmul.mubr.f32.vlgmr.msra.gmra.mrb[62].mxu0 %v8404_v17  ;;  %4274 = vmatmul.mubr.f32.vlgmr.msra.gmra.mrb[62].mxu1 %v8404_v17 }
 0xffe   :  { %5950 = vmatpush3.bf16.msra.mxu0 %v5949_v3  ;;  %4630 = vmatprep.mubr.msk.f32.mxu0 %vm6398_vm14, %v8627_v60 }
 0xfff   :  { %5951 = vmatprep.subr.bf16.mxu0 %v6397_v32  ;;  %4665 = vmatprep.mubr.msk.f32.mxu1 %vm6398_vm14, %v8627_v60  ;;  %v4403_v60 = vld [vmem:[%s8554_s10] sm:$0xff] }
0x1000   :  { %v5973_v43 = vpack.c.bf16 %v4404_v11, %v4403_v60 }
0x1002   :  { %5953 = vmatpush3.bf16.msra.mxu0 %v5952_v48  ;;  %5974 = vmatpush3.bf16.msra.mxu1 %v5973_v43 }
0x1003   :  { %5954 = vmatprep.subr.bf16.mxu0 %v6397_v32  ;;  %5975 = vmatprep.subr.bf16.mxu1 %v6397_v32 }
0x1006   :  { %5956 = vmatpush3.bf16.msra.mxu0 %v5955_v19  ;;  %5977 = vmatpush3.bf16.msra.mxu1 %v5976_v58 }
0x1007   :  { %5957 = vmatprep.subr.bf16.mxu0 %v6397_v32  ;;  %5978 = vmatprep.subr.bf16.mxu1 %v6397_v32 }
0x100a   :  { %5959 = vmatpush3.bf16.msra.mxu0 %v5958_v54  ;;  %5980 = vmatpush3.bf16.msra.mxu1 %v5979_v52 }
0x100b   :  { %5960 = vmatprep.subr.bf16.mxu0 %v6397_v32  ;;  %5981 = vmatprep.subr.bf16.mxu1 %v6397_v32 }
0x100e   :  { %5962 = vmatpush3.bf16.msra.mxu0 %v5961_v4  ;;  %5983 = vmatpush3.bf16.msra.mxu1 %v5982_v15 }
0x100f   :  { %5963 = vmatprep.subr.bf16.mxu0 %v6397_v32  ;;  %5984 = vmatprep.subr.bf16.mxu1 %v6397_v32 }
0x1012   :  { %5965 = vmatpush3.bf16.msra.mxu0 %v5964_v49  ;;  %5986 = vmatpush3.bf16.msra.mxu1 %v5985_v61 }
0x1013   :  { %5966 = vmatprep.subr.bf16.mxu0 %v6397_v32  ;;  %5987 = vmatprep.subr.bf16.mxu1 %v6397_v32 }
0x1016   :  { %5968 = vmatpush3.bf16.msra.mxu0 %v5967_v14  ;;  %5989 = vmatpush3.bf16.msra.mxu1 %v5988_v24 }
0x1017   :  { %5969 = vmatprep.subr.bf16.mxu0 %v6397_v32  ;;  %5990 = vmatprep.subr.bf16.mxu1 %v6397_v32 }
0x101a   :  { %5971 = vmatpush3.bf16.msra.mxu0 %v5970_v47  ;;  %5992 = vmatpush3.bf16.msra.mxu1 %v5991_v5 }
0x101b   :  { %5993 = vmatprep.subr.bf16.mxu1 %v6397_v32 }
0x101e   :  { %5995 = vmatpush3.bf16.msra.mxu1 %v5994_v39 }
0x10d0   :  { %v4204_v9 = vpop.f32.mrb[62].mxu0  ;;  %v4275_v26 = vpop.f32.mrb[62].mxu1 }
0x10d1   :  { %v4280_v29 = vadd.f32 %v4204_v9, %v8722_v8  ;;  %v4282_v10 = vadd.f32 %v4275_v26, %v8723_v22  ;;  %v4206_v16 = vpop.f32.mrb[63].mxu0  ;;  %v4277_v45 = vpop.f32.mrb[63].mxu1 }
0x10d2   :  { %v4281_v33 = vadd.f32 %v4206_v16, %v8082_v34  ;;  %v4283_v44 = vadd.f32 %v4277_v45, %v8086_v25 }
0x10d3   :  { %v4558_v42 = vmul.f32 -1.442695, %v4280_v29 }
0x10d4   :  { %v4559_v36 = vmul.f32 -1.442695, %v4281_v33  ;;  %v4560_v13 = vmul.f32 -1.442695, %v4283_v44 }
0x10d5   :  { %6315 = vpow2.f32 %v4558_v42 }
0x10d6   :  { %6317 = vpow2.f32 %v4559_v36 }
0x10d7   :  { %6319 = vpow2.f32 %v4560_v13 }
0x10d8   :  { %6321 = vtanh.f32 %v4282_v10 }
0x10df   :  { %v6316_v3 = vpop.eup %6315 }
0x10e0   :  { %v6318_v63 = vpop.eup %6317  ;;  %v4287_v32 = vadd.f32 1.0, %v6316_v3 }
0x10e1   :  { %v4293_v62 = vadd.f32 1.0, %v6318_v63  ;;  %v6320_v48 = vpop.eup %6319 }
0x10e2   :  { %6323 = vrcp.f32 %v4287_v32  ;;  %v6322_v56 = vpop.eup %6321  ;;  %v4300_v12 = vadd.f32 1.0, %v6320_v48 }
0x10e3   :  { %6325 = vrcp.f32 %v4293_v62 }
0x10e4   :  { %6327 = vrcp.f32 %v4300_v12 }
0x10ec   :  { %v6324_v6 = vpop.eup %6323 }
0x10ed   :  { %v6326_v19 = vpop.eup %6325  ;;  %v4304_v34 = vmul.f32 %v6324_v6, %v6322_v56 }
0x10ee   :  { %v4303_v25 = vmul.f32 %v6326_v19, %v4133_v30  ;;  %v6328_v54 = vpop.eup %6327  ;;  %v4561_v30 = vld [vmem:[%s8553_s9] ss:$0 sm:$0xff] }
0x10f0   :  { %v4305_v18 = vadd.f32 %v4304_v34, %v4303_v25 }
0x10f2   :  { %6329 = vtanh.f32 %v4305_v18 }
0x10fc   :  { %v6330_v41 = vpop.eup %6329 }
0x10fd   :  { %v4307_v21 = vmul.f32 %v6330_v41, %v6328_v54 }
0x10ff   :  { %v4308_v27 = vsel %vm2450_vm13, %v4307_v21, %v8404_v17  ;;  %v4562_v17 = vld [vmem:[%s8555_s11] ss:$0 sm:$0xff] }
0x1100   :  { %4631 = vmatmul.mubr.f32.vlgmr.msra.gmra.mrb[64].mxu0 %v4308_v27 }
0x11d3   :  { %v4398_v49 = vpop.f32.mrb[64].mxu0 }
0x11d4   :  { %v4399_v7 = vadd.f32 %v4561_v30, %v4398_v49  ;;  %v4632_v35 = vpop.f32.mrb[65].mxu0 }
0x11d6   :  { %v4402_v14 = vmax.f32 %v4399_v7, 0.0 }
0x11d8   :  { %4666 = vmatmul.mubr.f32.vlgmr.msra.gmra.mrb[64].mxu1 %v4402_v14 }
0x12ab   :  { %v4492_v59 = vpop.f32.mrb[64].mxu1 }
0x12ac   :  { %v4493_v51 = vadd.f32 %v4562_v17, %v4492_v59  ;;  %v4667_v47 = vpop.f32.mrb[65].mxu1 }
0x12ae   :  { %v4563_v60 = vmul.f32 -1.442695, %v4493_v51 }
0x12b0   :  { %6331 = vpow2.f32 %v4563_v60 }
0x12ba   :  { %v6332_v11 = vpop.eup %6331 }
0x12bb   :  { %v4499_v55 = vadd.f32 1.0, %v6332_v11 }
0x12bd   :  { %6333 = vrcp.f32 %v4499_v55 }
0x12c7   :  { %v6334_v43 = vpop.eup %6333 }
0x12c8   :  { %4502 = vst [vmem:[%s8556_s12] sm:$0xff] %v6334_v43 }
0x12c9   :  { %4507 = vsyncpa [#allocation5], 1 }
0x12ca   :  { %4508 = vsyncpa [#allocation7], 1 }

</bundles_post_ra>
